<compile_context>
chip_gen: v7x
topology: tpu7x:2x2x1
jax: 0.10.0
libtpu: 0.0.40
codegen_flags: <defaults>
</compile_context>

<pallas_src>
import numpy as np
import jax
import jax.numpy as jnp
from jax.experimental import pallas as pl
from jax.experimental.pallas import tpu as pltpu

EMBDIM = 20
NUM_HEADS = 4
MXU_DTYPE = jnp.bfloat16   # MXU input dtype; accumulation is always f32.


# -----------------------------------------------------------------------------
# Small helpers
# -----------------------------------------------------------------------------
def _round_up(x, m):
    return (x + m - 1) // m * m


def _pick_node_tile(n, cap=128):
    best = None
    for t in range(8, min(n, cap) + 1, 8):
        if n % t == 0:
            best = t
    return best if best is not None else n


def _normalize(x, gain, bias, eps=1e-6):
    """struct2seq `Normalize`: unbiased variance, sqrt(var+eps), /(sigma+eps).

    Exact f32 divide (approx reciprocal is reserved for the softmax)."""
    h = x.shape[-1]
    mu = jnp.mean(x, axis=-1, keepdims=True)
    var = jnp.sum((x - mu) ** 2, axis=-1, keepdims=True) * (1.0 / (h - 1))
    sigma = jnp.sqrt(var + eps)
    return gain * (x - mu) / (sigma + eps) + bias


def _head_block_matrix(h, num_heads):
    """[H, H] 0/1 matrix: blk[c, c'] = 1 iff c and c' belong to the same head."""
    d = h // num_heads
    c = np.arange(h)
    blk = ((c[:, None] // d) == (c[None, :] // d)).astype(np.float32)
    return jnp.asarray(blk, dtype=MXU_DTYPE)


# -----------------------------------------------------------------------------
# Row-tiled elementwise/matmul kernels (embeddings, W_s, output head)
# -----------------------------------------------------------------------------
def linear_kernel(x_ref, w_ref, b_ref, o_ref):
    o_ref[...] = (
        jnp.dot(x_ref[...].astype(MXU_DTYPE), w_ref[...],
                preferred_element_type=jnp.float32)
        + b_ref[...]
    )


def embed_kernel(x_ref, w1_ref, b1_ref, g_ref, nb_ref, w2_ref, b2_ref, o_ref):
    # Fused: feature Linear -> Normalize -> hidden projection Linear.
    y = (
        jnp.dot(x_ref[...].astype(MXU_DTYPE), w1_ref[...],
                preferred_element_type=jnp.float32)
        + b1_ref[...]
    )
    y = _normalize(y, g_ref[...], nb_ref[...])
    o_ref[...] = (
        jnp.dot(y.astype(MXU_DTYPE), w2_ref[...],
                preferred_element_type=jnp.float32)
        + b2_ref[...]
    )


def out_head_kernel(x_ref, w_ref, b_ref, o_ref):
    y = (
        jnp.dot(x_ref[...].astype(MXU_DTYPE), w_ref[...],
                preferred_element_type=jnp.float32)
        + b_ref[...]
    )
    y = 1.0 / (1.0 + jnp.exp(-y))                       # nn.Sigmoid
    nrm = jnp.sqrt(jnp.sum(y * y, axis=-1, keepdims=True))
    o_ref[...] = y / nrm                                # logits / ||logits||_2


def _row_tiled_call(kernel, x2d, consts, out_dim, row_tile=1024):
    """Run `kernel` over row tiles of x2d (pads rows to a multiple of the tile)."""
    m, cin = x2d.shape
    tile = min(row_tile, _round_up(m, 8))
    m_pad = _round_up(m, tile)
    if m_pad != m:
        x2d = jnp.pad(x2d, ((0, m_pad - m), (0, 0)))
    in_specs = [pl.BlockSpec((tile, cin), lambda i: (i, 0))]
    for c in consts:
        in_specs.append(pl.BlockSpec(c.shape, lambda i, nd=c.ndim: (0,) * nd))
    out = pl.pallas_call(
        kernel,
        out_shape=jax.ShapeDtypeStruct((m_pad, out_dim), jnp.float32),
        grid=(m_pad // tile,),
        in_specs=in_specs,
        out_specs=pl.BlockSpec((tile, out_dim), lambda i: (i, 0)),
        compiler_params=pltpu.CompilerParams(dimension_semantics=("parallel",)),
    )(x2d, *consts)
    return out[:m]


def pallas_linear(x2d, w, b):
    return _row_tiled_call(linear_kernel, x2d, (w, b.reshape(1, -1)), w.shape[1])


def pallas_embed(x2d, w1, b1, g, nb, w2, b2):
    return _row_tiled_call(
        embed_kernel, x2d,
        (w1, b1.reshape(1, -1), g.reshape(1, -1), nb.reshape(1, -1),
         w2, b2.reshape(1, -1)),
        w2.shape[1])


def pallas_out_head(x2d, w, b):
    return _row_tiled_call(out_head_kernel, x2d, (w, b.reshape(1, -1)), w.shape[1])


# -----------------------------------------------------------------------------
# Transformer layer kernel (encoder + decoder share one body; static flags)
# -----------------------------------------------------------------------------
def make_transformer_kernel(num_heads, masked_softmax, use_kv_scale, edge_factor):
    def kernel(hV_ref, hE_ref, eidx_ref, tbl_ref, mV_ref, mA_ref, sc_ref, hb_ref,
               wq_ref, wkve_ref, wkvn_ref, wo_ref,
               g1_ref, b1_ref, g2_ref, b2_ref,
               win_ref, bin_ref, wout_ref, bout_ref,
               o_ref):
        tn, h = hV_ref.shape[1], hV_ref.shape[2]
        k = eidx_ref.shape[2]
        n_full = tbl_ref.shape[1]
        d = h // num_heads

        hV = hV_ref[0]                     # [TN, H]       f32
        hE = hE_ref[0]                     # [TN*K, H]     bf16 (pre-flattened)

        # --- in-kernel neighbor gather: one-hot matmul against the resident
        #     per-batch node table (exact: 0/1 bf16 weights, f32 accumulation).
        eidx = eidx_ref[0]                 # [TN, K, 1]    int32
        iota_n = jax.lax.broadcasted_iota(jnp.int32, (tn, k, n_full), 2)
        onehot = (eidx == iota_n).astype(MXU_DTYPE).reshape(tn * k, n_full)
        g_nodes = jnp.dot(onehot, tbl_ref[0],
                          preferred_element_type=jnp.float32)       # [TN*K, Ht]

        # --- fused K|V projection, W_KV split into edge-rows / node-rows -----
        part_e = jnp.dot(hE, wkve_ref[...],
                         preferred_element_type=jnp.float32)        # [TN*K, 2H]
        part_n = jnp.dot(g_nodes.astype(MXU_DTYPE), wkvn_ref[...],
                         preferred_element_type=jnp.float32)        # [TN*K, 2H]
        if edge_factor == 1.0:
            kvf = part_e + part_n
        else:
            kvf = jnp.float32(edge_factor) * part_e + part_n
        kvf = kvf.reshape(tn, k, 2 * h)
        if use_kv_scale:                     # decoder: mask_bw applied to K|V
            kvf = sc_ref[0] * kvf            # sc: [TN, K, 1]
        kv = kvf.astype(MXU_DTYPE)           # bf16 right away (VMEM pressure)
        km = kv[:, :, :h]                    # [TN, K, H]
        vm = kv[:, :, h:]                    # [TN, K, H]

        # --- lane-dense multi-head attention ---------------------------------
        q = jnp.dot(hV.astype(MXU_DTYPE), wq_ref[...],
                    preferred_element_type=jnp.float32)              # [TN, H]
        q = q * jnp.float32(1.0 / np.sqrt(d))                        # fold scale

        prod = q[:, None, :] * km                                    # [TN, K, H] f32
        # head-blocked lane sums (replicated back per channel) via ONE matmul
        logits = jnp.dot(prod.reshape(tn * k, h).astype(MXU_DTYPE), hb_ref[...],
                         preferred_element_type=jnp.float32).reshape(tn, k, h)

        if masked_softmax:                   # encoder: struct2seq masked softmax
            mA = mA_ref[0]                   # [TN, K, 1]
            logits = jnp.where(mA > 0, logits,
                               jnp.float32(np.finfo(np.float32).min))
        mmax = jnp.max(logits, axis=1, keepdims=True)                # [TN, 1, H]
        e = jnp.exp(logits - mmax)
        att = e * pl.reciprocal(jnp.sum(e, axis=1, keepdims=True), approx=True)
        if masked_softmax:
            att = mA * att

        ctx = jnp.sum(att * vm, axis=1)                              # [TN, H] f32
        dh = jnp.dot(ctx.astype(MXU_DTYPE), wo_ref[...],
                     preferred_element_type=jnp.float32)

        # --- residual + Normalize + FFN + Normalize --------------------------
        x = _normalize(hV + dh, g1_ref[...], b1_ref[...])
        ff = jnp.maximum(
            jnp.dot(x.astype(MXU_DTYPE), win_ref[...],
                    preferred_element_type=jnp.float32) + bin_ref[...],
            0.0,
        )
        dh2 = jnp.dot(ff.astype(MXU_DTYPE), wout_ref[...],
                      preferred_element_type=jnp.float32) + bout_ref[...]
        x = _normalize(x + dh2, g2_ref[...], b2_ref[...])
        o_ref[0] = mV_ref[0] * x

    return kernel


def _layer_vmem_estimate(tn, k, n, h, ht, ff):
    f32, bf16 = 4, 2
    blocks = (tn * h * f32 + tn * k * h * bf16 + tn * k * 3 * f32
              + n * ht * bf16 + tn * f32 + tn * h * f32)
    weights = ((h * h + h * 2 * h + ht * 2 * h + h * h + h * ff + ff * h
                + h * h) * bf16 + (4 * h + ff + h) * f32)
    temps = (tn * k * n * bf16 + tn * k * ht * f32
             + tn * k * 2 * h * (2 * f32 + bf16)
             + tn * k * h * f32 * 4 + tn * (h * 6 + ff) * f32)
    return 2 * (blocks + weights) + temps


def pallas_transformer_layer(h_V, h_E_flat, e_idx4, node_tbl, mask_V3,
                             mask_attend4, kv_scale4, head_blk, lp, *,
                             masked_softmax, use_kv_scale, edge_factor,
                             node_tile):
    b, n, h = h_V.shape
    k = e_idx4.shape[2]
    ht = node_tbl.shape[-1]
    ffdim = lp["W_in"].shape[1]
    tn = node_tile
    assert n % tn == 0 and h % NUM_HEADS == 0
    assert ht == lp["W_KV"].shape[0] - h
    nt = n // tn

    w_e = lp["W_KV"][:h]         # edge-channel rows of the fused K|V projection
    w_n = lp["W_KV"][h:]         # gathered-node-channel rows

    kernel = make_transformer_kernel(NUM_HEADS, masked_softmax,
                                     use_kv_scale, edge_factor)

    tile3 = lambda bi, ti: (bi, ti, 0)
    tile4 = lambda bi, ti: (bi, ti, 0, 0)
    full3 = lambda bi, ti: (bi, 0, 0)     # per-batch resident (no refetch over t)
    const2 = lambda bi, ti: (0, 0)

    # TODO(synk): single-buffer the grid-invariant weight specs with
    # pipeline_mode=pl.Buffered(1) to reclaim VMEM on v7x once buffer_count=1
    # is universally supported.
    in_specs = [
        pl.BlockSpec((1, tn, h), tile3),          # h_V tile (f32, residual/query)
        pl.BlockSpec((1, tn * k, h), tile3),      # h_E flat tile (bf16)
        pl.BlockSpec((1, tn, k, 1), tile4),       # e_idx tile (int32)
        pl.BlockSpec((1, n, ht), full3),          # gather table (bf16)
        pl.BlockSpec((1, tn, 1), tile3),          # mask_V
        pl.BlockSpec((1, tn, k, 1), tile4),       # mask_attend (softmax mask)
        pl.BlockSpec((1, tn, k, 1), tile4),       # kv scale (mask_bw, decoder)
        pl.BlockSpec((h, h), const2),             # head block-diagonal matrix
        pl.BlockSpec((h, h), const2),             # W_Q
        pl.BlockSpec((h, 2 * h), const2),         # W_KV edge rows
        pl.BlockSpec((ht, 2 * h), const2),        # W_KV node rows
        pl.BlockSpec((h, h), const2),             # W_O
        pl.BlockSpec((1, h), const2),             # norm1 gain
        pl.BlockSpec((1, h), const2),             # norm1 bias
        pl.BlockSpec((1, h), const2),             # norm2 gain
        pl.BlockSpec((1, h), const2),             # norm2 bias
        pl.BlockSpec((h, ffdim), const2),         # FFN W_in
        pl.BlockSpec((1, ffdim), const2),         # FFN b_in
        pl.BlockSpec((ffdim, h), const2),         # FFN W_out
        pl.BlockSpec((1, h), const2),             # FFN b_out
    ]
    out_specs = pl.BlockSpec((1, tn, h), tile3)

    est = _layer_vmem_estimate(tn, k, n, h, ht, ffdim)
    vmem_limit = int(min(max(int(est * 1.5) + (4 << 20), 32 << 20), 64 << 20))

    return pl.pallas_call(
        kernel,
        out_shape=jax.ShapeDtypeStruct((b, n, h), jnp.float32),
        grid=(b, nt),
        in_specs=in_specs,
        out_specs=out_specs,
        compiler_params=pltpu.CompilerParams(
            dimension_semantics=("parallel", "parallel"),
            vmem_limit_bytes=vmem_limit),
    )(
        h_V, h_E_flat, e_idx4, node_tbl, mask_V3, mask_attend4, kv_scale4,
        head_blk,
        lp["W_Q"], w_e, w_n, lp["W_O"],
        lp["g1"], lp["b1"], lp["g2"], lp["b2"],
        lp["W_in"], lp["b_in"], lp["W_out"], lp["b_out"],
    )


# -----------------------------------------------------------------------------
# Plain-JAX glue (k-NN feature engineering, parameter setup)
# -----------------------------------------------------------------------------
def gather_nodes(nodes, e_idx):
    b, n, c = nodes.shape
    k = e_idx.shape[-1]
    flat = e_idx.reshape(b, n * k)
    gathered = jnp.take_along_axis(nodes, flat[..., None], axis=1)
    return gathered.reshape(b, n, k, c)


def _dihedrals(X, eps=1e-7):
    b, n = X.shape[0], X.shape[1]
    xb = X[:, :, :3, :].reshape(b, 3 * n, 3)
    dx = xb[:, 1:, :] - xb[:, :-1, :]
    u = dx / jnp.maximum(jnp.linalg.norm(dx, axis=-1, keepdims=True), 1e-12)
    u_2, u_1, u_0 = u[:, :-2, :], u[:, 1:-1, :], u[:, 2:, :]
    n_2 = jnp.cross(u_2, u_1)
    n_2 = n_2 / jnp.maximum(jnp.linalg.norm(n_2, axis=-1, keepdims=True), 1e-12)
    n_1 = jnp.cross(u_1, u_0)
    n_1 = n_1 / jnp.maximum(jnp.linalg.norm(n_1, axis=-1, keepdims=True), 1e-12)
    cos_d = jnp.clip(jnp.sum(n_2 * n_1, axis=-1), -1 + eps, 1 - eps)
    d = jnp.sign(jnp.sum(u_2 * n_1, axis=-1)) * jnp.arccos(cos_d)
    d = jnp.pad(d, ((0, 0), (1, 2)))
    d = d.reshape(b, n, 3)
    return jnp.concatenate([jnp.cos(d), jnp.sin(d)], axis=-1)  # [B, N, 6]


def raw_protein_features(X, mask, k_neighbors, num_rbf=16, num_pos=16):
    b, n = mask.shape
    x_ca = X[:, :, 1, :]
    mask_2d = mask[:, None, :] * mask[:, :, None]
    dx = x_ca[:, None, :, :] - x_ca[:, :, None, :]
    dist = mask_2d * jnp.sqrt(jnp.sum(dx ** 2, axis=-1) + 1e-6)
    d_max = jnp.max(dist, axis=-1, keepdims=True)
    d_adjust = dist + (1.0 - mask_2d) * d_max
    k = min(k_neighbors, n)
    neg_vals, e_idx = jax.lax.top_k(-d_adjust, k)
    d_neighbors = -neg_vals

    d_mu = jnp.linspace(0.0, 20.0, num_rbf)
    d_sigma = 20.0 / num_rbf
    rbf = jnp.exp(-(((d_neighbors[..., None] - d_mu) / d_sigma) ** 2))

    ii = jnp.arange(n)[None, :, None]
    offset = (e_idx - ii).astype(jnp.float32)[..., None]
    freq = jnp.exp(
        jnp.arange(0, num_pos, 2, dtype=jnp.float32) * -(np.log(10000.0) / num_pos)
    )
    angles = offset * freq
    e_pos = jnp.concatenate([jnp.cos(angles), jnp.sin(angles)], axis=-1)

    v_dih = _dihedrals(X)
    # TODO(synk): orientation-quaternion edge features (7 dims) of the original
    # 'full' ProteinFeatures (source not provided) are filled with zeros here.
    o_feat = jnp.zeros(rbf.shape[:-1] + (7,), jnp.float32)
    e_feat = jnp.concatenate([e_pos, rbf, o_feat], axis=-1)      # [B,N,K,39]
    return v_dih, e_feat, e_idx


def init_params(key, node_features, edge_features, hidden, n_enc=3, n_dec=3):
    keys = list(jax.random.split(key, 128))
    it = iter(keys)

    def xav(shape):
        lim = np.sqrt(6.0 / (shape[0] + shape[1]))
        w = jax.random.uniform(next(it), shape, jnp.float32, -lim, lim)
        return w.astype(MXU_DTYPE)          # matmul weights stored in bf16

    ff = hidden * 4
    p = {
        "node_W": xav((6, node_features)), "node_b": jnp.zeros((node_features,)),
        "edge_W": xav((39, edge_features)), "edge_b": jnp.zeros((edge_features,)),
        "node_g": jnp.ones((node_features,)), "node_nb": jnp.zeros((node_features,)),
        "edge_g": jnp.ones((edge_features,)), "edge_nb": jnp.zeros((edge_features,)),
        "W_v": xav((node_features, hidden)), "b_v": jnp.zeros((hidden,)),
        "W_e": xav((edge_features, hidden)), "b_e": jnp.zeros((hidden,)),
        "W_s": xav((EMBDIM, hidden)), "b_s": jnp.zeros((hidden,)),
        "W_head": xav((hidden, EMBDIM)), "b_head": jnp.zeros((EMBDIM,)),
    }

    def layer_params(cin):
        w_k = xav((cin, hidden))
        w_v = xav((cin, hidden))
        return dict(
            W_Q=xav((hidden, hidden)),
            W_KV=jnp.concatenate([w_k, w_v], axis=1),   # fused [Cin, 2H]
            W_O=xav((hidden, hidden)),
            g1=jnp.ones((1, hidden)), b1=jnp.zeros((1, hidden)),
            g2=jnp.ones((1, hidden)), b2=jnp.zeros((1, hidden)),
            W_in=xav((hidden, ff)), b_in=jnp.zeros((1, ff)),
            W_out=xav((ff, hidden)), b_out=jnp.zeros((1, hidden)),
        )

    p["enc"] = [layer_params(2 * hidden) for _ in range(n_enc)]
    p["dec"] = [layer_params(3 * hidden) for _ in range(n_dec)]
    return p


def struct2seq_forward(params, X, S, L, mask, k_neighbors=8, node_tile=None):
    del L  # kept for API parity; unused (as in the reference features module)
    v_feat, e_feat, e_idx = raw_protein_features(X, mask, k_neighbors)
    b, n = mask.shape
    k = e_idx.shape[-1]
    h = params["W_v"].shape[1]
    tn = node_tile if node_tile is not None else _pick_node_tile(n)

    # Fused (feature Linear -> Normalize -> W_v / W_e) embeddings, row-tiled.
    h_V = pallas_embed(v_feat.reshape(b * n, -1),
                       params["node_W"], params["node_b"],
                       params["node_g"], params["node_nb"],
                       params["W_v"], params["b_v"]).reshape(b, n, h)
    h_E = pallas_embed(e_feat.reshape(b * n * k, -1),
                       params["edge_W"], params["edge_b"],
                       params["edge_g"], params["edge_nb"],
                       params["W_e"], params["b_e"]).reshape(b, n, k, h)

    # Edge embeddings are fixed for all 6 layers: flatten + cast to bf16 once.
    h_E_flat = h_E.reshape(b, n * k, h).astype(MXU_DTYPE)
    e_idx = e_idx.astype(jnp.int32)
    e_idx4 = e_idx[..., None]
    head_blk = _head_block_matrix(h, NUM_HEADS)

    mask_V3 = mask[:, :, None]
    mask_attend = mask_V3 * gather_nodes(mask[..., None], e_idx)[..., 0]  # [B,N,K]
    mask_attend4 = mask_attend[..., None]
    ones_nk1 = jnp.ones((b, n, k, 1), jnp.float32)

    # ----- encoder: masked softmax, h_EV = [h_E | gather(h_V)] ---------------
    for lp in params["enc"]:
        tbl = h_V.astype(MXU_DTYPE)                      # gather table [B,N,H]
        h_V = pallas_transformer_layer(
            h_V, h_E_flat, e_idx4, tbl, mask_V3, mask_attend4, ones_nk1,
            head_blk, lp, masked_softmax=True, use_kv_scale=False,
            edge_factor=1.0, node_tile=tn)

    h_S = pallas_linear(S.reshape(b * n, -1),
                        params["W_s"], params["b_s"]).reshape(b, n, h)

    ii = jnp.arange(n)[None, :, None]
    mask_bw = mask_V3 * (e_idx != ii).astype(jnp.float32)          # [B,N,K]
    mask_bw4 = mask_bw[..., None]

    # ----- decoder: plain softmax (mask_attend=None in the reference);
    # h_ESV = mask_bw*[h_E|gS|gV] + mask_bw*[h_E|0|gV_enc]
    #       = [2*mbw*h_E | mbw*gather(h_S) | mbw*gather(h_V + h_V_enc)] --------
    h_V_enc = h_V
    h_S_bf = h_S.astype(MXU_DTYPE)
    for lp in params["dec"]:
        tbl = jnp.concatenate(
            [h_S_bf, (h_V + h_V_enc).astype(MXU_DTYPE)], axis=-1)  # [B,N,2H]
        h_V = pallas_transformer_layer(
            h_V, h_E_flat, e_idx4, tbl, mask_V3, ones_nk1, mask_bw4,
            head_blk, lp, masked_softmax=False, use_kv_scale=True,
            edge_factor=2.0, node_tile=tn)

    logits = pallas_out_head(h_V.reshape(b * n, -1),
                             params["W_head"], params["b_head"])
    return logits.reshape(b, n, EMBDIM)


# -----------------------------------------------------------------------------
if __name__ == "__main__":
    key = jax.random.PRNGKey(0)
    k_x, k_s, k_p = jax.random.split(key, 3)

    B, N, HIDDEN = 2, 16, 32
    K_NEIGHBORS = 8
    NODE_TILE = 8   # 2 node tiles / batch element -> exercises the (B, N//TN) grid

    X = jax.random.normal(k_x, (B, N, 4, 3), jnp.float32) * 3.0
    S = jax.random.normal(k_s, (B, N, EMBDIM), jnp.float32)
    mask = jnp.ones((B, N), jnp.float32).at[1, -2:].set(0.0)
    L = jnp.array([N, N - 2], jnp.int32)

    params = init_params(k_p, node_features=32, edge_features=32, hidden=HIDDEN)

    fwd = jax.jit(lambda p, x, s, l, m: struct2seq_forward(
        p, x, s, l, m, k_neighbors=K_NEIGHBORS, node_tile=NODE_TILE))
    out = jax.block_until_ready(fwd(params, X, S, L, mask))

    assert out.shape == (B, N, EMBDIM)
    assert bool(jnp.all(jnp.isfinite(out)))
    # output rows are L2-normalized sigmoid logits
    norms = jnp.linalg.norm(out, axis=-1)
    assert bool(jnp.all(jnp.abs(norms - 1.0) < 1e-4))
    print("KERNEL_OK")
</pallas_src>

<mosaic_0001>
module attributes {stable_mosaic.version = 11 : i64} {
  func.func @embed_kernel(%arg0: i32, %arg1: memref<32x6xf32, #tpu.memory_space<vmem>>, %arg2: memref<6x32xbf16, #tpu.memory_space<vmem>>, %arg3: memref<1x32xf32, #tpu.memory_space<vmem>>, %arg4: memref<1x32xf32, #tpu.memory_space<vmem>>, %arg5: memref<1x32xf32, #tpu.memory_space<vmem>>, %arg6: memref<32x32xbf16, #tpu.memory_space<vmem>>, %arg7: memref<1x32xf32, #tpu.memory_space<vmem>>, %arg8: memref<32x32xf32, #tpu.memory_space<vmem>>) attributes {dimension_semantics = [#tpu.dimension_semantics<parallel>], iteration_bounds = array<i64: 1>, scalar_prefetch = 0 : i64, scratch_operands = 0 : i64, tpu.core_type = #tpu.core_type<tc>, window_params = [{transform_indices = @transform_0, window_bounds = array<i64: 32, 6>}, {pipeline_mode = #tpu.pipeline_mode<synchronous>, transform_indices = @transform_1, window_bounds = array<i64: 6, 32>}, {pipeline_mode = #tpu.pipeline_mode<synchronous>, transform_indices = @transform_2, window_bounds = array<i64: 1, 32>}, {pipeline_mode = #tpu.pipeline_mode<synchronous>, transform_indices = @transform_3, window_bounds = array<i64: 1, 32>}, {pipeline_mode = #tpu.pipeline_mode<synchronous>, transform_indices = @transform_4, window_bounds = array<i64: 1, 32>}, {pipeline_mode = #tpu.pipeline_mode<synchronous>, transform_indices = @transform_5, window_bounds = array<i64: 32, 32>}, {pipeline_mode = #tpu.pipeline_mode<synchronous>, transform_indices = @transform_6, window_bounds = array<i64: 1, 32>}, {transform_indices = @transform_7, window_bounds = array<i64: 32, 32>}]} {
    %c0 = arith.constant 0 : index
    %c0_0 = arith.constant 0 : index
    %0 = vector.load %arg1[%c0, %c0_0] : memref<32x6xf32, #tpu.memory_space<vmem>>, vector<32x6xf32>
    %1 = arith.truncf %0 : vector<32x6xf32> to vector<32x6xbf16>
    %c0_1 = arith.constant 0 : index
    %c0_2 = arith.constant 0 : index
    %2 = vector.load %arg2[%c0_1, %c0_2] : memref<6x32xbf16, #tpu.memory_space<vmem>>, vector<6x32xbf16>
    %cst = arith.constant dense<0.000000e+00> : vector<32x32xf32>
    %3 = tpu.matmul %1, %2, %cst {dimension_numbers = #tpu.dot_dimension_numbers<[1], [0], [0], [1], [0, 0, 1, 1], [], []>} : vector<32x6xbf16>, vector<6x32xbf16>, vector<32x32xf32> -> vector<32x32xf32>
    %c0_3 = arith.constant 0 : index
    %c0_4 = arith.constant 0 : index
    %4 = vector.load %arg3[%c0_3, %c0_4] : memref<1x32xf32, #tpu.memory_space<vmem>>, vector<1x32xf32>
    %5 = vector.broadcast %4 : vector<1x32xf32> to vector<32x32xf32>
    %6 = arith.addf %3, %5 : vector<32x32xf32>
    %c0_5 = arith.constant 0 : index
    %c0_6 = arith.constant 0 : index
    %7 = vector.load %arg4[%c0_5, %c0_6] : memref<1x32xf32, #tpu.memory_space<vmem>>, vector<1x32xf32>
    %c0_7 = arith.constant 0 : index
    %c0_8 = arith.constant 0 : index
    %8 = vector.load %arg5[%c0_7, %c0_8] : memref<1x32xf32, #tpu.memory_space<vmem>>, vector<1x32xf32>
    %cst_9 = arith.constant dense<0.000000e+00> : vector<32xf32>
    %9 = vector.multi_reduction <add>, %6, %cst_9 [1] : vector<32x32xf32> to vector<32xf32>
    %10 = vector.shape_cast %9 : vector<32xf32> to vector<32x1xf32>
    %cst_10 = arith.constant 3.200000e+01 : f32
    %11 = vector.broadcast %cst_10 : f32 to vector<32x1xf32>
    %12 = arith.divf %10, %11 : vector<32x1xf32>
    %13 = vector.broadcast %12 : vector<32x1xf32> to vector<32x32xf32>
    %14 = arith.subf %6, %13 : vector<32x32xf32>
    %15 = arith.mulf %14, %14 : vector<32x32xf32>
    %cst_11 = arith.constant dense<0.000000e+00> : vector<32xf32>
    %16 = vector.multi_reduction <add>, %15, %cst_11 [1] : vector<32x32xf32> to vector<32xf32>
    %17 = vector.shape_cast %16 : vector<32xf32> to vector<32x1xf32>
    %cst_12 = arith.constant 0.0322580636 : f32
    %18 = vector.broadcast %cst_12 : f32 to vector<32x1xf32>
    %19 = arith.mulf %17, %18 : vector<32x1xf32>
    %cst_13 = arith.constant 9.99999997E-7 : f32
    %20 = vector.broadcast %cst_13 : f32 to vector<32x1xf32>
    %21 = arith.addf %19, %20 : vector<32x1xf32>
    %22 = math.sqrt %21 : vector<32x1xf32>
    %23 = vector.broadcast %12 : vector<32x1xf32> to vector<32x32xf32>
    %24 = arith.subf %6, %23 : vector<32x32xf32>
    %25 = vector.broadcast %7 : vector<1x32xf32> to vector<32x32xf32>
    %26 = arith.mulf %25, %24 : vector<32x32xf32>
    %cst_14 = arith.constant 9.99999997E-7 : f32
    %27 = vector.broadcast %cst_14 : f32 to vector<32x1xf32>
    %28 = arith.addf %22, %27 : vector<32x1xf32>
    %29 = vector.broadcast %28 : vector<32x1xf32> to vector<32x32xf32>
    %30 = arith.divf %26, %29 : vector<32x32xf32>
    %31 = vector.broadcast %8 : vector<1x32xf32> to vector<32x32xf32>
    %32 = arith.addf %30, %31 : vector<32x32xf32>
    %33 = arith.truncf %32 : vector<32x32xf32> to vector<32x32xbf16>
    %c0_15 = arith.constant 0 : index
    %c0_16 = arith.constant 0 : index
    %34 = vector.load %arg6[%c0_15, %c0_16] : memref<32x32xbf16, #tpu.memory_space<vmem>>, vector<32x32xbf16>
    %cst_17 = arith.constant dense<0.000000e+00> : vector<32x32xf32>
    %35 = tpu.matmul %33, %34, %cst_17 {dimension_numbers = #tpu.dot_dimension_numbers<[1], [0], [0], [1], [0, 0, 1, 1], [], []>} : vector<32x32xbf16>, vector<32x32xbf16>, vector<32x32xf32> -> vector<32x32xf32>
    %c0_18 = arith.constant 0 : index
    %c0_19 = arith.constant 0 : index
    %36 = vector.load %arg7[%c0_18, %c0_19] : memref<1x32xf32, #tpu.memory_space<vmem>>, vector<1x32xf32>
    %37 = vector.broadcast %36 : vector<1x32xf32> to vector<32x32xf32>
    %38 = arith.addf %35, %37 : vector<32x32xf32>
    %c0_20 = arith.constant 0 : index
    %c0_21 = arith.constant 0 : index
    %39 = vector.load %arg8[%c0_20, %c0_21] : memref<32x32xf32, #tpu.memory_space<vmem>>, vector<32x32xf32>
    tpu.vector_store %arg8[%c0_20, %c0_21], %38 {strides = array<i32>} : memref<32x32xf32, #tpu.memory_space<vmem>>, vector<32x32xf32>,
    return
  }
  func.func @transform_0(%arg0: i32) -> (i32, i32) {
    %c0_i32 = arith.constant 0 : i32
    %c0_i32_0 = arith.constant 0 : i32
    return %arg0, %c0_i32 : i32, i32
  }
  func.func @transform_1(%arg0: i32) -> (i32, i32) {
    %c0_i32 = arith.constant 0 : i32
    %c0_i32_0 = arith.constant 0 : i32
    %c0_i32_1 = arith.constant 0 : i32
    return %c0_i32, %c0_i32_0 : i32, i32
  }
  func.func @transform_2(%arg0: i32) -> (i32, i32) {
    %c0_i32 = arith.constant 0 : i32
    %c0_i32_0 = arith.constant 0 : i32
    %c0_i32_1 = arith.constant 0 : i32
    return %c0_i32, %c0_i32_0 : i32, i32
  }
  func.func @transform_3(%arg0: i32) -> (i32, i32) {
    %c0_i32 = arith.constant 0 : i32
    %c0_i32_0 = arith.constant 0 : i32
    %c0_i32_1 = arith.constant 0 : i32
    return %c0_i32, %c0_i32_0 : i32, i32
  }
  func.func @transform_4(%arg0: i32) -> (i32, i32) {
    %c0_i32 = arith.constant 0 : i32
    %c0_i32_0 = arith.constant 0 : i32
    %c0_i32_1 = arith.constant 0 : i32
    return %c0_i32, %c0_i32_0 : i32, i32
  }
  func.func @transform_5(%arg0: i32) -> (i32, i32) {
    %c0_i32 = arith.constant 0 : i32
    %c0_i32_0 = arith.constant 0 : i32
    %c0_i32_1 = arith.constant 0 : i32
    return %c0_i32, %c0_i32_0 : i32, i32
  }
  func.func @transform_6(%arg0: i32) -> (i32, i32) {
    %c0_i32 = arith.constant 0 : i32
    %c0_i32_0 = arith.constant 0 : i32
    %c0_i32_1 = arith.constant 0 : i32
    return %c0_i32, %c0_i32_0 : i32, i32
  }
  func.func @transform_7(%arg0: i32) -> (i32, i32) {
    %c0_i32 = arith.constant 0 : i32
    %c0_i32_0 = arith.constant 0 : i32
    return %arg0, %c0_i32 : i32, i32
  }
}

module attributes {stable_mosaic.version = 11 : i64} {
  func.func @embed_kernel(%arg0: i32, %arg1: memref<256x39xf32, #tpu.memory_space<vmem>>, %arg2: memref<39x32xbf16, #tpu.memory_space<vmem>>, %arg3: memref<1x32xf32, #tpu.memory_space<vmem>>, %arg4: memref<1x32xf32, #tpu.memory_space<vmem>>, %arg5: memref<1x32xf32, #tpu.memory_space<vmem>>, %arg6: memref<32x32xbf16, #tpu.memory_space<vmem>>, %arg7: memref<1x32xf32, #tpu.memory_space<vmem>>, %arg8: memref<256x32xf32, #tpu.memory_space<vmem>>) attributes {dimension_semantics = [#tpu.dimension_semantics<parallel>], iteration_bounds = array<i64: 1>, scalar_prefetch = 0 : i64, scratch_operands = 0 : i64, tpu.core_type = #tpu.core_type<tc>, window_params = [{transform_indices = @transform_0, window_bounds = array<i64: 256, 39>}, {pipeline_mode = #tpu.pipeline_mode<synchronous>, transform_indices = @transform_1, window_bounds = array<i64: 39, 32>}, {pipeline_mode = #tpu.pipeline_mode<synchronous>, transform_indices = @transform_2, window_bounds = array<i64: 1, 32>}, {pipeline_mode = #tpu.pipeline_mode<synchronous>, transform_indices = @transform_3, window_bounds = array<i64: 1, 32>}, {pipeline_mode = #tpu.pipeline_mode<synchronous>, transform_indices = @transform_4, window_bounds = array<i64: 1, 32>}, {pipeline_mode = #tpu.pipeline_mode<synchronous>, transform_indices = @transform_5, window_bounds = array<i64: 32, 32>}, {pipeline_mode = #tpu.pipeline_mode<synchronous>, transform_indices = @transform_6, window_bounds = array<i64: 1, 32>}, {transform_indices = @transform_7, window_bounds = array<i64: 256, 32>}]} {
    %c0 = arith.constant 0 : index
    %c0_0 = arith.constant 0 : index
    %0 = vector.load %arg1[%c0, %c0_0] : memref<256x39xf32, #tpu.memory_space<vmem>>, vector<256x39xf32>
    %1 = arith.truncf %0 : vector<256x39xf32> to vector<256x39xbf16>
    %c0_1 = arith.constant 0 : index
    %c0_2 = arith.constant 0 : index
    %2 = vector.load %arg2[%c0_1, %c0_2] : memref<39x32xbf16, #tpu.memory_space<vmem>>, vector<39x32xbf16>
    %cst = arith.constant dense<0.000000e+00> : vector<256x32xf32>
    %3 = tpu.matmul %1, %2, %cst {dimension_numbers = #tpu.dot_dimension_numbers<[1], [0], [0], [1], [0, 0, 1, 1], [], []>} : vector<256x39xbf16>, vector<39x32xbf16>, vector<256x32xf32> -> vector<256x32xf32>
    %c0_3 = arith.constant 0 : index
    %c0_4 = arith.constant 0 : index
    %4 = vector.load %arg3[%c0_3, %c0_4] : memref<1x32xf32, #tpu.memory_space<vmem>>, vector<1x32xf32>
    %5 = vector.broadcast %4 : vector<1x32xf32> to vector<256x32xf32>
    %6 = arith.addf %3, %5 : vector<256x32xf32>
    %c0_5 = arith.constant 0 : index
    %c0_6 = arith.constant 0 : index
    %7 = vector.load %arg4[%c0_5, %c0_6] : memref<1x32xf32, #tpu.memory_space<vmem>>, vector<1x32xf32>
    %c0_7 = arith.constant 0 : index
    %c0_8 = arith.constant 0 : index
    %8 = vector.load %arg5[%c0_7, %c0_8] : memref<1x32xf32, #tpu.memory_space<vmem>>, vector<1x32xf32>
    %cst_9 = arith.constant dense<0.000000e+00> : vector<256xf32>
    %9 = vector.multi_reduction <add>, %6, %cst_9 [1] : vector<256x32xf32> to vector<256xf32>
    %10 = vector.shape_cast %9 : vector<256xf32> to vector<256x1xf32>
    %cst_10 = arith.constant 3.200000e+01 : f32
    %11 = vector.broadcast %cst_10 : f32 to vector<256x1xf32>
    %12 = arith.divf %10, %11 : vector<256x1xf32>
    %13 = vector.broadcast %12 : vector<256x1xf32> to vector<256x32xf32>
    %14 = arith.subf %6, %13 : vector<256x32xf32>
    %15 = arith.mulf %14, %14 : vector<256x32xf32>
    %cst_11 = arith.constant dense<0.000000e+00> : vector<256xf32>
    %16 = vector.multi_reduction <add>, %15, %cst_11 [1] : vector<256x32xf32> to vector<256xf32>
    %17 = vector.shape_cast %16 : vector<256xf32> to vector<256x1xf32>
    %cst_12 = arith.constant 0.0322580636 : f32
    %18 = vector.broadcast %cst_12 : f32 to vector<256x1xf32>
    %19 = arith.mulf %17, %18 : vector<256x1xf32>
    %cst_13 = arith.constant 9.99999997E-7 : f32
    %20 = vector.broadcast %cst_13 : f32 to vector<256x1xf32>
    %21 = arith.addf %19, %20 : vector<256x1xf32>
    %22 = math.sqrt %21 : vector<256x1xf32>
    %23 = vector.broadcast %12 : vector<256x1xf32> to vector<256x32xf32>
    %24 = arith.subf %6, %23 : vector<256x32xf32>
    %25 = vector.broadcast %7 : vector<1x32xf32> to vector<256x32xf32>
    %26 = arith.mulf %25, %24 : vector<256x32xf32>
    %cst_14 = arith.constant 9.99999997E-7 : f32
    %27 = vector.broadcast %cst_14 : f32 to vector<256x1xf32>
    %28 = arith.addf %22, %27 : vector<256x1xf32>
    %29 = vector.broadcast %28 : vector<256x1xf32> to vector<256x32xf32>
    %30 = arith.divf %26, %29 : vector<256x32xf32>
    %31 = vector.broadcast %8 : vector<1x32xf32> to vector<256x32xf32>
    %32 = arith.addf %30, %31 : vector<256x32xf32>
    %33 = arith.truncf %32 : vector<256x32xf32> to vector<256x32xbf16>
    %c0_15 = arith.constant 0 : index
    %c0_16 = arith.constant 0 : index
    %34 = vector.load %arg6[%c0_15, %c0_16] : memref<32x32xbf16, #tpu.memory_space<vmem>>, vector<32x32xbf16>
    %cst_17 = arith.constant dense<0.000000e+00> : vector<256x32xf32>
    %35 = tpu.matmul %33, %34, %cst_17 {dimension_numbers = #tpu.dot_dimension_numbers<[1], [0], [0], [1], [0, 0, 1, 1], [], []>} : vector<256x32xbf16>, vector<32x32xbf16>, vector<256x32xf32> -> vector<256x32xf32>
    %c0_18 = arith.constant 0 : index
    %c0_19 = arith.constant 0 : index
    %36 = vector.load %arg7[%c0_18, %c0_19] : memref<1x32xf32, #tpu.memory_space<vmem>>, vector<1x32xf32>
    %37 = vector.broadcast %36 : vector<1x32xf32> to vector<256x32xf32>
    %38 = arith.addf %35, %37 : vector<256x32xf32>
    %c0_20 = arith.constant 0 : index
    %c0_21 = arith.constant 0 : index
    %39 = vector.load %arg8[%c0_20, %c0_21] : memref<256x32xf32, #tpu.memory_space<vmem>>, vector<256x32xf32>
    tpu.vector_store %arg8[%c0_20, %c0_21], %38 {strides = array<i32>} : memref<256x32xf32, #tpu.memory_space<vmem>>, vector<256x32xf32>,
    return
  }
  func.func @transform_0(%arg0: i32) -> (i32, i32) {
    %c0_i32 = arith.constant 0 : i32
    %c0_i32_0 = arith.constant 0 : i32
    return %arg0, %c0_i32 : i32, i32
  }
  func.func @transform_1(%arg0: i32) -> (i32, i32) {
    %c0_i32 = arith.constant 0 : i32
    %c0_i32_0 = arith.constant 0 : i32
    %c0_i32_1 = arith.constant 0 : i32
    return %c0_i32, %c0_i32_0 : i32, i32
  }
  func.func @transform_2(%arg0: i32) -> (i32, i32) {
    %c0_i32 = arith.constant 0 : i32
    %c0_i32_0 = arith.constant 0 : i32
    %c0_i32_1 = arith.constant 0 : i32
    return %c0_i32, %c0_i32_0 : i32, i32
  }
  func.func @transform_3(%arg0: i32) -> (i32, i32) {
    %c0_i32 = arith.constant 0 : i32
    %c0_i32_0 = arith.constant 0 : i32
    %c0_i32_1 = arith.constant 0 : i32
    return %c0_i32, %c0_i32_0 : i32, i32
  }
  func.func @transform_4(%arg0: i32) -> (i32, i32) {
    %c0_i32 = arith.constant 0 : i32
    %c0_i32_0 = arith.constant 0 : i32
    %c0_i32_1 = arith.constant 0 : i32
    return %c0_i32, %c0_i32_0 : i32, i32
  }
  func.func @transform_5(%arg0: i32) -> (i32, i32) {
    %c0_i32 = arith.constant 0 : i32
    %c0_i32_0 = arith.constant 0 : i32
    %c0_i32_1 = arith.constant 0 : i32
    return %c0_i32, %c0_i32_0 : i32, i32
  }
  func.func @transform_6(%arg0: i32) -> (i32, i32) {
    %c0_i32 = arith.constant 0 : i32
    %c0_i32_0 = arith.constant 0 : i32
    %c0_i32_1 = arith.constant 0 : i32
    return %c0_i32, %c0_i32_0 : i32, i32
  }
  func.func @transform_7(%arg0: i32) -> (i32, i32) {
    %c0_i32 = arith.constant 0 : i32
    %c0_i32_0 = arith.constant 0 : i32
    return %arg0, %c0_i32 : i32, i32
  }
}

module attributes {stable_mosaic.version = 11 : i64} {
  func.func @linear_kernel(%arg0: i32, %arg1: memref<32x20xf32, #tpu.memory_space<vmem>>, %arg2: memref<20x32xbf16, #tpu.memory_space<vmem>>, %arg3: memref<1x32xf32, #tpu.memory_space<vmem>>, %arg4: memref<32x32xf32, #tpu.memory_space<vmem>>) attributes {dimension_semantics = [#tpu.dimension_semantics<parallel>], iteration_bounds = array<i64: 1>, scalar_prefetch = 0 : i64, scratch_operands = 0 : i64, tpu.core_type = #tpu.core_type<tc>, window_params = [{transform_indices = @transform_0, window_bounds = array<i64: 32, 20>}, {pipeline_mode = #tpu.pipeline_mode<synchronous>, transform_indices = @transform_1, window_bounds = array<i64: 20, 32>}, {pipeline_mode = #tpu.pipeline_mode<synchronous>, transform_indices = @transform_2, window_bounds = array<i64: 1, 32>}, {transform_indices = @transform_3, window_bounds = array<i64: 32, 32>}]} {
    %c0 = arith.constant 0 : index
    %c0_0 = arith.constant 0 : index
    %0 = vector.load %arg1[%c0, %c0_0] : memref<32x20xf32, #tpu.memory_space<vmem>>, vector<32x20xf32>
    %1 = arith.truncf %0 : vector<32x20xf32> to vector<32x20xbf16>
    %c0_1 = arith.constant 0 : index
    %c0_2 = arith.constant 0 : index
    %2 = vector.load %arg2[%c0_1, %c0_2] : memref<20x32xbf16, #tpu.memory_space<vmem>>, vector<20x32xbf16>
    %cst = arith.constant dense<0.000000e+00> : vector<32x32xf32>
    %3 = tpu.matmul %1, %2, %cst {dimension_numbers = #tpu.dot_dimension_numbers<[1], [0], [0], [1], [0, 0, 1, 1], [], []>} : vector<32x20xbf16>, vector<20x32xbf16>, vector<32x32xf32> -> vector<32x32xf32>
    %c0_3 = arith.constant 0 : index
    %c0_4 = arith.constant 0 : index
    %4 = vector.load %arg3[%c0_3, %c0_4] : memref<1x32xf32, #tpu.memory_space<vmem>>, vector<1x32xf32>
    %5 = vector.broadcast %4 : vector<1x32xf32> to vector<32x32xf32>
    %6 = arith.addf %3, %5 : vector<32x32xf32>
    %c0_5 = arith.constant 0 : index
    %c0_6 = arith.constant 0 : index
    %7 = vector.load %arg4[%c0_5, %c0_6] : memref<32x32xf32, #tpu.memory_space<vmem>>, vector<32x32xf32>
    tpu.vector_store %arg4[%c0_5, %c0_6], %6 {strides = array<i32>} : memref<32x32xf32, #tpu.memory_space<vmem>>, vector<32x32xf32>,
    return
  }
  func.func @transform_0(%arg0: i32) -> (i32, i32) {
    %c0_i32 = arith.constant 0 : i32
    %c0_i32_0 = arith.constant 0 : i32
    return %arg0, %c0_i32 : i32, i32
  }
  func.func @transform_1(%arg0: i32) -> (i32, i32) {
    %c0_i32 = arith.constant 0 : i32
    %c0_i32_0 = arith.constant 0 : i32
    %c0_i32_1 = arith.constant 0 : i32
    return %c0_i32, %c0_i32_0 : i32, i32
  }
  func.func @transform_2(%arg0: i32) -> (i32, i32) {
    %c0_i32 = arith.constant 0 : i32
    %c0_i32_0 = arith.constant 0 : i32
    %c0_i32_1 = arith.constant 0 : i32
    return %c0_i32, %c0_i32_0 : i32, i32
  }
  func.func @transform_3(%arg0: i32) -> (i32, i32) {
    %c0_i32 = arith.constant 0 : i32
    %c0_i32_0 = arith.constant 0 : i32
    return %arg0, %c0_i32 : i32, i32
  }
}

module attributes {stable_mosaic.version = 11 : i64} {
  func.func @kernel(%arg0: i32, %arg1: i32, %arg2: memref<1x8x32xf32, #tpu.memory_space<vmem>>, %arg3: memref<1x64x32xbf16, #tpu.memory_space<vmem>>, %arg4: memref<1x8x8x1xi32, #tpu.memory_space<vmem>>, %arg5: memref<1x16x32xbf16, #tpu.memory_space<vmem>>, %arg6: memref<1x8x1xf32, #tpu.memory_space<vmem>>, %arg7: memref<1x8x8x1xf32, #tpu.memory_space<vmem>>, %arg8: memref<1x8x8x1xf32, #tpu.memory_space<vmem>>, %arg9: memref<32x32xbf16, #tpu.memory_space<vmem>>, %arg10: memref<32x32xbf16, #tpu.memory_space<vmem>>, %arg11: memref<32x64xbf16, #tpu.memory_space<vmem>>, %arg12: memref<32x64xbf16, #tpu.memory_space<vmem>>, %arg13: memref<32x32xbf16, #tpu.memory_space<vmem>>, %arg14: memref<1x32xf32, #tpu.memory_space<vmem>>, %arg15: memref<1x32xf32, #tpu.memory_space<vmem>>, %arg16: memref<1x32xf32, #tpu.memory_space<vmem>>, %arg17: memref<1x32xf32, #tpu.memory_space<vmem>>, %arg18: memref<32x128xbf16, #tpu.memory_space<vmem>>, %arg19: memref<1x128xf32, #tpu.memory_space<vmem>>, %arg20: memref<128x32xbf16, #tpu.memory_space<vmem>>, %arg21: memref<1x32xf32, #tpu.memory_space<vmem>>, %arg22: memref<1x8x32xf32, #tpu.memory_space<vmem>>) attributes {dimension_semantics = [#tpu.dimension_semantics<parallel>, #tpu.dimension_semantics<parallel>], iteration_bounds = array<i64: 2, 2>, scalar_prefetch = 0 : i64, scratch_operands = 0 : i64, tpu.core_type = #tpu.core_type<tc>, window_params = [{transform_indices = @transform_0, window_bounds = array<i64: 1, 8, 32>}, {transform_indices = @transform_1, window_bounds = array<i64: 1, 64, 32>}, {transform_indices = @transform_2, window_bounds = array<i64: 1, 8, 8, 1>}, {transform_indices = @transform_3, window_bounds = array<i64: 1, 16, 32>}, {transform_indices = @transform_4, window_bounds = array<i64: 1, 8, 1>}, {transform_indices = @transform_5, window_bounds = array<i64: 1, 8, 8, 1>}, {transform_indices = @transform_6, window_bounds = array<i64: 1, 8, 8, 1>}, {pipeline_mode = #tpu.pipeline_mode<synchronous>, transform_indices = @transform_7, window_bounds = array<i64: 32, 32>}, {pipeline_mode = #tpu.pipeline_mode<synchronous>, transform_indices = @transform_8, window_bounds = array<i64: 32, 32>}, {pipeline_mode = #tpu.pipeline_mode<synchronous>, transform_indices = @transform_9, window_bounds = array<i64: 32, 64>}, {pipeline_mode = #tpu.pipeline_mode<synchronous>, transform_indices = @transform_10, window_bounds = array<i64: 32, 64>}, {pipeline_mode = #tpu.pipeline_mode<synchronous>, transform_indices = @transform_11, window_bounds = array<i64: 32, 32>}, {pipeline_mode = #tpu.pipeline_mode<synchronous>, transform_indices = @transform_12, window_bounds = array<i64: 1, 32>}, {pipeline_mode = #tpu.pipeline_mode<synchronous>, transform_indices = @transform_13, window_bounds = array<i64: 1, 32>}, {pipeline_mode = #tpu.pipeline_mode<synchronous>, transform_indices = @transform_14, window_bounds = array<i64: 1, 32>}, {pipeline_mode = #tpu.pipeline_mode<synchronous>, transform_indices = @transform_15, window_bounds = array<i64: 1, 32>}, {pipeline_mode = #tpu.pipeline_mode<synchronous>, transform_indices = @transform_16, window_bounds = array<i64: 32, 128>}, {pipeline_mode = #tpu.pipeline_mode<synchronous>, transform_indices = @transform_17, window_bounds = array<i64: 1, 128>}, {pipeline_mode = #tpu.pipeline_mode<synchronous>, transform_indices = @transform_18, window_bounds = array<i64: 128, 32>}, {pipeline_mode = #tpu.pipeline_mode<synchronous>, transform_indices = @transform_19, window_bounds = array<i64: 1, 32>}, {transform_indices = @transform_20, window_bounds = array<i64: 1, 8, 32>}]} {
    %c0 = arith.constant 0 : index
    %c0_0 = arith.constant 0 : index
    %c0_1 = arith.constant 0 : index
    %0 = vector.load %arg2[%c0, %c0_0, %c0_1] : memref<1x8x32xf32, #tpu.memory_space<vmem>>, vector<1x8x32xf32>
    %1 = vector.shape_cast %0 : vector<1x8x32xf32> to vector<8x32xf32>
    %c0_2 = arith.constant 0 : index
    %c0_3 = arith.constant 0 : index
    %c0_4 = arith.constant 0 : index
    %2 = vector.load %arg3[%c0_2, %c0_3, %c0_4] : memref<1x64x32xbf16, #tpu.memory_space<vmem>>, vector<1x64x32xbf16>
    %3 = vector.shape_cast %2 : vector<1x64x32xbf16> to vector<64x32xbf16>
    %c0_5 = arith.constant 0 : index
    %c0_6 = arith.constant 0 : index
    %c0_7 = arith.constant 0 : index
    %c0_8 = arith.constant 0 : index
    %4 = vector.load %arg4[%c0_5, %c0_6, %c0_7, %c0_8] : memref<1x8x8x1xi32, #tpu.memory_space<vmem>>, vector<1x8x8x1xi32>
    %5 = vector.shape_cast %4 : vector<1x8x8x1xi32> to vector<8x8x1xi32>
    %6 = tpu.iota {dimensions = array<i32: 2>} : vector<8x8x16xi32>
    %7 = vector.broadcast %5 : vector<8x8x1xi32> to vector<8x8x16xi32>
    %8 = arith.cmpi eq, %7, %6 : vector<8x8x16xi32>
    %9 = arith.extui %8 : vector<8x8x16xi1> to vector<8x8x16xi32>
    %10 = arith.sitofp %9 : vector<8x8x16xi32> to vector<8x8x16xf32>
    %11 = arith.truncf %10 : vector<8x8x16xf32> to vector<8x8x16xbf16>
    %12 = vector.shape_cast %11 : vector<8x8x16xbf16> to vector<64x16xbf16>
    %c0_9 = arith.constant 0 : index
    %c0_10 = arith.constant 0 : index
    %c0_11 = arith.constant 0 : index
    %13 = vector.load %arg5[%c0_9, %c0_10, %c0_11] : memref<1x16x32xbf16, #tpu.memory_space<vmem>>, vector<1x16x32xbf16>
    %14 = vector.shape_cast %13 : vector<1x16x32xbf16> to vector<16x32xbf16>
    %cst = arith.constant dense<0.000000e+00> : vector<64x32xf32>
    %15 = tpu.matmul %12, %14, %cst {dimension_numbers = #tpu.dot_dimension_numbers<[1], [0], [0], [1], [0, 0, 1, 1], [], []>} : vector<64x16xbf16>, vector<16x32xbf16>, vector<64x32xf32> -> vector<64x32xf32>
    %c0_12 = arith.constant 0 : index
    %c0_13 = arith.constant 0 : index
    %16 = vector.load %arg11[%c0_12, %c0_13] : memref<32x64xbf16, #tpu.memory_space<vmem>>, vector<32x64xbf16>
    %cst_14 = arith.constant dense<0.000000e+00> : vector<64x64xf32>
    %17 = tpu.matmul %3, %16, %cst_14 {dimension_numbers = #tpu.dot_dimension_numbers<[1], [0], [0], [1], [0, 0, 1, 1], [], []>} : vector<64x32xbf16>, vector<32x64xbf16>, vector<64x64xf32> -> vector<64x64xf32>
    %18 = arith.truncf %15 : vector<64x32xf32> to vector<64x32xbf16>
    %c0_15 = arith.constant 0 : index
    %c0_16 = arith.constant 0 : index
    %19 = vector.load %arg12[%c0_15, %c0_16] : memref<32x64xbf16, #tpu.memory_space<vmem>>, vector<32x64xbf16>
    %cst_17 = arith.constant dense<0.000000e+00> : vector<64x64xf32>
    %20 = tpu.matmul %18, %19, %cst_17 {dimension_numbers = #tpu.dot_dimension_numbers<[1], [0], [0], [1], [0, 0, 1, 1], [], []>} : vector<64x32xbf16>, vector<32x64xbf16>, vector<64x64xf32> -> vector<64x64xf32>
    %21 = arith.addf %17, %20 : vector<64x64xf32>
    %22 = vector.shape_cast %21 : vector<64x64xf32> to vector<8x8x64xf32>
    %23 = arith.truncf %22 : vector<8x8x64xf32> to vector<8x8x64xbf16>
    %24 = vector.extract_strided_slice %23 {offsets = [0, 0, 0], sizes = [8, 8, 32], strides = [1, 1, 1]} : vector<8x8x64xbf16> to vector<8x8x32xbf16>
    %25 = vector.extract_strided_slice %23 {offsets = [0, 0, 32], sizes = [8, 8, 32], strides = [1, 1, 1]} : vector<8x8x64xbf16> to vector<8x8x32xbf16>
    %26 = arith.truncf %1 : vector<8x32xf32> to vector<8x32xbf16>
    %c0_18 = arith.constant 0 : index
    %c0_19 = arith.constant 0 : index
    %27 = vector.load %arg10[%c0_18, %c0_19] : memref<32x32xbf16, #tpu.memory_space<vmem>>, vector<32x32xbf16>
    %cst_20 = arith.constant dense<0.000000e+00> : vector<8x32xf32>
    %28 = tpu.matmul %26, %27, %cst_20 {dimension_numbers = #tpu.dot_dimension_numbers<[1], [0], [0], [1], [0, 0, 1, 1], [], []>} : vector<8x32xbf16>, vector<32x32xbf16>, vector<8x32xf32> -> vector<8x32xf32>
    %cst_21 = arith.constant 0.353553385 : f32
    %29 = vector.broadcast %cst_21 : f32 to vector<8x32xf32>
    %30 = arith.mulf %28, %29 : vector<8x32xf32>
    %31 = vector.shape_cast %30 : vector<8x32xf32> to vector<8x1x32xf32>
    %32 = arith.extf %24 : vector<8x8x32xbf16> to vector<8x8x32xf32>
    %33 = vector.broadcast %31 : vector<8x1x32xf32> to vector<8x8x32xf32>
    %34 = arith.mulf %33, %32 : vector<8x8x32xf32>
    %35 = vector.shape_cast %34 : vector<8x8x32xf32> to vector<64x32xf32>
    %36 = arith.truncf %35 : vector<64x32xf32> to vector<64x32xbf16>
    %c0_22 = arith.constant 0 : index
    %c0_23 = arith.constant 0 : index
    %37 = vector.load %arg9[%c0_22, %c0_23] : memref<32x32xbf16, #tpu.memory_space<vmem>>, vector<32x32xbf16>
    %cst_24 = arith.constant dense<0.000000e+00> : vector<64x32xf32>
    %38 = tpu.matmul %36, %37, %cst_24 {dimension_numbers = #tpu.dot_dimension_numbers<[1], [0], [0], [1], [0, 0, 1, 1], [], []>} : vector<64x32xbf16>, vector<32x32xbf16>, vector<64x32xf32> -> vector<64x32xf32>
    %39 = vector.shape_cast %38 : vector<64x32xf32> to vector<8x8x32xf32>
    %c0_25 = arith.constant 0 : index
    %c0_26 = arith.constant 0 : index
    %c0_27 = arith.constant 0 : index
    %c0_28 = arith.constant 0 : index
    %40 = vector.load %arg7[%c0_25, %c0_26, %c0_27, %c0_28] : memref<1x8x8x1xf32, #tpu.memory_space<vmem>>, vector<1x8x8x1xf32>
    %41 = vector.shape_cast %40 : vector<1x8x8x1xf32> to vector<8x8x1xf32>
    %cst_29 = arith.constant 0.000000e+00 : f32
    %42 = vector.broadcast %cst_29 : f32 to vector<8x8x1xf32>
    %43 = arith.cmpf ogt, %41, %42 : vector<8x8x1xf32>
    %cst_30 = arith.constant -3.40282347E+38 : f32
    %44 = vector.shape_cast %43 : vector<8x8x1xi1> to vector<8x8x1xi1>
    %45 = vector.broadcast %44 : vector<8x8x1xi1> to vector<8x8x32xi1>
    %46 = vector.broadcast %cst_30 : f32 to vector<8x8x32xf32>
    %47 = arith.select %45, %39, %46 : vector<8x8x32xi1>, vector<8x8x32xf32>
    %cst_31 = arith.constant dense<0xFF800000> : vector<8x32xf32>
    %48 = vector.multi_reduction <maximumf>, %47, %cst_31 [1] : vector<8x8x32xf32> to vector<8x32xf32>
    %49 = vector.shape_cast %48 : vector<8x32xf32> to vector<8x1x32xf32>
    %50 = vector.broadcast %49 : vector<8x1x32xf32> to vector<8x8x32xf32>
    %51 = arith.subf %47, %50 : vector<8x8x32xf32>
    %52 = math.exp %51 : vector<8x8x32xf32>
    %cst_32 = arith.constant dense<0.000000e+00> : vector<8x32xf32>
    %53 = vector.multi_reduction <add>, %52, %cst_32 [1] : vector<8x8x32xf32> to vector<8x32xf32>
    %54 = vector.shape_cast %53 : vector<8x32xf32> to vector<8x1x32xf32>
    %55 = tpu.reciprocal %54 {approx = true} : vector<8x1x32xf32> -> vector<8x1x32xf32>
    %56 = vector.broadcast %55 : vector<8x1x32xf32> to vector<8x8x32xf32>
    %57 = arith.mulf %52, %56 : vector<8x8x32xf32>
    %58 = vector.broadcast %41 : vector<8x8x1xf32> to vector<8x8x32xf32>
    %59 = arith.mulf %58, %57 : vector<8x8x32xf32>
    %60 = arith.extf %25 : vector<8x8x32xbf16> to vector<8x8x32xf32>
    %61 = arith.mulf %59, %60 : vector<8x8x32xf32>
    %cst_33 = arith.constant dense<0.000000e+00> : vector<8x32xf32>
    %62 = vector.multi_reduction <add>, %61, %cst_33 [1] : vector<8x8x32xf32> to vector<8x32xf32>
    %63 = arith.truncf %62 : vector<8x32xf32> to vector<8x32xbf16>
    %c0_34 = arith.constant 0 : index
    %c0_35 = arith.constant 0 : index
    %64 = vector.load %arg13[%c0_34, %c0_35] : memref<32x32xbf16, #tpu.memory_space<vmem>>, vector<32x32xbf16>
    %cst_36 = arith.constant dense<0.000000e+00> : vector<8x32xf32>
    %65 = tpu.matmul %63, %64, %cst_36 {dimension_numbers = #tpu.dot_dimension_numbers<[1], [0], [0], [1], [0, 0, 1, 1], [], []>} : vector<8x32xbf16>, vector<32x32xbf16>, vector<8x32xf32> -> vector<8x32xf32>
    %66 = arith.addf %1, %65 : vector<8x32xf32>
    %c0_37 = arith.constant 0 : index
    %c0_38 = arith.constant 0 : index
    %67 = vector.load %arg14[%c0_37, %c0_38] : memref<1x32xf32, #tpu.memory_space<vmem>>, vector<1x32xf32>
    %c0_39 = arith.constant 0 : index
    %c0_40 = arith.constant 0 : index
    %68 = vector.load %arg15[%c0_39, %c0_40] : memref<1x32xf32, #tpu.memory_space<vmem>>, vector<1x32xf32>
    %cst_41 = arith.constant dense<0.000000e+00> : vector<8xf32>
    %69 = vector.multi_reduction <add>, %66, %cst_41 [1] : vector<8x32xf32> to vector<8xf32>
    %70 = vector.shape_cast %69 : vector<8xf32> to vector<8x1xf32>
    %cst_42 = arith.constant 3.200000e+01 : f32
    %71 = vector.broadcast %cst_42 : f32 to vector<8x1xf32>
    %72 = arith.divf %70, %71 : vector<8x1xf32>
    %73 = vector.broadcast %72 : vector<8x1xf32> to vector<8x32xf32>
    %74 = arith.subf %66, %73 : vector<8x32xf32>
    %75 = arith.mulf %74, %74 : vector<8x32xf32>
    %cst_43 = arith.constant dense<0.000000e+00> : vector<8xf32>
    %76 = vector.multi_reduction <add>, %75, %cst_43 [1] : vector<8x32xf32> to vector<8xf32>
    %77 = vector.shape_cast %76 : vector<8xf32> to vector<8x1xf32>
    %cst_44 = arith.constant 0.0322580636 : f32
    %78 = vector.broadcast %cst_44 : f32 to vector<8x1xf32>
    %79 = arith.mulf %77, %78 : vector<8x1xf32>
    %cst_45 = arith.constant 9.99999997E-7 : f32
    %80 = vector.broadcast %cst_45 : f32 to vector<8x1xf32>
    %81 = arith.addf %79, %80 : vector<8x1xf32>
    %82 = math.sqrt %81 : vector<8x1xf32>
    %83 = vector.broadcast %72 : vector<8x1xf32> to vector<8x32xf32>
    %84 = arith.subf %66, %83 : vector<8x32xf32>
    %85 = vector.broadcast %67 : vector<1x32xf32> to vector<8x32xf32>
    %86 = arith.mulf %85, %84 : vector<8x32xf32>
    %cst_46 = arith.constant 9.99999997E-7 : f32
    %87 = vector.broadcast %cst_46 : f32 to vector<8x1xf32>
    %88 = arith.addf %82, %87 : vector<8x1xf32>
    %89 = vector.broadcast %88 : vector<8x1xf32> to vector<8x32xf32>
    %90 = arith.divf %86, %89 : vector<8x32xf32>
    %91 = vector.broadcast %68 : vector<1x32xf32> to vector<8x32xf32>
    %92 = arith.addf %90, %91 : vector<8x32xf32>
    %93 = arith.truncf %92 : vector<8x32xf32> to vector<8x32xbf16>
    %c0_47 = arith.constant 0 : index
    %c0_48 = arith.constant 0 : index
    %94 = vector.load %arg18[%c0_47, %c0_48] : memref<32x128xbf16, #tpu.memory_space<vmem>>, vector<32x128xbf16>
    %cst_49 = arith.constant dense<0.000000e+00> : vector<8x128xf32>
    %95 = tpu.matmul %93, %94, %cst_49 {dimension_numbers = #tpu.dot_dimension_numbers<[1], [0], [0], [1], [0, 0, 1, 1], [], []>} : vector<8x32xbf16>, vector<32x128xbf16>, vector<8x128xf32> -> vector<8x128xf32>
    %c0_50 = arith.constant 0 : index
    %c0_51 = arith.constant 0 : index
    %96 = vector.load %arg19[%c0_50, %c0_51] : memref<1x128xf32, #tpu.memory_space<vmem>>, vector<1x128xf32>
    %97 = vector.broadcast %96 : vector<1x128xf32> to vector<8x128xf32>
    %98 = arith.addf %95, %97 : vector<8x128xf32>
    %cst_52 = arith.constant 0.000000e+00 : f32
    %99 = vector.broadcast %cst_52 : f32 to vector<8x128xf32>
    %100 = arith.maximumf %98, %99 : vector<8x128xf32>
    %101 = arith.truncf %100 : vector<8x128xf32> to vector<8x128xbf16>
    %c0_53 = arith.constant 0 : index
    %c0_54 = arith.constant 0 : index
    %102 = vector.load %arg20[%c0_53, %c0_54] : memref<128x32xbf16, #tpu.memory_space<vmem>>, vector<128x32xbf16>
    %cst_55 = arith.constant dense<0.000000e+00> : vector<8x32xf32>
    %103 = tpu.matmul %101, %102, %cst_55 {dimension_numbers = #tpu.dot_dimension_numbers<[1], [0], [0], [1], [0, 0, 1, 1], [], []>} : vector<8x128xbf16>, vector<128x32xbf16>, vector<8x32xf32> -> vector<8x32xf32>
    %c0_56 = arith.constant 0 : index
    %c0_57 = arith.constant 0 : index
    %104 = vector.load %arg21[%c0_56, %c0_57] : memref<1x32xf32, #tpu.memory_space<vmem>>, vector<1x32xf32>
    %105 = vector.broadcast %104 : vector<1x32xf32> to vector<8x32xf32>
    %106 = arith.addf %103, %105 : vector<8x32xf32>
    %107 = arith.addf %92, %106 : vector<8x32xf32>
    %c0_58 = arith.constant 0 : index
    %c0_59 = arith.constant 0 : index
    %108 = vector.load %arg16[%c0_58, %c0_59] : memref<1x32xf32, #tpu.memory_space<vmem>>, vector<1x32xf32>
    %c0_60 = arith.constant 0 : index
    %c0_61 = arith.constant 0 : index
    %109 = vector.load %arg17[%c0_60, %c0_61] : memref<1x32xf32, #tpu.memory_space<vmem>>, vector<1x32xf32>
    %cst_62 = arith.constant dense<0.000000e+00> : vector<8xf32>
    %110 = vector.multi_reduction <add>, %107, %cst_62 [1] : vector<8x32xf32> to vector<8xf32>
    %111 = vector.shape_cast %110 : vector<8xf32> to vector<8x1xf32>
    %cst_63 = arith.constant 3.200000e+01 : f32
    %112 = vector.broadcast %cst_63 : f32 to vector<8x1xf32>
    %113 = arith.divf %111, %112 : vector<8x1xf32>
    %114 = vector.broadcast %113 : vector<8x1xf32> to vector<8x32xf32>
    %115 = arith.subf %107, %114 : vector<8x32xf32>
    %116 = arith.mulf %115, %115 : vector<8x32xf32>
    %cst_64 = arith.constant dense<0.000000e+00> : vector<8xf32>
    %117 = vector.multi_reduction <add>, %116, %cst_64 [1] : vector<8x32xf32> to vector<8xf32>
    %118 = vector.shape_cast %117 : vector<8xf32> to vector<8x1xf32>
    %cst_65 = arith.constant 0.0322580636 : f32
    %119 = vector.broadcast %cst_65 : f32 to vector<8x1xf32>
    %120 = arith.mulf %118, %119 : vector<8x1xf32>
    %cst_66 = arith.constant 9.99999997E-7 : f32
    %121 = vector.broadcast %cst_66 : f32 to vector<8x1xf32>
    %122 = arith.addf %120, %121 : vector<8x1xf32>
    %123 = math.sqrt %122 : vector<8x1xf32>
    %124 = vector.broadcast %113 : vector<8x1xf32> to vector<8x32xf32>
    %125 = arith.subf %107, %124 : vector<8x32xf32>
    %126 = vector.broadcast %108 : vector<1x32xf32> to vector<8x32xf32>
    %127 = arith.mulf %126, %125 : vector<8x32xf32>
    %cst_67 = arith.constant 9.99999997E-7 : f32
    %128 = vector.broadcast %cst_67 : f32 to vector<8x1xf32>
    %129 = arith.addf %123, %128 : vector<8x1xf32>
    %130 = vector.broadcast %129 : vector<8x1xf32> to vector<8x32xf32>
    %131 = arith.divf %127, %130 : vector<8x32xf32>
    %132 = vector.broadcast %109 : vector<1x32xf32> to vector<8x32xf32>
    %133 = arith.addf %131, %132 : vector<8x32xf32>
    %c0_68 = arith.constant 0 : index
    %c0_69 = arith.constant 0 : index
    %c0_70 = arith.constant 0 : index
    %134 = vector.load %arg6[%c0_68, %c0_69, %c0_70] : memref<1x8x1xf32, #tpu.memory_space<vmem>>, vector<1x8x1xf32>
    %135 = vector.shape_cast %134 : vector<1x8x1xf32> to vector<8x1xf32>
    %136 = vector.broadcast %135 : vector<8x1xf32> to vector<8x32xf32>
    %137 = arith.mulf %136, %133 : vector<8x32xf32>
    %c0_71 = arith.constant 0 : index
    %c0_72 = arith.constant 0 : index
    %c0_73 = arith.constant 0 : index
    %138 = vector.load %arg22[%c0_71, %c0_72, %c0_73] : memref<1x8x32xf32, #tpu.memory_space<vmem>>, vector<1x8x32xf32>
    %139 = vector.shape_cast %138 : vector<1x8x32xf32> to vector<8x32xf32>
    %140 = vector.shape_cast %137 : vector<8x32xf32> to vector<1x8x32xf32>
    tpu.vector_store %arg22[%c0_71, %c0_72, %c0_73], %140 {strides = array<i32>} : memref<1x8x32xf32, #tpu.memory_space<vmem>>, vector<1x8x32xf32>,
    return
  }
  func.func @transform_0(%arg0: i32, %arg1: i32) -> (i32, i32, i32) {
    %c0_i32 = arith.constant 0 : i32
    %c0_i32_0 = arith.constant 0 : i32
    return %arg0, %arg1, %c0_i32 : i32, i32, i32
  }
  func.func @transform_1(%arg0: i32, %arg1: i32) -> (i32, i32, i32) {
    %c0_i32 = arith.constant 0 : i32
    %c0_i32_0 = arith.constant 0 : i32
    return %arg0, %arg1, %c0_i32 : i32, i32, i32
  }
  func.func @transform_2(%arg0: i32, %arg1: i32) -> (i32, i32, i32, i32) {
    %c0_i32 = arith.constant 0 : i32
    %c0_i32_0 = arith.constant 0 : i32
    %c0_i32_1 = arith.constant 0 : i32
    return %arg0, %arg1, %c0_i32, %c0_i32_0 : i32, i32, i32, i32
  }
  func.func @transform_3(%arg0: i32, %arg1: i32) -> (i32, i32, i32) {
    %c0_i32 = arith.constant 0 : i32
    %c0_i32_0 = arith.constant 0 : i32
    %c0_i32_1 = arith.constant 0 : i32
    return %arg0, %c0_i32, %c0_i32_0 : i32, i32, i32
  }
  func.func @transform_4(%arg0: i32, %arg1: i32) -> (i32, i32, i32) {
    %c0_i32 = arith.constant 0 : i32
    %c0_i32_0 = arith.constant 0 : i32
    return %arg0, %arg1, %c0_i32 : i32, i32, i32
  }
  func.func @transform_5(%arg0: i32, %arg1: i32) -> (i32, i32, i32, i32) {
    %c0_i32 = arith.constant 0 : i32
    %c0_i32_0 = arith.constant 0 : i32
    %c0_i32_1 = arith.constant 0 : i32
    return %arg0, %arg1, %c0_i32, %c0_i32_0 : i32, i32, i32, i32
  }
  func.func @transform_6(%arg0: i32, %arg1: i32) -> (i32, i32, i32, i32) {
    %c0_i32 = arith.constant 0 : i32
    %c0_i32_0 = arith.constant 0 : i32
    %c0_i32_1 = arith.constant 0 : i32
    return %arg0, %arg1, %c0_i32, %c0_i32_0 : i32, i32, i32, i32
  }
  func.func @transform_7(%arg0: i32, %arg1: i32) -> (i32, i32) {
    %c0_i32 = arith.constant 0 : i32
    %c0_i32_0 = arith.constant 0 : i32
    %c0_i32_1 = arith.constant 0 : i32
    return %c0_i32, %c0_i32_0 : i32, i32
  }
  func.func @transform_8(%arg0: i32, %arg1: i32) -> (i32, i32) {
    %c0_i32 = arith.constant 0 : i32
    %c0_i32_0 = arith.constant 0 : i32
    %c0_i32_1 = arith.constant 0 : i32
    return %c0_i32, %c0_i32_0 : i32, i32
  }
  func.func @transform_9(%arg0: i32, %arg1: i32) -> (i32, i32) {
    %c0_i32 = arith.constant 0 : i32
    %c0_i32_0 = arith.constant 0 : i32
    %c0_i32_1 = arith.constant 0 : i32
    return %c0_i32, %c0_i32_0 : i32, i32
  }
  func.func @transform_10(%arg0: i32, %arg1: i32) -> (i32, i32) {
    %c0_i32 = arith.constant 0 : i32
    %c0_i32_0 = arith.constant 0 : i32
    %c0_i32_1 = arith.constant 0 : i32
    return %c0_i32, %c0_i32_0 : i32, i32
  }
  func.func @transform_11(%arg0: i32, %arg1: i32) -> (i32, i32) {
    %c0_i32 = arith.constant 0 : i32
    %c0_i32_0 = arith.constant 0 : i32
    %c0_i32_1 = arith.constant 0 : i32
    return %c0_i32, %c0_i32_0 : i32, i32
  }
  func.func @transform_12(%arg0: i32, %arg1: i32) -> (i32, i32) {
    %c0_i32 = arith.constant 0 : i32
    %c0_i32_0 = arith.constant 0 : i32
    %c0_i32_1 = arith.constant 0 : i32
    return %c0_i32, %c0_i32_0 : i32, i32
  }
  func.func @transform_13(%arg0: i32, %arg1: i32) -> (i32, i32) {
    %c0_i32 = arith.constant 0 : i32
    %c0_i32_0 = arith.constant 0 : i32
    %c0_i32_1 = arith.constant 0 : i32
    return %c0_i32, %c0_i32_0 : i32, i32
  }
  func.func @transform_14(%arg0: i32, %arg1: i32) -> (i32, i32) {
    %c0_i32 = arith.constant 0 : i32
    %c0_i32_0 = arith.constant 0 : i32
    %c0_i32_1 = arith.constant 0 : i32
    return %c0_i32, %c0_i32_0 : i32, i32
  }
  func.func @transform_15(%arg0: i32, %arg1: i32) -> (i32, i32) {
    %c0_i32 = arith.constant 0 : i32
    %c0_i32_0 = arith.constant 0 : i32
    %c0_i32_1 = arith.constant 0 : i32
    return %c0_i32, %c0_i32_0 : i32, i32
  }
  func.func @transform_16(%arg0: i32, %arg1: i32) -> (i32, i32) {
    %c0_i32 = arith.constant 0 : i32
    %c0_i32_0 = arith.constant 0 : i32
    %c0_i32_1 = arith.constant 0 : i32
    return %c0_i32, %c0_i32_0 : i32, i32
  }
  func.func @transform_17(%arg0: i32, %arg1: i32) -> (i32, i32) {
    %c0_i32 = arith.constant 0 : i32
    %c0_i32_0 = arith.constant 0 : i32
    %c0_i32_1 = arith.constant 0 : i32
    return %c0_i32, %c0_i32_0 : i32, i32
  }
  func.func @transform_18(%arg0: i32, %arg1: i32) -> (i32, i32) {
    %c0_i32 = arith.constant 0 : i32
    %c0_i32_0 = arith.constant 0 : i32
    %c0_i32_1 = arith.constant 0 : i32
    return %c0_i32, %c0_i32_0 : i32, i32
  }
  func.func @transform_19(%arg0: i32, %arg1: i32) -> (i32, i32) {
    %c0_i32 = arith.constant 0 : i32
    %c0_i32_0 = arith.constant 0 : i32
    %c0_i32_1 = arith.constant 0 : i32
    return %c0_i32, %c0_i32_0 : i32, i32
  }
  func.func @transform_20(%arg0: i32, %arg1: i32) -> (i32, i32, i32) {
    %c0_i32 = arith.constant 0 : i32
    %c0_i32_0 = arith.constant 0 : i32
    return %arg0, %arg1, %c0_i32 : i32, i32, i32
  }
}

module attributes {stable_mosaic.version = 11 : i64} {
  func.func @kernel(%arg0: i32, %arg1: i32, %arg2: memref<1x8x32xf32, #tpu.memory_space<vmem>>, %arg3: memref<1x64x32xbf16, #tpu.memory_space<vmem>>, %arg4: memref<1x8x8x1xi32, #tpu.memory_space<vmem>>, %arg5: memref<1x16x64xbf16, #tpu.memory_space<vmem>>, %arg6: memref<1x8x1xf32, #tpu.memory_space<vmem>>, %arg7: memref<1x8x8x1xf32, #tpu.memory_space<vmem>>, %arg8: memref<1x8x8x1xf32, #tpu.memory_space<vmem>>, %arg9: memref<32x32xbf16, #tpu.memory_space<vmem>>, %arg10: memref<32x32xbf16, #tpu.memory_space<vmem>>, %arg11: memref<32x64xbf16, #tpu.memory_space<vmem>>, %arg12: memref<64x64xbf16, #tpu.memory_space<vmem>>, %arg13: memref<32x32xbf16, #tpu.memory_space<vmem>>, %arg14: memref<1x32xf32, #tpu.memory_space<vmem>>, %arg15: memref<1x32xf32, #tpu.memory_space<vmem>>, %arg16: memref<1x32xf32, #tpu.memory_space<vmem>>, %arg17: memref<1x32xf32, #tpu.memory_space<vmem>>, %arg18: memref<32x128xbf16, #tpu.memory_space<vmem>>, %arg19: memref<1x128xf32, #tpu.memory_space<vmem>>, %arg20: memref<128x32xbf16, #tpu.memory_space<vmem>>, %arg21: memref<1x32xf32, #tpu.memory_space<vmem>>, %arg22: memref<1x8x32xf32, #tpu.memory_space<vmem>>) attributes {dimension_semantics = [#tpu.dimension_semantics<parallel>, #tpu.dimension_semantics<parallel>], iteration_bounds = array<i64: 2, 2>, scalar_prefetch = 0 : i64, scratch_operands = 0 : i64, tpu.core_type = #tpu.core_type<tc>, window_params = [{transform_indices = @transform_0, window_bounds = array<i64: 1, 8, 32>}, {transform_indices = @transform_1, window_bounds = array<i64: 1, 64, 32>}, {transform_indices = @transform_2, window_bounds = array<i64: 1, 8, 8, 1>}, {transform_indices = @transform_3, window_bounds = array<i64: 1, 16, 64>}, {transform_indices = @transform_4, window_bounds = array<i64: 1, 8, 1>}, {transform_indices = @transform_5, window_bounds = array<i64: 1, 8, 8, 1>}, {transform_indices = @transform_6, window_bounds = array<i64: 1, 8, 8, 1>}, {pipeline_mode = #tpu.pipeline_mode<synchronous>, transform_indices = @transform_7, window_bounds = array<i64: 32, 32>}, {pipeline_mode = #tpu.pipeline_mode<synchronous>, transform_indices = @transform_8, window_bounds = array<i64: 32, 32>}, {pipeline_mode = #tpu.pipeline_mode<synchronous>, transform_indices = @transform_9, window_bounds = array<i64: 32, 64>}, {pipeline_mode = #tpu.pipeline_mode<synchronous>, transform_indices = @transform_10, window_bounds = array<i64: 64, 64>}, {pipeline_mode = #tpu.pipeline_mode<synchronous>, transform_indices = @transform_11, window_bounds = array<i64: 32, 32>}, {pipeline_mode = #tpu.pipeline_mode<synchronous>, transform_indices = @transform_12, window_bounds = array<i64: 1, 32>}, {pipeline_mode = #tpu.pipeline_mode<synchronous>, transform_indices = @transform_13, window_bounds = array<i64: 1, 32>}, {pipeline_mode = #tpu.pipeline_mode<synchronous>, transform_indices = @transform_14, window_bounds = array<i64: 1, 32>}, {pipeline_mode = #tpu.pipeline_mode<synchronous>, transform_indices = @transform_15, window_bounds = array<i64: 1, 32>}, {pipeline_mode = #tpu.pipeline_mode<synchronous>, transform_indices = @transform_16, window_bounds = array<i64: 32, 128>}, {pipeline_mode = #tpu.pipeline_mode<synchronous>, transform_indices = @transform_17, window_bounds = array<i64: 1, 128>}, {pipeline_mode = #tpu.pipeline_mode<synchronous>, transform_indices = @transform_18, window_bounds = array<i64: 128, 32>}, {pipeline_mode = #tpu.pipeline_mode<synchronous>, transform_indices = @transform_19, window_bounds = array<i64: 1, 32>}, {transform_indices = @transform_20, window_bounds = array<i64: 1, 8, 32>}]} {
    %c0 = arith.constant 0 : index
    %c0_0 = arith.constant 0 : index
    %c0_1 = arith.constant 0 : index
    %0 = vector.load %arg2[%c0, %c0_0, %c0_1] : memref<1x8x32xf32, #tpu.memory_space<vmem>>, vector<1x8x32xf32>
    %1 = vector.shape_cast %0 : vector<1x8x32xf32> to vector<8x32xf32>
    %c0_2 = arith.constant 0 : index
    %c0_3 = arith.constant 0 : index
    %c0_4 = arith.constant 0 : index
    %2 = vector.load %arg3[%c0_2, %c0_3, %c0_4] : memref<1x64x32xbf16, #tpu.memory_space<vmem>>, vector<1x64x32xbf16>
    %3 = vector.shape_cast %2 : vector<1x64x32xbf16> to vector<64x32xbf16>
    %c0_5 = arith.constant 0 : index
    %c0_6 = arith.constant 0 : index
    %c0_7 = arith.constant 0 : index
    %c0_8 = arith.constant 0 : index
    %4 = vector.load %arg4[%c0_5, %c0_6, %c0_7, %c0_8] : memref<1x8x8x1xi32, #tpu.memory_space<vmem>>, vector<1x8x8x1xi32>
    %5 = vector.shape_cast %4 : vector<1x8x8x1xi32> to vector<8x8x1xi32>
    %6 = tpu.iota {dimensions = array<i32: 2>} : vector<8x8x16xi32>
    %7 = vector.broadcast %5 : vector<8x8x1xi32> to vector<8x8x16xi32>
    %8 = arith.cmpi eq, %7, %6 : vector<8x8x16xi32>
    %9 = arith.extui %8 : vector<8x8x16xi1> to vector<8x8x16xi32>
    %10 = arith.sitofp %9 : vector<8x8x16xi32> to vector<8x8x16xf32>
    %11 = arith.truncf %10 : vector<8x8x16xf32> to vector<8x8x16xbf16>
    %12 = vector.shape_cast %11 : vector<8x8x16xbf16> to vector<64x16xbf16>
    %c0_9 = arith.constant 0 : index
    %c0_10 = arith.constant 0 : index
    %c0_11 = arith.constant 0 : index
    %13 = vector.load %arg5[%c0_9, %c0_10, %c0_11] : memref<1x16x64xbf16, #tpu.memory_space<vmem>>, vector<1x16x64xbf16>
    %14 = vector.shape_cast %13 : vector<1x16x64xbf16> to vector<16x64xbf16>
    %cst = arith.constant dense<0.000000e+00> : vector<64x64xf32>
    %15 = tpu.matmul %12, %14, %cst {dimension_numbers = #tpu.dot_dimension_numbers<[1], [0], [0], [1], [0, 0, 1, 1], [], []>} : vector<64x16xbf16>, vector<16x64xbf16>, vector<64x64xf32> -> vector<64x64xf32>
    %c0_12 = arith.constant 0 : index
    %c0_13 = arith.constant 0 : index
    %16 = vector.load %arg11[%c0_12, %c0_13] : memref<32x64xbf16, #tpu.memory_space<vmem>>, vector<32x64xbf16>
    %cst_14 = arith.constant dense<0.000000e+00> : vector<64x64xf32>
    %17 = tpu.matmul %3, %16, %cst_14 {dimension_numbers = #tpu.dot_dimension_numbers<[1], [0], [0], [1], [0, 0, 1, 1], [], []>} : vector<64x32xbf16>, vector<32x64xbf16>, vector<64x64xf32> -> vector<64x64xf32>
    %18 = arith.truncf %15 : vector<64x64xf32> to vector<64x64xbf16>
    %c0_15 = arith.constant 0 : index
    %c0_16 = arith.constant 0 : index
    %19 = vector.load %arg12[%c0_15, %c0_16] : memref<64x64xbf16, #tpu.memory_space<vmem>>, vector<64x64xbf16>
    %cst_17 = arith.constant dense<0.000000e+00> : vector<64x64xf32>
    %20 = tpu.matmul %18, %19, %cst_17 {dimension_numbers = #tpu.dot_dimension_numbers<[1], [0], [0], [1], [0, 0, 1, 1], [], []>} : vector<64x64xbf16>, vector<64x64xbf16>, vector<64x64xf32> -> vector<64x64xf32>
    %cst_18 = arith.constant 2.000000e+00 : f32
    %21 = vector.broadcast %cst_18 : f32 to vector<64x64xf32>
    %22 = arith.mulf %21, %17 : vector<64x64xf32>
    %23 = arith.addf %22, %20 : vector<64x64xf32>
    %24 = vector.shape_cast %23 : vector<64x64xf32> to vector<8x8x64xf32>
    %c0_19 = arith.constant 0 : index
    %c0_20 = arith.constant 0 : index
    %c0_21 = arith.constant 0 : index
    %c0_22 = arith.constant 0 : index
    %25 = vector.load %arg8[%c0_19, %c0_20, %c0_21, %c0_22] : memref<1x8x8x1xf32, #tpu.memory_space<vmem>>, vector<1x8x8x1xf32>
    %26 = vector.shape_cast %25 : vector<1x8x8x1xf32> to vector<8x8x1xf32>
    %27 = vector.broadcast %26 : vector<8x8x1xf32> to vector<8x8x64xf32>
    %28 = arith.mulf %27, %24 : vector<8x8x64xf32>
    %29 = arith.truncf %28 : vector<8x8x64xf32> to vector<8x8x64xbf16>
    %30 = vector.extract_strided_slice %29 {offsets = [0, 0, 0], sizes = [8, 8, 32], strides = [1, 1, 1]} : vector<8x8x64xbf16> to vector<8x8x32xbf16>
    %31 = vector.extract_strided_slice %29 {offsets = [0, 0, 32], sizes = [8, 8, 32], strides = [1, 1, 1]} : vector<8x8x64xbf16> to vector<8x8x32xbf16>
    %32 = arith.truncf %1 : vector<8x32xf32> to vector<8x32xbf16>
    %c0_23 = arith.constant 0 : index
    %c0_24 = arith.constant 0 : index
    %33 = vector.load %arg10[%c0_23, %c0_24] : memref<32x32xbf16, #tpu.memory_space<vmem>>, vector<32x32xbf16>
    %cst_25 = arith.constant dense<0.000000e+00> : vector<8x32xf32>
    %34 = tpu.matmul %32, %33, %cst_25 {dimension_numbers = #tpu.dot_dimension_numbers<[1], [0], [0], [1], [0, 0, 1, 1], [], []>} : vector<8x32xbf16>, vector<32x32xbf16>, vector<8x32xf32> -> vector<8x32xf32>
    %cst_26 = arith.constant 0.353553385 : f32
    %35 = vector.broadcast %cst_26 : f32 to vector<8x32xf32>
    %36 = arith.mulf %34, %35 : vector<8x32xf32>
    %37 = vector.shape_cast %36 : vector<8x32xf32> to vector<8x1x32xf32>
    %38 = arith.extf %30 : vector<8x8x32xbf16> to vector<8x8x32xf32>
    %39 = vector.broadcast %37 : vector<8x1x32xf32> to vector<8x8x32xf32>
    %40 = arith.mulf %39, %38 : vector<8x8x32xf32>
    %41 = vector.shape_cast %40 : vector<8x8x32xf32> to vector<64x32xf32>
    %42 = arith.truncf %41 : vector<64x32xf32> to vector<64x32xbf16>
    %c0_27 = arith.constant 0 : index
    %c0_28 = arith.constant 0 : index
    %43 = vector.load %arg9[%c0_27, %c0_28] : memref<32x32xbf16, #tpu.memory_space<vmem>>, vector<32x32xbf16>
    %cst_29 = arith.constant dense<0.000000e+00> : vector<64x32xf32>
    %44 = tpu.matmul %42, %43, %cst_29 {dimension_numbers = #tpu.dot_dimension_numbers<[1], [0], [0], [1], [0, 0, 1, 1], [], []>} : vector<64x32xbf16>, vector<32x32xbf16>, vector<64x32xf32> -> vector<64x32xf32>
    %45 = vector.shape_cast %44 : vector<64x32xf32> to vector<8x8x32xf32>
    %cst_30 = arith.constant dense<0xFF800000> : vector<8x32xf32>
    %46 = vector.multi_reduction <maximumf>, %45, %cst_30 [1] : vector<8x8x32xf32> to vector<8x32xf32>
    %47 = vector.shape_cast %46 : vector<8x32xf32> to vector<8x1x32xf32>
    %48 = vector.broadcast %47 : vector<8x1x32xf32> to vector<8x8x32xf32>
    %49 = arith.subf %45, %48 : vector<8x8x32xf32>
    %50 = math.exp %49 : vector<8x8x32xf32>
    %cst_31 = arith.constant dense<0.000000e+00> : vector<8x32xf32>
    %51 = vector.multi_reduction <add>, %50, %cst_31 [1] : vector<8x8x32xf32> to vector<8x32xf32>
    %52 = vector.shape_cast %51 : vector<8x32xf32> to vector<8x1x32xf32>
    %53 = tpu.reciprocal %52 {approx = true} : vector<8x1x32xf32> -> vector<8x1x32xf32>
    %54 = vector.broadcast %53 : vector<8x1x32xf32> to vector<8x8x32xf32>
    %55 = arith.mulf %50, %54 : vector<8x8x32xf32>
    %56 = arith.extf %31 : vector<8x8x32xbf16> to vector<8x8x32xf32>
    %57 = arith.mulf %55, %56 : vector<8x8x32xf32>
    %cst_32 = arith.constant dense<0.000000e+00> : vector<8x32xf32>
    %58 = vector.multi_reduction <add>, %57, %cst_32 [1] : vector<8x8x32xf32> to vector<8x32xf32>
    %59 = arith.truncf %58 : vector<8x32xf32> to vector<8x32xbf16>
    %c0_33 = arith.constant 0 : index
    %c0_34 = arith.constant 0 : index
    %60 = vector.load %arg13[%c0_33, %c0_34] : memref<32x32xbf16, #tpu.memory_space<vmem>>, vector<32x32xbf16>
    %cst_35 = arith.constant dense<0.000000e+00> : vector<8x32xf32>
    %61 = tpu.matmul %59, %60, %cst_35 {dimension_numbers = #tpu.dot_dimension_numbers<[1], [0], [0], [1], [0, 0, 1, 1], [], []>} : vector<8x32xbf16>, vector<32x32xbf16>, vector<8x32xf32> -> vector<8x32xf32>
    %62 = arith.addf %1, %61 : vector<8x32xf32>
    %c0_36 = arith.constant 0 : index
    %c0_37 = arith.constant 0 : index
    %63 = vector.load %arg14[%c0_36, %c0_37] : memref<1x32xf32, #tpu.memory_space<vmem>>, vector<1x32xf32>
    %c0_38 = arith.constant 0 : index
    %c0_39 = arith.constant 0 : index
    %64 = vector.load %arg15[%c0_38, %c0_39] : memref<1x32xf32, #tpu.memory_space<vmem>>, vector<1x32xf32>
    %cst_40 = arith.constant dense<0.000000e+00> : vector<8xf32>
    %65 = vector.multi_reduction <add>, %62, %cst_40 [1] : vector<8x32xf32> to vector<8xf32>
    %66 = vector.shape_cast %65 : vector<8xf32> to vector<8x1xf32>
    %cst_41 = arith.constant 3.200000e+01 : f32
    %67 = vector.broadcast %cst_41 : f32 to vector<8x1xf32>
    %68 = arith.divf %66, %67 : vector<8x1xf32>
    %69 = vector.broadcast %68 : vector<8x1xf32> to vector<8x32xf32>
    %70 = arith.subf %62, %69 : vector<8x32xf32>
    %71 = arith.mulf %70, %70 : vector<8x32xf32>
    %cst_42 = arith.constant dense<0.000000e+00> : vector<8xf32>
    %72 = vector.multi_reduction <add>, %71, %cst_42 [1] : vector<8x32xf32> to vector<8xf32>
    %73 = vector.shape_cast %72 : vector<8xf32> to vector<8x1xf32>
    %cst_43 = arith.constant 0.0322580636 : f32
    %74 = vector.broadcast %cst_43 : f32 to vector<8x1xf32>
    %75 = arith.mulf %73, %74 : vector<8x1xf32>
    %cst_44 = arith.constant 9.99999997E-7 : f32
    %76 = vector.broadcast %cst_44 : f32 to vector<8x1xf32>
    %77 = arith.addf %75, %76 : vector<8x1xf32>
    %78 = math.sqrt %77 : vector<8x1xf32>
    %79 = vector.broadcast %68 : vector<8x1xf32> to vector<8x32xf32>
    %80 = arith.subf %62, %79 : vector<8x32xf32>
    %81 = vector.broadcast %63 : vector<1x32xf32> to vector<8x32xf32>
    %82 = arith.mulf %81, %80 : vector<8x32xf32>
    %cst_45 = arith.constant 9.99999997E-7 : f32
    %83 = vector.broadcast %cst_45 : f32 to vector<8x1xf32>
    %84 = arith.addf %78, %83 : vector<8x1xf32>
    %85 = vector.broadcast %84 : vector<8x1xf32> to vector<8x32xf32>
    %86 = arith.divf %82, %85 : vector<8x32xf32>
    %87 = vector.broadcast %64 : vector<1x32xf32> to vector<8x32xf32>
    %88 = arith.addf %86, %87 : vector<8x32xf32>
    %89 = arith.truncf %88 : vector<8x32xf32> to vector<8x32xbf16>
    %c0_46 = arith.constant 0 : index
    %c0_47 = arith.constant 0 : index
    %90 = vector.load %arg18[%c0_46, %c0_47] : memref<32x128xbf16, #tpu.memory_space<vmem>>, vector<32x128xbf16>
    %cst_48 = arith.constant dense<0.000000e+00> : vector<8x128xf32>
    %91 = tpu.matmul %89, %90, %cst_48 {dimension_numbers = #tpu.dot_dimension_numbers<[1], [0], [0], [1], [0, 0, 1, 1], [], []>} : vector<8x32xbf16>, vector<32x128xbf16>, vector<8x128xf32> -> vector<8x128xf32>
    %c0_49 = arith.constant 0 : index
    %c0_50 = arith.constant 0 : index
    %92 = vector.load %arg19[%c0_49, %c0_50] : memref<1x128xf32, #tpu.memory_space<vmem>>, vector<1x128xf32>
    %93 = vector.broadcast %92 : vector<1x128xf32> to vector<8x128xf32>
    %94 = arith.addf %91, %93 : vector<8x128xf32>
    %cst_51 = arith.constant 0.000000e+00 : f32
    %95 = vector.broadcast %cst_51 : f32 to vector<8x128xf32>
    %96 = arith.maximumf %94, %95 : vector<8x128xf32>
    %97 = arith.truncf %96 : vector<8x128xf32> to vector<8x128xbf16>
    %c0_52 = arith.constant 0 : index
    %c0_53 = arith.constant 0 : index
    %98 = vector.load %arg20[%c0_52, %c0_53] : memref<128x32xbf16, #tpu.memory_space<vmem>>, vector<128x32xbf16>
    %cst_54 = arith.constant dense<0.000000e+00> : vector<8x32xf32>
    %99 = tpu.matmul %97, %98, %cst_54 {dimension_numbers = #tpu.dot_dimension_numbers<[1], [0], [0], [1], [0, 0, 1, 1], [], []>} : vector<8x128xbf16>, vector<128x32xbf16>, vector<8x32xf32> -> vector<8x32xf32>
    %c0_55 = arith.constant 0 : index
    %c0_56 = arith.constant 0 : index
    %100 = vector.load %arg21[%c0_55, %c0_56] : memref<1x32xf32, #tpu.memory_space<vmem>>, vector<1x32xf32>
    %101 = vector.broadcast %100 : vector<1x32xf32> to vector<8x32xf32>
    %102 = arith.addf %99, %101 : vector<8x32xf32>
    %103 = arith.addf %88, %102 : vector<8x32xf32>
    %c0_57 = arith.constant 0 : index
    %c0_58 = arith.constant 0 : index
    %104 = vector.load %arg16[%c0_57, %c0_58] : memref<1x32xf32, #tpu.memory_space<vmem>>, vector<1x32xf32>
    %c0_59 = arith.constant 0 : index
    %c0_60 = arith.constant 0 : index
    %105 = vector.load %arg17[%c0_59, %c0_60] : memref<1x32xf32, #tpu.memory_space<vmem>>, vector<1x32xf32>
    %cst_61 = arith.constant dense<0.000000e+00> : vector<8xf32>
    %106 = vector.multi_reduction <add>, %103, %cst_61 [1] : vector<8x32xf32> to vector<8xf32>
    %107 = vector.shape_cast %106 : vector<8xf32> to vector<8x1xf32>
    %cst_62 = arith.constant 3.200000e+01 : f32
    %108 = vector.broadcast %cst_62 : f32 to vector<8x1xf32>
    %109 = arith.divf %107, %108 : vector<8x1xf32>
    %110 = vector.broadcast %109 : vector<8x1xf32> to vector<8x32xf32>
    %111 = arith.subf %103, %110 : vector<8x32xf32>
    %112 = arith.mulf %111, %111 : vector<8x32xf32>
    %cst_63 = arith.constant dense<0.000000e+00> : vector<8xf32>
    %113 = vector.multi_reduction <add>, %112, %cst_63 [1] : vector<8x32xf32> to vector<8xf32>
    %114 = vector.shape_cast %113 : vector<8xf32> to vector<8x1xf32>
    %cst_64 = arith.constant 0.0322580636 : f32
    %115 = vector.broadcast %cst_64 : f32 to vector<8x1xf32>
    %116 = arith.mulf %114, %115 : vector<8x1xf32>
    %cst_65 = arith.constant 9.99999997E-7 : f32
    %117 = vector.broadcast %cst_65 : f32 to vector<8x1xf32>
    %118 = arith.addf %116, %117 : vector<8x1xf32>
    %119 = math.sqrt %118 : vector<8x1xf32>
    %120 = vector.broadcast %109 : vector<8x1xf32> to vector<8x32xf32>
    %121 = arith.subf %103, %120 : vector<8x32xf32>
    %122 = vector.broadcast %104 : vector<1x32xf32> to vector<8x32xf32>
    %123 = arith.mulf %122, %121 : vector<8x32xf32>
    %cst_66 = arith.constant 9.99999997E-7 : f32
    %124 = vector.broadcast %cst_66 : f32 to vector<8x1xf32>
    %125 = arith.addf %119, %124 : vector<8x1xf32>
    %126 = vector.broadcast %125 : vector<8x1xf32> to vector<8x32xf32>
    %127 = arith.divf %123, %126 : vector<8x32xf32>
    %128 = vector.broadcast %105 : vector<1x32xf32> to vector<8x32xf32>
    %129 = arith.addf %127, %128 : vector<8x32xf32>
    %c0_67 = arith.constant 0 : index
    %c0_68 = arith.constant 0 : index
    %c0_69 = arith.constant 0 : index
    %130 = vector.load %arg6[%c0_67, %c0_68, %c0_69] : memref<1x8x1xf32, #tpu.memory_space<vmem>>, vector<1x8x1xf32>
    %131 = vector.shape_cast %130 : vector<1x8x1xf32> to vector<8x1xf32>
    %132 = vector.broadcast %131 : vector<8x1xf32> to vector<8x32xf32>
    %133 = arith.mulf %132, %129 : vector<8x32xf32>
    %c0_70 = arith.constant 0 : index
    %c0_71 = arith.constant 0 : index
    %c0_72 = arith.constant 0 : index
    %134 = vector.load %arg22[%c0_70, %c0_71, %c0_72] : memref<1x8x32xf32, #tpu.memory_space<vmem>>, vector<1x8x32xf32>
    %135 = vector.shape_cast %134 : vector<1x8x32xf32> to vector<8x32xf32>
    %136 = vector.shape_cast %133 : vector<8x32xf32> to vector<1x8x32xf32>
    tpu.vector_store %arg22[%c0_70, %c0_71, %c0_72], %136 {strides = array<i32>} : memref<1x8x32xf32, #tpu.memory_space<vmem>>, vector<1x8x32xf32>,
    return
  }
  func.func @transform_0(%arg0: i32, %arg1: i32) -> (i32, i32, i32) {
    %c0_i32 = arith.constant 0 : i32
    %c0_i32_0 = arith.constant 0 : i32
    return %arg0, %arg1, %c0_i32 : i32, i32, i32
  }
  func.func @transform_1(%arg0: i32, %arg1: i32) -> (i32, i32, i32) {
    %c0_i32 = arith.constant 0 : i32
    %c0_i32_0 = arith.constant 0 : i32
    return %arg0, %arg1, %c0_i32 : i32, i32, i32
  }
  func.func @transform_2(%arg0: i32, %arg1: i32) -> (i32, i32, i32, i32) {
    %c0_i32 = arith.constant 0 : i32
    %c0_i32_0 = arith.constant 0 : i32
    %c0_i32_1 = arith.constant 0 : i32
    return %arg0, %arg1, %c0_i32, %c0_i32_0 : i32, i32, i32, i32
  }
  func.func @transform_3(%arg0: i32, %arg1: i32) -> (i32, i32, i32) {
    %c0_i32 = arith.constant 0 : i32
    %c0_i32_0 = arith.constant 0 : i32
    %c0_i32_1 = arith.constant 0 : i32
    return %arg0, %c0_i32, %c0_i32_0 : i32, i32, i32
  }
  func.func @transform_4(%arg0: i32, %arg1: i32) -> (i32, i32, i32) {
    %c0_i32 = arith.constant 0 : i32
    %c0_i32_0 = arith.constant 0 : i32
    return %arg0, %arg1, %c0_i32 : i32, i32, i32
  }
  func.func @transform_5(%arg0: i32, %arg1: i32) -> (i32, i32, i32, i32) {
    %c0_i32 = arith.constant 0 : i32
    %c0_i32_0 = arith.constant 0 : i32
    %c0_i32_1 = arith.constant 0 : i32
    return %arg0, %arg1, %c0_i32, %c0_i32_0 : i32, i32, i32, i32
  }
  func.func @transform_6(%arg0: i32, %arg1: i32) -> (i32, i32, i32, i32) {
    %c0_i32 = arith.constant 0 : i32
    %c0_i32_0 = arith.constant 0 : i32
    %c0_i32_1 = arith.constant 0 : i32
    return %arg0, %arg1, %c0_i32, %c0_i32_0 : i32, i32, i32, i32
  }
  func.func @transform_7(%arg0: i32, %arg1: i32) -> (i32, i32) {
    %c0_i32 = arith.constant 0 : i32
    %c0_i32_0 = arith.constant 0 : i32
    %c0_i32_1 = arith.constant 0 : i32
    return %c0_i32, %c0_i32_0 : i32, i32
  }
  func.func @transform_8(%arg0: i32, %arg1: i32) -> (i32, i32) {
    %c0_i32 = arith.constant 0 : i32
    %c0_i32_0 = arith.constant 0 : i32
    %c0_i32_1 = arith.constant 0 : i32
    return %c0_i32, %c0_i32_0 : i32, i32
  }
  func.func @transform_9(%arg0: i32, %arg1: i32) -> (i32, i32) {
    %c0_i32 = arith.constant 0 : i32
    %c0_i32_0 = arith.constant 0 : i32
    %c0_i32_1 = arith.constant 0 : i32
    return %c0_i32, %c0_i32_0 : i32, i32
  }
  func.func @transform_10(%arg0: i32, %arg1: i32) -> (i32, i32) {
    %c0_i32 = arith.constant 0 : i32
    %c0_i32_0 = arith.constant 0 : i32
    %c0_i32_1 = arith.constant 0 : i32
    return %c0_i32, %c0_i32_0 : i32, i32
  }
  func.func @transform_11(%arg0: i32, %arg1: i32) -> (i32, i32) {
    %c0_i32 = arith.constant 0 : i32
    %c0_i32_0 = arith.constant 0 : i32
    %c0_i32_1 = arith.constant 0 : i32
    return %c0_i32, %c0_i32_0 : i32, i32
  }
  func.func @transform_12(%arg0: i32, %arg1: i32) -> (i32, i32) {
    %c0_i32 = arith.constant 0 : i32
    %c0_i32_0 = arith.constant 0 : i32
    %c0_i32_1 = arith.constant 0 : i32
    return %c0_i32, %c0_i32_0 : i32, i32
  }
  func.func @transform_13(%arg0: i32, %arg1: i32) -> (i32, i32) {
    %c0_i32 = arith.constant 0 : i32
    %c0_i32_0 = arith.constant 0 : i32
    %c0_i32_1 = arith.constant 0 : i32
    return %c0_i32, %c0_i32_0 : i32, i32
  }
  func.func @transform_14(%arg0: i32, %arg1: i32) -> (i32, i32) {
    %c0_i32 = arith.constant 0 : i32
    %c0_i32_0 = arith.constant 0 : i32
    %c0_i32_1 = arith.constant 0 : i32
    return %c0_i32, %c0_i32_0 : i32, i32
  }
  func.func @transform_15(%arg0: i32, %arg1: i32) -> (i32, i32) {
    %c0_i32 = arith.constant 0 : i32
    %c0_i32_0 = arith.constant 0 : i32
    %c0_i32_1 = arith.constant 0 : i32
    return %c0_i32, %c0_i32_0 : i32, i32
  }
  func.func @transform_16(%arg0: i32, %arg1: i32) -> (i32, i32) {
    %c0_i32 = arith.constant 0 : i32
    %c0_i32_0 = arith.constant 0 : i32
    %c0_i32_1 = arith.constant 0 : i32
    return %c0_i32, %c0_i32_0 : i32, i32
  }
  func.func @transform_17(%arg0: i32, %arg1: i32) -> (i32, i32) {
    %c0_i32 = arith.constant 0 : i32
    %c0_i32_0 = arith.constant 0 : i32
    %c0_i32_1 = arith.constant 0 : i32
    return %c0_i32, %c0_i32_0 : i32, i32
  }
  func.func @transform_18(%arg0: i32, %arg1: i32) -> (i32, i32) {
    %c0_i32 = arith.constant 0 : i32
    %c0_i32_0 = arith.constant 0 : i32
    %c0_i32_1 = arith.constant 0 : i32
    return %c0_i32, %c0_i32_0 : i32, i32
  }
  func.func @transform_19(%arg0: i32, %arg1: i32) -> (i32, i32) {
    %c0_i32 = arith.constant 0 : i32
    %c0_i32_0 = arith.constant 0 : i32
    %c0_i32_1 = arith.constant 0 : i32
    return %c0_i32, %c0_i32_0 : i32, i32
  }
  func.func @transform_20(%arg0: i32, %arg1: i32) -> (i32, i32, i32) {
    %c0_i32 = arith.constant 0 : i32
    %c0_i32_0 = arith.constant 0 : i32
    return %arg0, %arg1, %c0_i32 : i32, i32, i32
  }
}

module attributes {stable_mosaic.version = 11 : i64} {
  func.func @out_head_kernel(%arg0: i32, %arg1: memref<32x32xf32, #tpu.memory_space<vmem>>, %arg2: memref<32x20xbf16, #tpu.memory_space<vmem>>, %arg3: memref<1x20xf32, #tpu.memory_space<vmem>>, %arg4: memref<32x20xf32, #tpu.memory_space<vmem>>) attributes {dimension_semantics = [#tpu.dimension_semantics<parallel>], iteration_bounds = array<i64: 1>, scalar_prefetch = 0 : i64, scratch_operands = 0 : i64, tpu.core_type = #tpu.core_type<tc>, window_params = [{transform_indices = @transform_0, window_bounds = array<i64: 32, 32>}, {pipeline_mode = #tpu.pipeline_mode<synchronous>, transform_indices = @transform_1, window_bounds = array<i64: 32, 20>}, {pipeline_mode = #tpu.pipeline_mode<synchronous>, transform_indices = @transform_2, window_bounds = array<i64: 1, 20>}, {transform_indices = @transform_3, window_bounds = array<i64: 32, 20>}]} {
    %c0 = arith.constant 0 : index
    %c0_0 = arith.constant 0 : index
    %0 = vector.load %arg1[%c0, %c0_0] : memref<32x32xf32, #tpu.memory_space<vmem>>, vector<32x32xf32>
    %1 = arith.truncf %0 : vector<32x32xf32> to vector<32x32xbf16>
    %c0_1 = arith.constant 0 : index
    %c0_2 = arith.constant 0 : index
    %2 = vector.load %arg2[%c0_1, %c0_2] : memref<32x20xbf16, #tpu.memory_space<vmem>>, vector<32x20xbf16>
    %cst = arith.constant dense<0.000000e+00> : vector<32x20xf32>
    %3 = tpu.matmul %1, %2, %cst {dimension_numbers = #tpu.dot_dimension_numbers<[1], [0], [0], [1], [0, 0, 1, 1], [], []>} : vector<32x32xbf16>, vector<32x20xbf16>, vector<32x20xf32> -> vector<32x20xf32>
    %c0_3 = arith.constant 0 : index
    %c0_4 = arith.constant 0 : index
    %4 = vector.load %arg3[%c0_3, %c0_4] : memref<1x20xf32, #tpu.memory_space<vmem>>, vector<1x20xf32>
    %5 = vector.broadcast %4 : vector<1x20xf32> to vector<32x20xf32>
    %6 = arith.addf %3, %5 : vector<32x20xf32>
    %cst_5 = arith.constant 0.000000e+00 : f32
    %7 = vector.broadcast %cst_5 : f32 to vector<32x20xf32>
    %8 = arith.subf %7, %6 : vector<32x20xf32>
    %9 = math.exp %8 : vector<32x20xf32>
    %cst_6 = arith.constant 1.000000e+00 : f32
    %10 = vector.broadcast %cst_6 : f32 to vector<32x20xf32>
    %11 = arith.addf %10, %9 : vector<32x20xf32>
    %cst_7 = arith.constant 1.000000e+00 : f32
    %12 = vector.broadcast %cst_7 : f32 to vector<32x20xf32>
    %13 = arith.divf %12, %11 : vector<32x20xf32>
    %14 = arith.mulf %13, %13 : vector<32x20xf32>
    %cst_8 = arith.constant dense<0.000000e+00> : vector<32xf32>
    %15 = vector.multi_reduction <add>, %14, %cst_8 [1] : vector<32x20xf32> to vector<32xf32>
    %16 = vector.shape_cast %15 : vector<32xf32> to vector<32x1xf32>
    %17 = math.sqrt %16 : vector<32x1xf32>
    %18 = vector.broadcast %17 : vector<32x1xf32> to vector<32x20xf32>
    %19 = arith.divf %13, %18 : vector<32x20xf32>
    %c0_9 = arith.constant 0 : index
    %c0_10 = arith.constant 0 : index
    %20 = vector.load %arg4[%c0_9, %c0_10] : memref<32x20xf32, #tpu.memory_space<vmem>>, vector<32x20xf32>
    tpu.vector_store %arg4[%c0_9, %c0_10], %19 {strides = array<i32>} : memref<32x20xf32, #tpu.memory_space<vmem>>, vector<32x20xf32>,
    return
  }
  func.func @transform_0(%arg0: i32) -> (i32, i32) {
    %c0_i32 = arith.constant 0 : i32
    %c0_i32_0 = arith.constant 0 : i32
    return %arg0, %c0_i32 : i32, i32
  }
  func.func @transform_1(%arg0: i32) -> (i32, i32) {
    %c0_i32 = arith.constant 0 : i32
    %c0_i32_0 = arith.constant 0 : i32
    %c0_i32_1 = arith.constant 0 : i32
    return %c0_i32, %c0_i32_0 : i32, i32
  }
  func.func @transform_2(%arg0: i32) -> (i32, i32) {
    %c0_i32 = arith.constant 0 : i32
    %c0_i32_0 = arith.constant 0 : i32
    %c0_i32_1 = arith.constant 0 : i32
    return %c0_i32, %c0_i32_0 : i32, i32
  }
  func.func @transform_3(%arg0: i32) -> (i32, i32) {
    %c0_i32 = arith.constant 0 : i32
    %c0_i32_0 = arith.constant 0 : i32
    return %arg0, %c0_i32 : i32, i32
  }
}

</mosaic_0001>

<bundles_post_ra>
// kernel: _lambda_.10
= control target key start
LH: loop header
LB: loop body
LE: loop exit
PB: predicated region body
PF: predicated region fallthrough
CT: control target
= control target key end

     0   :  { %vm48_vm0 = vcmask 1042432   ;;  %vm41_vm1 = vcmask 48128   ;;  %vm103_vm2 = vcmask 261120   ;;  %s466_s1 = inlined_call_operand.vmem [shape: bf16[6,32], index: 1, kind: input, shape index: {}]   ;;  %s467_s0 = inlined_call_operand.vmem [shape: f32[32,6], index: 0, kind: input, shape index: {}]   ;;  %s468_s2 = inlined_call_operand.vmem [shape: f32[1,32], index: 2, kind: input, shape index: {}]   ;;  %s469_s5 = inlined_call_operand.vmem [shape: bf16[32,32], index: 5, kind: input, shape index: {}]   ;;  %s470_s3 = inlined_call_operand.vmem [shape: f32[1,32], index: 3, kind: input, shape index: {}]   ;;  %s471_s4 = inlined_call_operand.vmem [shape: f32[1,32], index: 4, kind: input, shape index: {}]   ;;  %s472_s6 = inlined_call_operand.vmem [shape: f32[1,32], index: 6, kind: input, shape index: {}]   ;;  %s473_s7 = inlined_call_operand.vmem [shape: f32[32,32], index: 7, kind: output, shape index: {}]  }
   0x1   :  { %v33_v0 = vld [vmem:[%s466_s1] sm:$0x7]  ;;  %v28_v2 = vld [vmem:[%s467_s0 + $0x8] sm:$0xff]  ;;  %v29_v5 = vld [vmem:[%s467_s0 + $0x10] sm:$0xff] }
   0x2   :  { %v27_v1 = vld [vmem:[%s467_s0] sm:$0xff]  ;;  %328 = vmatprep.subr.msk.bf16.mxu0 %vm48_vm0, %v33_v0  ;;  %v50_v3 = vsel %vm48_vm0, %v33_v0, 0  ;;  %v30_v6 = vld [vmem:[%s467_s0 + $0x18] sm:$0xff]  ;;  %v330_v42 = vld [vmem:[%s469_s5 + $0x8] sm:$0xff]  }
   0x3   :  { %v31_v4 = vpack.c.bf16 %v28_v2, %v27_v1  ;;  %315 = vmatpush3.bf16.msra.mxu0 %v50_v3  ;;  %v32_v7 = vpack.c.bf16 %v30_v6, %v29_v5  ;;  %v297_v8 = vld [vmem:[%s468_s2] ss:$0 sm:$0xff] }
   0x4   :  { %v329_v41 = vld [vmem:[%s469_s5] sm:$0xff]  }
   0x5   :  { %316 = vmatprep.mubr.msk.bf16.mxu0 %vm41_vm1, %v31_v4  ;;  %320 = vmatprep.subr.bf16.mxu1 %v329_v41 }
   0x6   :  { %317 = vmatmul.mubr.msk.bf16.vlgmr.msra.gmra.mrb[0].mxu0 %vm41_vm1, %v32_v7  ;;  %321 = vmatpush3.bf16.msra.mxu1 %v329_v41 }
   0x7   :  { %322 = vmatprep.subr.bf16.mxu1 %v330_v42 }
   0xa   :  { %323 = vmatpush3.bf16.msra.mxu1 %v330_v42 }
  0xd9   :  { %v318_v9 = vpop.f32.mrb[0].mxu0 }
  0xda   :  { %v95_v10 = vadd.f32 %v318_v9, %v297_v8  ;;  %v86_v11 = vpop.f32.mrb[1].mxu0 }
  0xdb   :  { %v87_v12 = vadd.f32 %v297_v8, %v86_v11  ;;  %v319_v13 = vpop.f32.mrb[2].mxu0 }
  0xdc   :  { %v98_v14 = vadd.f32 %v319_v13, %v297_v8  ;;  %v89_v15 = vpop.f32.mrb[3].mxu0  ;;  %v110_v16 = vsel %vm103_vm2, %v95_v10, 0.0 }
  0xdd   :  { %v90_v17 = vadd.f32 %v297_v8, %v89_v15  ;;  %111 = vadd.xlane.f32.xlu1 %v110_v16  ;;  %v104_v18 = vsel %vm103_vm2, %v87_v12, 0.0  ;;  %v300_v15 = vld [vmem:[%s470_s3] ss:$0 sm:$0xff] }
  0xde   :  { %105 = vadd.xlane.f32.xlu0 %v104_v18  ;;  %v113_v19 = vsel %vm103_vm2, %v98_v14, 0.0 }
  0xdf   :  { %v107_v20 = vsel %vm103_vm2, %v90_v17, 0.0 }
  0xe1   :  { %114 = vadd.xlane.f32.xlu1 %v113_v19 }
  0xe2   :  { %108 = vadd.xlane.f32.xlu0 %v107_v20 }
 0x16a   :  { %v112_v21 = vpop.xlane.xlu1 %111 }
 0x16b   :  { %v119_v22 = vmul.f32 0.03125, %v112_v21  ;;  %v106_v23 = vpop.xlane.xlu0 %105  ;;  %v301_v21 = vld [vmem:[%s471_s4] ss:$0 sm:$0xff] }
 0x16c   :  { %v117_v24 = vmul.f32 0.03125, %v106_v23 }
 0x16d   :  { %v409_v25 = vsub.f32 %v95_v10, %v119_v22 }
 0x16e   :  { %v411_v26 = vsub.f32 %v87_v12, %v117_v24  ;;  %v115_v27 = vpop.xlane.xlu1 %114 }
 0x16f   :  { %v120_v28 = vmul.f32 0.03125, %v115_v27  ;;  %v109_v29 = vpop.xlane.xlu0 %108  ;;  %v127_v35 = vmul.f32 %v409_v25, %v409_v25  ;;  %v185_v23 = vmul.f32 %v300_v15, %v409_v25  ;;  %v302_v25 = vld [vmem:[%s472_s6] ss:$0 sm:$0xff] }
 0x170   :  { %v118_v30 = vmul.f32 0.03125, %v109_v29  ;;  %v125_v31 = vmul.f32 %v411_v26, %v411_v26 }
 0x171   :  { %v415_v32 = vsub.f32 %v98_v14, %v120_v28  ;;  %v135_v37 = vsel %vm103_vm2, %v127_v35, 0.0 }
 0x172   :  { %v417_v33 = vsub.f32 %v90_v17, %v118_v30  ;;  %v129_v34 = vsel %vm103_vm2, %v125_v31, 0.0  ;;  %v183_v17 = vmul.f32 %v300_v15, %v411_v26 }
 0x173   :  { %130 = vadd.xlane.f32.xlu0 %v129_v34  ;;  %v128_v39 = vmul.f32 %v415_v32, %v415_v32  ;;  %v186_v27 = vmul.f32 %v300_v15, %v415_v32 }
 0x174   :  { %v126_v36 = vmul.f32 %v417_v33, %v417_v33  ;;  %v184_v18 = vmul.f32 %v300_v15, %v417_v33 }
 0x175   :  { %v138_v40 = vsel %vm103_vm2, %v128_v39, 0.0 }
 0x176   :  { %v132_v38 = vsel %vm103_vm2, %v126_v36, 0.0 }
 0x177   :  { %136 = vadd.xlane.f32.xlu0 %v135_v37  ;;  %133 = vadd.xlane.f32.xlu1 %v132_v38 }
 0x17b   :  { %139 = vadd.xlane.f32.xlu1 %v138_v40 }
 0x200   :  { %v131_v43 = vpop.xlane.xlu0 %130 }
 0x201   :  { %v141_v44 = vmul.f32 0.032258064, %v131_v43 }
 0x203   :  { %v145_v45 = vadd.f32 1e-06, %v141_v44 }
 0x204   :  { %v134_v46 = vpop.xlane.xlu1 %133  ;;  %v137_v47 = vpop.xlane.xlu0 %136 }
 0x205   :  { %331 = vrsqrt.f32 %v145_v45  ;;  %v142_v48 = vmul.f32 0.032258064, %v134_v46  ;;  %v143_v49 = vmul.f32 0.032258064, %v137_v47  ;;  %vm151_vm3 = vcmp.eq.f32.partialorder %v145_v45, inf }
 0x206   :  { %v154_v57 = vand.u32 2147483648, %v145_v45  ;;  %vm153_vm4 = vcmp.eq.f32.partialorder %v145_v45, 0.0 }
 0x207   :  { %v146_v50 = vadd.f32 1e-06, %v142_v48  ;;  %v147_v51 = vadd.f32 1e-06, %v143_v49 }
 0x208   :  { %v140_v52 = vpop.xlane.xlu1 %139 }
 0x209   :  { %v144_v53 = vmul.f32 0.032258064, %v140_v52  ;;  %333 = vrsqrt.f32 %v146_v50  ;;  %vm158_vm5 = vcmp.eq.f32.partialorder %v146_v50, inf  ;;  %vm160_vm6 = vcmp.eq.f32.partialorder %v146_v50, 0.0 }
 0x20a   :  { %335 = vrsqrt.f32 %v147_v51  ;;  %v161_v0 = vand.u32 2147483648, %v146_v50  ;;  %vm165_vm7 = vcmp.eq.f32.partialorder %v147_v51, inf  ;;  %v168_v3 = vand.u32 2147483648, %v147_v51 }
 0x20b   :  { %v148_v54 = vadd.f32 1e-06, %v144_v53  ;;  %vm167_vm8 = vcmp.eq.f32.partialorder %v147_v51, 0.0 }
 0x20d   :  { %337 = vrsqrt.f32 %v148_v54  ;;  %vm172_vm9 = vcmp.eq.f32.partialorder %v148_v54, inf  ;;  %v175_v11 = vand.u32 2147483648, %v148_v54  ;;  %vm174_vm10 = vcmp.eq.f32.partialorder %v148_v54, 0.0 }
 0x20f   :  { %v332_v55 = vpop.eup %331 }
 0x210   :  { %v150_v56 = vmul.f32 %v332_v55, %v145_v45 }
 0x212   :  { %v152_v58 = vsel %vm151_vm3, %v145_v45, %v150_v56 }
 0x213   :  { %v155_v59 = vsel %vm153_vm4, %v154_v57, %v152_v58  ;;  %v334_v60 = vpop.eup %333 }
 0x214   :  { %v187_v61 = vadd.f32 1e-06, %v155_v59  ;;  %v336_v62 = vpop.eup %335  ;;  %v157_v63 = vmul.f32 %v334_v60, %v146_v50 }
 0x215   :  { %v164_v1 = vmul.f32 %v336_v62, %v147_v51 }
 0x216   :  { %v159_v2 = vsel %vm158_vm5, %v146_v50, %v157_v63  ;;  %339 = vrcp.f32 %v187_v61 }
 0x217   :  { %v338_v4 = vpop.eup %337  ;;  %v166_v5 = vsel %vm165_vm7, %v147_v51, %v164_v1  ;;  %v162_v6 = vsel %vm160_vm6, %v161_v0, %v159_v2 }
 0x218   :  { %v169_v7 = vsel %vm167_vm8, %v168_v3, %v166_v5  ;;  %v171_v8 = vmul.f32 %v338_v4, %v148_v54  ;;  %v188_v9 = vadd.f32 1e-06, %v162_v6 }
 0x219   :  { %v189_v10 = vadd.f32 1e-06, %v169_v7 }
 0x21a   :  { %v173_v12 = vsel %vm172_vm9, %v148_v54, %v171_v8  ;;  %341 = vrcp.f32 %v188_v9 }
 0x21b   :  { %343 = vrcp.f32 %v189_v10  ;;  %v176_v13 = vsel %vm174_vm10, %v175_v11, %v173_v12 }
 0x21c   :  { %v190_v14 = vadd.f32 1e-06, %v176_v13 }
 0x21e   :  { %345 = vrcp.f32 %v190_v14 }
 0x220   :  { %v340_v16 = vpop.eup %339 }
 0x221   :  { %v192_v19 = vmul.f32 %v340_v16, %v183_v17 }
 0x223   :  { %v205_v28 = vadd.f32 %v301_v21, %v192_v19 }
 0x224   :  { %v342_v20 = vpop.eup %341 }
 0x225   :  { %v344_v22 = vpop.eup %343  ;;  %v194_v24 = vmul.f32 %v342_v20, %v184_v18 }
 0x226   :  { %v196_v30 = vmul.f32 %v344_v22, %v185_v23 }
 0x227   :  { %v206_v29 = vadd.f32 %v301_v21, %v194_v24 }
 0x228   :  { %v346_v31 = vpop.eup %345  ;;  %v207_v33 = vadd.f32 %v301_v21, %v196_v30 }
 0x229   :  { %v209_v34 = vpack.c.bf16 %v206_v29, %v205_v28  ;;  %v198_v26 = vmul.f32 %v346_v31, %v186_v27 }
 0x22b   :  { %324 = vmatprep.mubr.msk.bf16.mxu1 %vm103_vm2, %v209_v34  ;;  %v208_v35 = vadd.f32 %v301_v21, %v198_v26 }
 0x22d   :  { %v210_v36 = vpack.c.bf16 %v208_v35, %v207_v33 }
 0x22f   :  { %325 = vmatmul.mubr.msk.bf16.vlgmr.msra.gmra.mrb[0].mxu1 %vm103_vm2, %v210_v36 }
 0x302   :  { %v326_v37 = vpop.f32.mrb[0].mxu1 }
 0x303   :  { %v283_v38 = vadd.f32 %v326_v37, %v302_v25  ;;  %v274_v32 = vpop.f32.mrb[1].mxu1 }
 0x304   :  { %v275_v39 = vadd.f32 %v302_v25, %v274_v32  ;;  %v327_v40 = vpop.f32.mrb[2].mxu1 }
 0x305   :  { %291 = vst.msk [vmem:[%s473_s7 + $0x10] sm:$0xff] %vm103_vm2, %v283_v38  ;;  %v286_v41 = vadd.f32 %v327_v40, %v302_v25  ;;  %v277_v42 = vpop.f32.mrb[3].mxu1 }
 0x306   :  { %289 = vst.msk [vmem:[%s473_s7] sm:$0xff] %vm103_vm2, %v275_v39  ;;  %v278_v43 = vadd.f32 %v302_v25, %v277_v42 }
 0x307   :  { %292 = vst.msk [vmem:[%s473_s7 + $0x18] sm:$0xff] %vm103_vm2, %v286_v41 }
 0x308   :  { %290 = vst.msk [vmem:[%s473_s7 + $0x8] sm:$0xff] %vm103_vm2, %v278_v43 }

// kernel: _lambda_.11
= control target key start
LH: loop header
LB: loop body
LE: loop exit
PB: predicated region body
PF: predicated region fallthrough
CT: control target
= control target key end

     0   :  { %vm151_vm0 = vcmask 1042432   ;;  %vm152_vm1 = vcmask 1043456   ;;  %v1642_v1 = vmov 65535   ;;  %vm102_vm2 = vcmask 318464   ;;  %s2985_s1 = inlined_call_operand.vmem [shape: bf16[39,32], index: 1, kind: input, shape index: {}]   ;;  %s2986_s0 = inlined_call_operand.vmem [shape: f32[256,39], index: 0, kind: input, shape index: {}]   ;;  %s2987_s2 = inlined_call_operand.vmem [shape: f32[1,32], index: 2, kind: input, shape index: {}]   ;;  %s2988_s3 = inlined_call_operand.vmem [shape: f32[1,32], index: 3, kind: input, shape index: {}]   ;;  %s2989_s5 = inlined_call_operand.vmem [shape: bf16[32,32], index: 5, kind: input, shape index: {}]   ;;  %s2990_s4 = inlined_call_operand.vmem [shape: f32[1,32], index: 4, kind: input, shape index: {}]   ;;  %s2991_s6 = inlined_call_operand.vmem [shape: f32[1,32], index: 6, kind: input, shape index: {}]   ;;  %s2992_s7 = inlined_call_operand.vmem [shape: f32[256,32], index: 7, kind: output, shape index: {}]  }
   0x1   :  { %v1508_v0 = vld [vmem:[%s2985_s1] sm:$0xff]   ;;  %v153_v2 = vsel %vm151_vm0, 4294967295, %v1642_v1  ;;  %v1509_v3 = vld [vmem:[%s2985_s1 + $0x8] sm:$0xff]   ;;  %v1510_v5 = vld [vmem:[%s2985_s1 + $0x10] ss:$0 sps:$4 sm:$0xff]   ;;  %vm321_vm3 = vcmask 261120  }
   0x2   :  { %v154_v4 = vsel %vm152_vm1, %v153_v2, 0  ;;  %1433 = vmatprep.subr.bf16.mxu0 %v1508_v0  ;;  %v27_v6 = vld [vmem:[%s2986_s0] sm:$0xff]  ;;  %v28_v7 = vld [vmem:[%s2986_s0 + $0x8] sm:$0xff]  ;;  %v29_v10 = vld [vmem:[%s2986_s0 + $0x10] sm:$0xff] }
   0x3   :  { %1434 = vmatpush3.bf16.msra.mxu0 %v1508_v0  ;;  %v156_v8 = vand.u32 %v1510_v5, %v154_v4  ;;  %v59_v9 = vpack.c.bf16 %v28_v7, %v27_v6  ;;  %v30_v11 = vld [vmem:[%s2986_s0 + $0x18] sm:$0xff]  ;;  %v31_v12 = vld [vmem:[%s2986_s0 + $0x20] sm:$0xff]  ;;  %v32_v13 = vld [vmem:[%s2986_s0 + $0x28] sm:$0xff] }
   0x4   :  { %1435 = vmatprep.subr.bf16.mxu0 %v1509_v3  ;;  %v60_v14 = vpack.c.bf16 %v30_v11, %v29_v10  ;;  %v61_v15 = vpack.c.bf16 %v32_v13, %v31_v12  ;;  %v33_v16 = vld [vmem:[%s2986_s0 + $0x30] sm:$0xff]  ;;  %v34_v17 = vld [vmem:[%s2986_s0 + $0x38] sm:$0xff]  ;;  %v35_v18 = vld [vmem:[%s2986_s0 + $0x40] sm:$0xff] }
   0x5   :  { %1439 = vmatprep.mubr.msk.bf16.mxu0 %vm102_vm2, %v59_v9  ;;  %v36_v19 = vld [vmem:[%s2986_s0 + $0x48] sm:$0xff]  ;;  %v62_v20 = vpack.c.bf16 %v34_v17, %v33_v16  ;;  %v37_v22 = vld [vmem:[%s2986_s0 + $0x50] sm:$0xff]  ;;  %v38_v23 = vld [vmem:[%s2986_s0 + $0x58] sm:$0xff] }
   0x6   :  { %v63_v21 = vpack.c.bf16 %v36_v19, %v35_v18  ;;  %v39_v24 = vld [vmem:[%s2986_s0 + $0x60] sm:$0xff]  ;;  %v40_v25 = vld [vmem:[%s2986_s0 + $0x68] sm:$0xff]  ;;  %v64_v26 = vpack.c.bf16 %v38_v23, %v37_v22  ;;  %v41_v28 = vld [vmem:[%s2986_s0 + $0x70] sm:$0xff] }
   0x7   :  { %1436 = vmatpush3.bf16.msra.mxu0 %v1509_v3  ;;  %v65_v27 = vpack.c.bf16 %v40_v25, %v39_v24  ;;  %v42_v29 = vld [vmem:[%s2986_s0 + $0x78] sm:$0xff]  ;;  %v43_v30 = vld [vmem:[%s2986_s0 + $0x80] sm:$0xff]  ;;  %v44_v31 = vld [vmem:[%s2986_s0 + $0x88] sm:$0xff] }
   0x8   :  { %1437 = vmatprep.subr.bf16.mxu0 %v156_v8  ;;  %v66_v32 = vpack.c.bf16 %v42_v29, %v41_v28  ;;  %v67_v33 = vpack.c.bf16 %v44_v31, %v43_v30  ;;  %v45_v34 = vld [vmem:[%s2986_s0 + $0x90] sm:$0xff]  ;;  %v46_v35 = vld [vmem:[%s2986_s0 + $0x98] sm:$0xff]  ;;  %v47_v36 = vld [vmem:[%s2986_s0 + $0xa0] sm:$0xff] }
   0x9   :  { %v48_v37 = vld [vmem:[%s2986_s0 + $0xa8] sm:$0xff]  ;;  %v68_v38 = vpack.c.bf16 %v46_v35, %v45_v34  ;;  %v49_v40 = vld [vmem:[%s2986_s0 + $0xb0] sm:$0xff]  ;;  %v50_v41 = vld [vmem:[%s2986_s0 + $0xb8] sm:$0xff] }
   0xa   :  { %v69_v39 = vpack.c.bf16 %v48_v37, %v47_v36  ;;  %v51_v42 = vld [vmem:[%s2986_s0 + $0xc0] sm:$0xff]  ;;  %v52_v43 = vld [vmem:[%s2986_s0 + $0xc8] sm:$0xff]  ;;  %v70_v44 = vpack.c.bf16 %v50_v41, %v49_v40  ;;  %v53_v46 = vld [vmem:[%s2986_s0 + $0xd0] sm:$0xff] }
   0xb   :  { %1438 = vmatpush3.bf16.msra.mxu0 %v156_v8  ;;  %v71_v45 = vpack.c.bf16 %v52_v43, %v51_v42  ;;  %v54_v47 = vld [vmem:[%s2986_s0 + $0xd8] sm:$0xff]  ;;  %v55_v48 = vld [vmem:[%s2986_s0 + $0xe0] sm:$0xff]  ;;  %v56_v49 = vld [vmem:[%s2986_s0 + $0xe8] sm:$0xff] }
   0xc   :  { %v72_v50 = vpack.c.bf16 %v54_v47, %v53_v46  ;;  %v73_v51 = vpack.c.bf16 %v56_v49, %v55_v48  ;;  %v57_v52 = vld [vmem:[%s2986_s0 + $0xf0] sm:$0xff]  ;;  %v58_v53 = vld [vmem:[%s2986_s0 + $0xf8] sm:$0xff]  ;;  %v1807_v55 = vld [vmem:[%s2987_s2] ss:$0 sm:$0xff] }
   0xd   :  { %v74_v54 = vpack.c.bf16 %v58_v53, %v57_v52 }
   0xe   :  { %1440 = vmatmul.mubr.msk.bf16.vlgmr.msra.gmra.mrb[0].mxu0 %vm102_vm2, %v60_v14 }
   0xf   :  { %1443 = vmatprep.mubr.msk.bf16.mxu0 %vm102_vm2, %v61_v15 }
  0x16   :  { %1444 = vmatmul.mubr.msk.bf16.gmra.mrb[4].mxu0 %vm102_vm2, %v62_v20 }
  0x17   :  { %1447 = vmatprep.mubr.msk.bf16.mxu0 %vm102_vm2, %v63_v21 }
  0x1e   :  { %1448 = vmatmul.mubr.msk.bf16.gmra.mrb[8].mxu0 %vm102_vm2, %v64_v26 }
  0x1f   :  { %1451 = vmatprep.mubr.msk.bf16.mxu0 %vm102_vm2, %v65_v27 }
  0x26   :  { %1452 = vmatmul.mubr.msk.bf16.gmra.mrb[12].mxu0 %vm102_vm2, %v66_v32 }
  0x27   :  { %1455 = vmatprep.mubr.msk.bf16.mxu0 %vm102_vm2, %v67_v33 }
  0x2e   :  { %1456 = vmatmul.mubr.msk.bf16.gmra.mrb[16].mxu0 %vm102_vm2, %v68_v38 }
  0x2f   :  { %1459 = vmatprep.mubr.msk.bf16.mxu0 %vm102_vm2, %v69_v39 }
  0x36   :  { %1460 = vmatmul.mubr.msk.bf16.gmra.mrb[20].mxu0 %vm102_vm2, %v70_v44 }
  0x37   :  { %1463 = vmatprep.mubr.msk.bf16.mxu0 %vm102_vm2, %v71_v45 }
  0x3e   :  { %1464 = vmatmul.mubr.msk.bf16.gmra.mrb[24].mxu0 %vm102_vm2, %v72_v50 }
  0x3f   :  { %1467 = vmatprep.mubr.msk.bf16.mxu0 %vm102_vm2, %v73_v51 }
  0x46   :  { %1468 = vmatmul.mubr.msk.bf16.gmra.mrb[28].mxu0 %vm102_vm2, %v74_v54 }
  0xe1   :  { %v1441_v56 = vpop.f32.mrb[0].mxu0 }
  0xe2   :  { %v1810_v57 = vadd.f32 %v1441_v56, %v1807_v55  ;;  %v192_v58 = vpop.f32.mrb[1].mxu0 }
  0xe3   :  { %v1813_v59 = vadd.f32 %v1807_v55, %v192_v58  ;;  %v1442_v60 = vpop.f32.mrb[2].mxu0 }
  0xe4   :  { %v1816_v61 = vadd.f32 %v1442_v60, %v1807_v55  ;;  %v195_v62 = vpop.f32.mrb[3].mxu0  ;;  %v328_v63 = vsel %vm321_vm3, %v1810_v57, 0.0 }
  0xe5   :  { %v1821_v0 = vadd.f32 %v1807_v55, %v195_v62  ;;  %329 = vadd.xlane.f32.xlu1 %v328_v63  ;;  %v322_v1 = vsel %vm321_vm3, %v1813_v59, 0.0 }
  0xe6   :  { %323 = vadd.xlane.f32.xlu0 %v322_v1  ;;  %v331_v2 = vsel %vm321_vm3, %v1816_v61, 0.0 }
  0xe7   :  { %v325_v4 = vsel %vm321_vm3, %v1821_v0, 0.0 }
  0xe9   :  { %332 = vadd.xlane.f32.xlu1 %v331_v2  ;;  %v1445_v3 = vpop.f32.mrb[4].mxu0 }
  0xea   :  { %v208_v5 = vpop.f32.mrb[5].mxu0  ;;  %326 = vadd.xlane.f32.xlu0 %v325_v4  ;;  %v1833_v9 = vadd.f32 %v1445_v3, %v1807_v55 }
  0xeb   :  { %v1830_v6 = vadd.f32 %v1807_v55, %v208_v5  ;;  %v1446_v7 = vpop.f32.mrb[6].mxu0 }
  0xec   :  { %v211_v8 = vpop.f32.mrb[7].mxu0  ;;  %v1841_v12 = vadd.f32 %v1446_v7, %v1807_v55  ;;  %v340_v15 = vsel %vm321_vm3, %v1833_v9, 0.0 }
  0xed   :  { %v1836_v10 = vadd.f32 %v1807_v55, %v211_v8  ;;  %v334_v11 = vsel %vm321_vm3, %v1830_v6, 0.0 }
  0xee   :  { %335 = vadd.xlane.f32.xlu0 %v334_v11  ;;  %v343_v19 = vsel %vm321_vm3, %v1841_v12, 0.0 }
  0xef   :  { %v337_v13 = vsel %vm321_vm3, %v1836_v10, 0.0 }
  0xf0   :  { %338 = vadd.xlane.f32.xlu1 %v337_v13 }
  0xf1   :  { %v1449_v14 = vpop.f32.mrb[8].mxu0 }
  0xf2   :  { %v224_v16 = vpop.f32.mrb[9].mxu0  ;;  %341 = vadd.xlane.f32.xlu0 %v340_v15  ;;  %v1853_v21 = vadd.f32 %v1449_v14, %v1807_v55 }
  0xf3   :  { %v1848_v17 = vadd.f32 %v1807_v55, %v224_v16  ;;  %v1450_v18 = vpop.f32.mrb[10].mxu0 }
  0xf4   :  { %v227_v20 = vpop.f32.mrb[11].mxu0  ;;  %344 = vadd.xlane.f32.xlu1 %v343_v19  ;;  %v1861_v24 = vadd.f32 %v1450_v18, %v1807_v55  ;;  %v352_v27 = vsel %vm321_vm3, %v1853_v21, 0.0 }
  0xf5   :  { %v1856_v22 = vadd.f32 %v1807_v55, %v227_v20  ;;  %v346_v23 = vsel %vm321_vm3, %v1848_v17, 0.0 }
  0xf6   :  { %347 = vadd.xlane.f32.xlu0 %v346_v23  ;;  %v355_v31 = vsel %vm321_vm3, %v1861_v24, 0.0 }
  0xf7   :  { %v349_v25 = vsel %vm321_vm3, %v1856_v22, 0.0 }
  0xf8   :  { %350 = vadd.xlane.f32.xlu1 %v349_v25 }
  0xf9   :  { %v1453_v26 = vpop.f32.mrb[12].mxu0 }
  0xfa   :  { %v240_v28 = vpop.f32.mrb[13].mxu0  ;;  %353 = vadd.xlane.f32.xlu0 %v352_v27  ;;  %v1873_v33 = vadd.f32 %v1453_v26, %v1807_v55 }
  0xfb   :  { %v1868_v29 = vadd.f32 %v1807_v55, %v240_v28  ;;  %v1454_v30 = vpop.f32.mrb[14].mxu0 }
  0xfc   :  { %v243_v32 = vpop.f32.mrb[15].mxu0  ;;  %356 = vadd.xlane.f32.xlu1 %v355_v31  ;;  %v1881_v36 = vadd.f32 %v1454_v30, %v1807_v55  ;;  %v364_v39 = vsel %vm321_vm3, %v1873_v33, 0.0 }
  0xfd   :  { %v1876_v34 = vadd.f32 %v1807_v55, %v243_v32  ;;  %v358_v35 = vsel %vm321_vm3, %v1868_v29, 0.0 }
  0xfe   :  { %359 = vadd.xlane.f32.xlu0 %v358_v35  ;;  %v367_v43 = vsel %vm321_vm3, %v1881_v36, 0.0 }
  0xff   :  { %v361_v37 = vsel %vm321_vm3, %v1876_v34, 0.0 }
 0x100   :  { %362 = vadd.xlane.f32.xlu1 %v361_v37 }
 0x101   :  { %v1457_v38 = vpop.f32.mrb[16].mxu0 }
 0x102   :  { %v256_v40 = vpop.f32.mrb[17].mxu0  ;;  %365 = vadd.xlane.f32.xlu0 %v364_v39  ;;  %v1893_v45 = vadd.f32 %v1457_v38, %v1807_v55 }
 0x103   :  { %v1888_v41 = vadd.f32 %v1807_v55, %v256_v40  ;;  %v1458_v42 = vpop.f32.mrb[18].mxu0 }
 0x104   :  { %v259_v44 = vpop.f32.mrb[19].mxu0  ;;  %368 = vadd.xlane.f32.xlu1 %v367_v43  ;;  %v1901_v48 = vadd.f32 %v1458_v42, %v1807_v55  ;;  %v376_v51 = vsel %vm321_vm3, %v1893_v45, 0.0 }
 0x105   :  { %v1896_v46 = vadd.f32 %v1807_v55, %v259_v44  ;;  %v370_v47 = vsel %vm321_vm3, %v1888_v41, 0.0 }
 0x106   :  { %371 = vadd.xlane.f32.xlu0 %v370_v47  ;;  %v379_v56 = vsel %vm321_vm3, %v1901_v48, 0.0 }
 0x107   :  { %v373_v49 = vsel %vm321_vm3, %v1896_v46, 0.0 }
 0x108   :  { %374 = vadd.xlane.f32.xlu1 %v373_v49 }
 0x109   :  { %v1461_v50 = vpop.f32.mrb[20].mxu0 }
 0x10a   :  { %v272_v52 = vpop.f32.mrb[21].mxu0  ;;  %377 = vadd.xlane.f32.xlu0 %v376_v51  ;;  %v1913_v60 = vadd.f32 %v1461_v50, %v1807_v55 }
 0x10b   :  { %v1908_v53 = vadd.f32 %v1807_v55, %v272_v52  ;;  %v1462_v54 = vpop.f32.mrb[22].mxu0 }
 0x10c   :  { %v275_v58 = vpop.f32.mrb[23].mxu0  ;;  %380 = vadd.xlane.f32.xlu1 %v379_v56  ;;  %v1921_v1 = vadd.f32 %v1462_v54, %v1807_v55  ;;  %v388_v4 = vsel %vm321_vm3, %v1913_v60, 0.0 }
 0x10d   :  { %v1916_v62 = vadd.f32 %v1807_v55, %v275_v58  ;;  %v382_v63 = vsel %vm321_vm3, %v1908_v53, 0.0 }
 0x10e   :  { %383 = vadd.xlane.f32.xlu0 %v382_v63  ;;  %v391_v11 = vsel %vm321_vm3, %v1921_v1, 0.0 }
 0x10f   :  { %v385_v2 = vsel %vm321_vm3, %v1916_v62, 0.0 }
 0x110   :  { %386 = vadd.xlane.f32.xlu1 %v385_v2 }
 0x111   :  { %v1465_v3 = vpop.f32.mrb[24].mxu0 }
 0x112   :  { %v288_v5 = vpop.f32.mrb[25].mxu0  ;;  %389 = vadd.xlane.f32.xlu0 %v388_v4  ;;  %v1933_v14 = vadd.f32 %v1465_v3, %v1807_v55 }
 0x113   :  { %v1928_v7 = vadd.f32 %v1807_v55, %v288_v5  ;;  %v1466_v8 = vpop.f32.mrb[26].mxu0 }
 0x114   :  { %v291_v13 = vpop.f32.mrb[27].mxu0  ;;  %392 = vadd.xlane.f32.xlu1 %v391_v11  ;;  %v1941_v18 = vadd.f32 %v1466_v8, %v1807_v55  ;;  %v400_v23 = vsel %vm321_vm3, %v1933_v14, 0.0 }
 0x115   :  { %v1936_v15 = vadd.f32 %v1807_v55, %v291_v13  ;;  %v394_v16 = vsel %vm321_vm3, %v1928_v7, 0.0 }
 0x116   :  { %395 = vadd.xlane.f32.xlu0 %v394_v16  ;;  %v403_v28 = vsel %vm321_vm3, %v1941_v18, 0.0 }
 0x117   :  { %v397_v19 = vsel %vm321_vm3, %v1936_v15, 0.0 }
 0x118   :  { %398 = vadd.xlane.f32.xlu1 %v397_v19 }
 0x119   :  { %v1469_v20 = vpop.f32.mrb[28].mxu0 }
 0x11a   :  { %v304_v25 = vpop.f32.mrb[29].mxu0  ;;  %401 = vadd.xlane.f32.xlu0 %v400_v23  ;;  %v1953_v31 = vadd.f32 %v1469_v20, %v1807_v55 }
 0x11b   :  { %v1948_v26 = vadd.f32 %v1807_v55, %v304_v25  ;;  %v1470_v27 = vpop.f32.mrb[30].mxu0 }
 0x11c   :  { %v307_v30 = vpop.f32.mrb[31].mxu0  ;;  %404 = vadd.xlane.f32.xlu1 %v403_v28  ;;  %v1961_v37 = vadd.f32 %v1470_v27, %v1807_v55  ;;  %v412_v39 = vsel %vm321_vm3, %v1953_v31, 0.0 }
 0x11d   :  { %v1956_v32 = vadd.f32 %v1807_v55, %v307_v30  ;;  %v406_v35 = vsel %vm321_vm3, %v1948_v26, 0.0 }
 0x11e   :  { %407 = vadd.xlane.f32.xlu0 %v406_v35  ;;  %v415_v40 = vsel %vm321_vm3, %v1961_v37, 0.0 }
 0x11f   :  { %v409_v38 = vsel %vm321_vm3, %v1956_v32, 0.0 }
 0x120   :  { %410 = vadd.xlane.f32.xlu1 %v409_v38 }
 0x122   :  { %413 = vadd.xlane.f32.xlu0 %v412_v39 }
 0x124   :  { %416 = vadd.xlane.f32.xlu1 %v415_v40 }
 0x172   :  { %v330_v42 = vpop.xlane.xlu1 %329 }
 0x173   :  { %v421_v43 = vmul.f32 0.03125, %v330_v42  ;;  %v324_v44 = vpop.xlane.xlu0 %323 }
 0x174   :  { %v419_v47 = vmul.f32 0.03125, %v324_v44 }
 0x175   :  { %v1970_v49 = vsub.f32 %v1810_v57, %v421_v43 }
 0x176   :  { %v1973_v55 = vsub.f32 %v1813_v59, %v419_v47  ;;  %v333_v50 = vpop.xlane.xlu1 %332 }
 0x177   :  { %v422_v51 = vmul.f32 0.03125, %v333_v50  ;;  %v327_v52 = vpop.xlane.xlu0 %326  ;;  %v485_v58 = vmul.f32 %v1970_v49, %v1970_v49 }
 0x178   :  { %v420_v54 = vmul.f32 0.03125, %v327_v52  ;;  %v483_v56 = vmul.f32 %v1973_v55, %v1973_v55 }
 0x179   :  { %v1980_v63 = vsub.f32 %v1816_v61, %v422_v51  ;;  %v521_v8 = vsel %vm321_vm3, %v485_v58, 0.0 }
 0x17a   :  { %v1983_v2 = vsub.f32 %v1821_v0, %v420_v54  ;;  %v515_v57 = vsel %vm321_vm3, %v483_v56, 0.0 }
 0x17b   :  { %516 = vadd.xlane.f32.xlu0 %v515_v57  ;;  %v336_v59 = vpop.xlane.xlu0 %335  ;;  %v486_v0 = vmul.f32 %v1980_v63, %v1980_v63 }
 0x17c   :  { %v423_v3 = vmul.f32 0.03125, %v336_v59  ;;  %v484_v4 = vmul.f32 %v1983_v2, %v1983_v2 }
 0x17d   :  { %v339_v5 = vpop.xlane.xlu1 %338  ;;  %v524_v28 = vsel %vm321_vm3, %v486_v0, 0.0 }
 0x17e   :  { %v1990_v11 = vsub.f32 %v1830_v6, %v423_v3  ;;  %v424_v13 = vmul.f32 0.03125, %v339_v5  ;;  %v518_v61 = vsel %vm321_vm3, %v484_v4, 0.0 }
 0x17f   :  { %522 = vadd.xlane.f32.xlu0 %v521_v8  ;;  %519 = vadd.xlane.f32.xlu1 %v518_v61  ;;  %v342_v16 = vpop.xlane.xlu0 %341 }
 0x180   :  { %v1996_v19 = vsub.f32 %v1836_v10, %v424_v13  ;;  %v425_v20 = vmul.f32 0.03125, %v342_v16  ;;  %v487_v23 = vmul.f32 %v1990_v11, %v1990_v11 }
 0x181   :  { %v345_v25 = vpop.xlane.xlu1 %344 }
 0x182   :  { %v2001_v6 = vsub.f32 %v1833_v9, %v425_v20  ;;  %v426_v27 = vmul.f32 0.03125, %v345_v25  ;;  %v527_v30 = vsel %vm321_vm3, %v487_v23, 0.0  ;;  %v488_v10 = vmul.f32 %v1996_v19, %v1996_v19 }
 0x183   :  { %525 = vadd.xlane.f32.xlu1 %v524_v28  ;;  %528 = vadd.xlane.f32.xlu0 %v527_v30  ;;  %v348_v35 = vpop.xlane.xlu0 %347 }
 0x184   :  { %v2008_v38 = vsub.f32 %v1841_v12, %v426_v27  ;;  %v427_v39 = vmul.f32 0.03125, %v348_v35  ;;  %v489_v40 = vmul.f32 %v2001_v6, %v2001_v6  ;;  %v530_v44 = vsel %vm321_vm3, %v488_v10, 0.0 }
 0x185   :  { %v351_v9 = vpop.xlane.xlu1 %350 }
 0x186   :  { %v2013_v42 = vsub.f32 %v1848_v17, %v427_v39  ;;  %v428_v43 = vmul.f32 0.03125, %v351_v9  ;;  %v533_v47 = vsel %vm321_vm3, %v489_v40, 0.0  ;;  %v490_v12 = vmul.f32 %v2008_v38, %v2008_v38 }
 0x187   :  { %531 = vadd.xlane.f32.xlu1 %v530_v44  ;;  %534 = vadd.xlane.f32.xlu0 %v533_v47  ;;  %v354_v50 = vpop.xlane.xlu0 %353 }
 0x188   :  { %v2020_v51 = vsub.f32 %v1856_v22, %v428_v43  ;;  %v429_v52 = vmul.f32 0.03125, %v354_v50  ;;  %v491_v54 = vmul.f32 %v2013_v42, %v2013_v42  ;;  %v536_v57 = vsel %vm321_vm3, %v490_v12, 0.0 }
 0x189   :  { %v357_v17 = vpop.xlane.xlu1 %356 }
 0x18a   :  { %v2025_v56 = vsub.f32 %v1853_v21, %v429_v52  ;;  %v430_v58 = vmul.f32 0.03125, %v357_v17  ;;  %v539_v59 = vsel %vm321_vm3, %v491_v54, 0.0  ;;  %v492_v22 = vmul.f32 %v2020_v51, %v2020_v51 }
 0x18b   :  { %537 = vadd.xlane.f32.xlu1 %v536_v57  ;;  %540 = vadd.xlane.f32.xlu0 %v539_v59  ;;  %v360_v3 = vpop.xlane.xlu0 %359 }
 0x18c   :  { %v2032_v4 = vsub.f32 %v1861_v24, %v430_v58  ;;  %v431_v5 = vmul.f32 0.03125, %v360_v3  ;;  %v493_v8 = vmul.f32 %v2025_v56, %v2025_v56  ;;  %v542_v0 = vsel %vm321_vm3, %v492_v22, 0.0 }
 0x18d   :  { %v363_v21 = vpop.xlane.xlu1 %362 }
 0x18e   :  { %v2037_v13 = vsub.f32 %v1868_v29, %v431_v5  ;;  %v432_v61 = vmul.f32 0.03125, %v363_v21  ;;  %v545_v16 = vsel %vm321_vm3, %v493_v8, 0.0  ;;  %v494_v24 = vmul.f32 %v2032_v4, %v2032_v4 }
 0x18f   :  { %543 = vadd.xlane.f32.xlu1 %v542_v0  ;;  %546 = vadd.xlane.f32.xlu0 %v545_v16  ;;  %v366_v20 = vpop.xlane.xlu0 %365 }
 0x190   :  { %v2044_v23 = vsub.f32 %v1876_v34, %v432_v61  ;;  %v433_v25 = vmul.f32 0.03125, %v366_v20  ;;  %v495_v27 = vmul.f32 %v2037_v13, %v2037_v13  ;;  %v548_v35 = vsel %vm321_vm3, %v494_v24, 0.0 }
 0x191   :  { %v369_v29 = vpop.xlane.xlu1 %368 }
 0x192   :  { %v2049_v28 = vsub.f32 %v1873_v33, %v433_v25  ;;  %v434_v30 = vmul.f32 0.03125, %v369_v29  ;;  %v551_v10 = vsel %vm321_vm3, %v495_v27, 0.0  ;;  %v496_v34 = vmul.f32 %v2044_v23, %v2044_v23 }
 0x193   :  { %549 = vadd.xlane.f32.xlu1 %v548_v35  ;;  %552 = vadd.xlane.f32.xlu0 %v551_v10  ;;  %v372_v39 = vpop.xlane.xlu0 %371 }
 0x194   :  { %v2056_v40 = vsub.f32 %v1881_v36, %v434_v30  ;;  %v435_v9 = vmul.f32 0.03125, %v372_v39  ;;  %v497_v43 = vmul.f32 %v2049_v28, %v2049_v28  ;;  %v554_v50 = vsel %vm321_vm3, %v496_v34, 0.0 }
 0x195   :  { %v375_v33 = vpop.xlane.xlu1 %374 }
 0x196   :  { %v2061_v44 = vsub.f32 %v1888_v41, %v435_v9  ;;  %v436_v47 = vmul.f32 0.03125, %v375_v33  ;;  %v557_v12 = vsel %vm321_vm3, %v497_v43, 0.0  ;;  %v498_v36 = vmul.f32 %v2056_v40, %v2056_v40 }
 0x197   :  { %555 = vadd.xlane.f32.xlu1 %v554_v50  ;;  %558 = vadd.xlane.f32.xlu0 %v557_v12  ;;  %v378_v52 = vpop.xlane.xlu0 %377 }
 0x198   :  { %v2068_v54 = vsub.f32 %v1896_v46, %v436_v47  ;;  %v437_v17 = vmul.f32 0.03125, %v378_v52  ;;  %v499_v58 = vmul.f32 %v2061_v44, %v2061_v44  ;;  %v560_v3 = vsel %vm321_vm3, %v498_v36, 0.0 }
 0x199   :  { %v381_v41 = vpop.xlane.xlu1 %380 }
 0x19a   :  { %v2073_v57 = vsub.f32 %v1893_v45, %v437_v17  ;;  %v438_v59 = vmul.f32 0.03125, %v381_v41  ;;  %v563_v22 = vsel %vm321_vm3, %v499_v58, 0.0  ;;  %v500_v46 = vmul.f32 %v2068_v54, %v2068_v54 }
 0x19b   :  { %561 = vadd.xlane.f32.xlu1 %v560_v3  ;;  %564 = vadd.xlane.f32.xlu0 %v563_v22  ;;  %v384_v5 = vpop.xlane.xlu0 %383 }
 0x19c   :  { %v2080_v8 = vsub.f32 %v1901_v48, %v438_v59  ;;  %v439_v21 = vmul.f32 0.03125, %v384_v5  ;;  %v501_v61 = vmul.f32 %v2073_v57, %v2073_v57  ;;  %v566_v20 = vsel %vm321_vm3, %v500_v46, 0.0 }
 0x19d   :  { %v387_v45 = vpop.xlane.xlu1 %386 }
 0x19e   :  { %v2085_v0 = vsub.f32 %v1908_v53, %v439_v21  ;;  %v440_v16 = vmul.f32 0.03125, %v387_v45  ;;  %v569_v24 = vsel %vm321_vm3, %v501_v61, 0.0  ;;  %v502_v48 = vmul.f32 %v2080_v8, %v2080_v8 }
 0x19f   :  { %567 = vadd.xlane.f32.xlu1 %v566_v20  ;;  %570 = vadd.xlane.f32.xlu0 %v569_v24  ;;  %v390_v25 = vpop.xlane.xlu0 %389 }
 0x1a0   :  { %v2092_v27 = vsub.f32 %v1916_v62, %v440_v16  ;;  %v441_v29 = vmul.f32 0.03125, %v390_v25  ;;  %v503_v30 = vmul.f32 %v2085_v0, %v2085_v0  ;;  %v572_v39 = vsel %vm321_vm3, %v502_v48, 0.0 }
 0x1a1   :  { %v393_v53 = vpop.xlane.xlu1 %392 }
 0x1a2   :  { %v2097_v35 = vsub.f32 %v1913_v60, %v441_v29  ;;  %v442_v10 = vmul.f32 0.03125, %v393_v53  ;;  %v575_v34 = vsel %vm321_vm3, %v503_v30, 0.0  ;;  %v504_v62 = vmul.f32 %v2092_v27, %v2092_v27 }
 0x1a3   :  { %573 = vadd.xlane.f32.xlu1 %v572_v39  ;;  %576 = vadd.xlane.f32.xlu0 %v575_v34  ;;  %v396_v9 = vpop.xlane.xlu0 %395 }
 0x1a4   :  { %v2104_v43 = vsub.f32 %v1921_v1, %v442_v10  ;;  %v443_v33 = vmul.f32 0.03125, %v396_v9  ;;  %v505_v47 = vmul.f32 %v2097_v35, %v2097_v35  ;;  %v578_v52 = vsel %vm321_vm3, %v504_v62, 0.0 }
 0x1a5   :  { %v399_v60 = vpop.xlane.xlu1 %398 }
 0x1a6   :  { %v2109_v50 = vsub.f32 %v1928_v7, %v443_v33  ;;  %v444_v12 = vmul.f32 0.03125, %v399_v60  ;;  %v581_v36 = vsel %vm321_vm3, %v505_v47, 0.0  ;;  %v506_v1 = vmul.f32 %v2104_v43, %v2104_v43  ;;  %v2150_v33 = vld [vmem:[%s2988_s3] ss:$0 sm:$0xff] }
 0x1a7   :  { %579 = vadd.xlane.f32.xlu1 %v578_v52  ;;  %582 = vadd.xlane.f32.xlu0 %v581_v36  ;;  %v402_v17 = vpop.xlane.xlu0 %401 }
 0x1a8   :  { %v2116_v58 = vsub.f32 %v1936_v15, %v444_v12  ;;  %v445_v41 = vmul.f32 0.03125, %v402_v17  ;;  %v507_v59 = vmul.f32 %v2109_v50, %v2109_v50  ;;  %v584_v5 = vsel %vm321_vm3, %v506_v1, 0.0  ;;  %v1511_v1 = vld [vmem:[%s2989_s5] sm:$0xff]  }
 0x1a9   :  { %v405_v7 = vpop.xlane.xlu1 %404  ;;  %1471 = vmatprep.subr.bf16.mxu1 %v1511_v1 }
 0x1aa   :  { %v2121_v3 = vsub.f32 %v1933_v14, %v445_v41  ;;  %v446_v22 = vmul.f32 0.03125, %v405_v7  ;;  %v587_v46 = vsel %vm321_vm3, %v507_v59, 0.0  ;;  %v508_v15 = vmul.f32 %v2116_v58, %v2116_v58  ;;  %1472 = vmatpush3.bf16.msra.mxu1 %v1511_v1 }
 0x1ab   :  { %585 = vadd.xlane.f32.xlu1 %v584_v5  ;;  %588 = vadd.xlane.f32.xlu0 %v587_v46  ;;  %v408_v21 = vpop.xlane.xlu0 %407 }
 0x1ac   :  { %v2128_v61 = vsub.f32 %v1941_v18, %v446_v22  ;;  %v447_v45 = vmul.f32 0.03125, %v408_v21  ;;  %v509_v16 = vmul.f32 %v2121_v3, %v2121_v3  ;;  %v590_v25 = vsel %vm321_vm3, %v508_v15, 0.0 }
 0x1ad   :  { %v411_v14 = vpop.xlane.xlu1 %410  ;;  %v2174_v21 = vmul.f32 %v2150_v33, %v1970_v49  ;;  %v2179_v15 = vmul.f32 %v2150_v33, %v1973_v55  ;;  %v2191_v49 = vmul.f32 %v2150_v33, %v1990_v11  ;;  %v2199_v55 = vmul.f32 %v2150_v33, %v2001_v6 }
 0x1ae   :  { %v2133_v20 = vsub.f32 %v1948_v26, %v447_v45  ;;  %v448_v24 = vmul.f32 0.03125, %v411_v14  ;;  %v593_v48 = vsel %vm321_vm3, %v509_v16, 0.0  ;;  %v510_v18 = vmul.f32 %v2128_v61, %v2128_v61 }
 0x1af   :  { %591 = vadd.xlane.f32.xlu1 %v590_v25  ;;  %594 = vadd.xlane.f32.xlu0 %v593_v48  ;;  %v414_v29 = vpop.xlane.xlu0 %413  ;;  %v2183_v45 = vmul.f32 %v2150_v33, %v1980_v63  ;;  %v2195_v25 = vmul.f32 %v2150_v33, %v1996_v19  ;;  %v2203_v63 = vmul.f32 %v2150_v33, %v2008_v38 }
 0x1b0   :  { %2995 = vst [vmem:[#allocation2_spill] sm:$0xff] %v2133_v20  ;;  %v2140_v30 = vsub.f32 %v1956_v32, %v448_v24  ;;  %v449_v53 = vmul.f32 0.03125, %v414_v29  ;;  %v511_v10 = vmul.f32 %v2133_v20, %v2133_v20  ;;  %v596_v9 = vsel %vm321_vm3, %v510_v18, 0.0 }
 0x1b1   :  { %v417_v26 = vpop.xlane.xlu1 %416  ;;  %v2187_v24 = vmul.f32 %v2150_v33, %v1983_v2  ;;  %v2207_v2 = vmul.f32 %v2150_v33, %v2013_v42  ;;  %v2215_v19 = vmul.f32 %v2150_v33, %v2020_v51  ;;  %v2219_v6 = vmul.f32 %v2150_v33, %v2025_v56 }
 0x1b2   :  { %2996 = vst [vmem:[#allocation3_spill] sm:$0xff] %v2140_v30  ;;  %v481_v39 = vsub.f32 %v1953_v31, %v449_v53  ;;  %v450_v34 = vmul.f32 0.03125, %v417_v26  ;;  %v599_v62 = vsel %vm321_vm3, %v511_v10, 0.0  ;;  %v512_v32 = vmul.f32 %v2140_v30, %v2140_v30 }
 0x1b3   :  { %597 = vadd.xlane.f32.xlu1 %v596_v9  ;;  %600 = vadd.xlane.f32.xlu0 %v599_v62  ;;  %v2223_v42 = vmul.f32 %v2150_v33, %v2032_v4  ;;  %v2227_v10 = vmul.f32 %v2150_v33, %v2037_v13  ;;  %v2231_v26 = vmul.f32 %v2150_v33, %v2044_v23 }
 0x1b4   :  { %v2155_v47 = vmul.f32 %v2150_v33, %v481_v39  ;;  %v482_v31 = vsub.f32 %v1961_v37, %v450_v34  ;;  %v513_v60 = vmul.f32 %v481_v39, %v481_v39  ;;  %v602_v52 = vsel %vm321_vm3, %v512_v32, 0.0  ;;  %v1512_v37 = vld [vmem:[%s2989_s5 + $0x8] sm:$0xff]  }
 0x1b5   :  { %1473 = vmatprep.subr.bf16.mxu1 %v1512_v37  ;;  %v2236_v51 = vmul.f32 %v2150_v33, %v2049_v28  ;;  %v2240_v56 = vmul.f32 %v2150_v33, %v2056_v40  ;;  %v2244_v4 = vmul.f32 %v2150_v33, %v2061_v44  ;;  %v2249_v13 = vmul.f32 %v2150_v33, %v2068_v54 }
 0x1b6   :  { %2997 = vst [vmem:[#allocation4_spill] sm:$0xff] %v2155_v47  ;;  %v2159_v12 = vmul.f32 %v2150_v33, %v482_v31  ;;  %v605_v36 = vsel %vm321_vm3, %v513_v60, 0.0  ;;  %v514_v17 = vmul.f32 %v482_v31, %v482_v31  ;;  %1474 = vmatpush3.bf16.msra.mxu1 %v1512_v37  ;;  %v2253_v23 = vmul.f32 %v2150_v33, %v2073_v57 }
 0x1b7   :  { %603 = vadd.xlane.f32.xlu1 %v602_v52  ;;  %606 = vadd.xlane.f32.xlu0 %v605_v36  ;;  %v2261_v44 = vmul.f32 %v2150_v33, %v2080_v8  ;;  %v2265_v9 = vmul.f32 %v2150_v33, %v2085_v0  ;;  %v2269_v57 = vmul.f32 %v2150_v33, %v2092_v27 }
 0x1b8   :  { %2998 = vst [vmem:[#allocation5_spill] sm:$0xff] %v2159_v12  ;;  %v608_v41 = vsel %vm321_vm3, %v514_v17, 0.0  ;;  %v2273_v32 = vmul.f32 %v2150_v33, %v2097_v35  ;;  %v2277_v31 = vmul.f32 %v2150_v33, %v2104_v43  ;;  %v2282_v0 = vmul.f32 %v2150_v33, %v2109_v50 }
 0x1b9   :  { %v2286_v60 = vmul.f32 %v2150_v33, %v2116_v58  ;;  %v2290_v27 = vmul.f32 %v2150_v33, %v2121_v3  ;;  %v2295_v35 = vmul.f32 %v2150_v33, %v2128_v61 }
 0x1bb   :  { %609 = vadd.xlane.f32.xlu1 %v608_v41 }
 0x208   :  { %v517_v59 = vpop.xlane.xlu0 %516 }
 0x209   :  { %v611_v7 = vmul.f32 0.032258064, %v517_v59 }
 0x20b   :  { %v2170_v22 = vadd.f32 1e-06, %v611_v7 }
 0x20c   :  { %v520_v5 = vpop.xlane.xlu1 %519  ;;  %v523_v46 = vpop.xlane.xlu0 %522 }
 0x20d   :  { %1513 = vrsqrt.f32 %v2170_v22  ;;  %v612_v16 = vmul.f32 0.032258064, %v520_v5  ;;  %v613_v14 = vmul.f32 0.032258064, %v523_v46  ;;  %vm677_vm4 = vcmp.eq.f32.partialorder %v2170_v22, inf }
 0x20e   :  { %vm679_vm5 = vcmp.eq.f32.partialorder %v2170_v22, 0.0  ;;  %v680_v1 = vand.u32 2147483648, %v2170_v22 }
 0x20f   :  { %v2209_v48 = vadd.f32 1e-06, %v612_v16  ;;  %v2211_v11 = vadd.f32 1e-06, %v613_v14 }
 0x210   :  { %v526_v29 = vpop.xlane.xlu1 %525  ;;  %v529_v18 = vpop.xlane.xlu0 %528 }
 0x211   :  { %v614_v38 = vmul.f32 0.032258064, %v526_v29  ;;  %v615_v53 = vmul.f32 0.032258064, %v529_v18  ;;  %1515 = vrsqrt.f32 %v2209_v48  ;;  %vm691_vm6 = vcmp.eq.f32.partialorder %v2211_v11, inf }
 0x212   :  { %1517 = vrsqrt.f32 %v2211_v11  ;;  %vm684_vm7 = vcmp.eq.f32.partialorder %v2209_v48, inf  ;;  %vm693_vm8 = vcmp.eq.f32.partialorder %v2211_v11, 0.0  ;;  %v694_v61 = vand.u32 2147483648, %v2211_v11 }
 0x213   :  { %v2255_v28 = vadd.f32 1e-06, %v614_v38  ;;  %v2257_v39 = vadd.f32 1e-06, %v615_v53 }
 0x214   :  { %v532_v40 = vpop.xlane.xlu1 %531  ;;  %v535_v34 = vpop.xlane.xlu0 %534 }
 0x215   :  { %v616_v54 = vmul.f32 0.032258064, %v532_v40  ;;  %v617_v62 = vmul.f32 0.032258064, %v535_v34  ;;  %1519 = vrsqrt.f32 %v2255_v28  ;;  %vm698_vm9 = vcmp.eq.f32.partialorder %v2255_v28, inf }
 0x216   :  { %1521 = vrsqrt.f32 %v2257_v39  ;;  %vm700_vm10 = vcmp.eq.f32.partialorder %v2255_v28, 0.0  ;;  %v701_v37 = vand.u32 2147483648, %v2255_v28  ;;  %vm705_vm11 = vcmp.eq.f32.partialorder %v2257_v39, inf }
 0x217   :  { %v1514_v8 = vpop.eup %1513  ;;  %v2298_v43 = vadd.f32 1e-06, %v616_v54  ;;  %v2300_v50 = vadd.f32 1e-06, %v617_v62  ;;  %vm707_vm12 = vcmp.eq.f32.partialorder %v2257_v39, 0.0  ;;  %v708_v53 = vand.u32 2147483648, %v2257_v39 }
 0x218   :  { %v538_v52 = vpop.xlane.xlu1 %537  ;;  %v541_v36 = vpop.xlane.xlu0 %540  ;;  %v676_v58 = vmul.f32 %v1514_v8, %v2170_v22 }
 0x219   :  { %v618_v3 = vmul.f32 0.032258064, %v538_v52  ;;  %v619_v17 = vmul.f32 0.032258064, %v541_v36  ;;  %1523 = vrsqrt.f32 %v2298_v43  ;;  %vm712_vm13 = vcmp.eq.f32.partialorder %v2298_v43, inf }
 0x21a   :  { %1525 = vrsqrt.f32 %v2300_v50  ;;  %v678_v14 = vsel %vm677_vm4, %v2170_v22, %v676_v58  ;;  %vm714_vm14 = vcmp.eq.f32.partialorder %v2298_v43, 0.0  ;;  %v715_v40 = vand.u32 2147483648, %v2298_v43 }
 0x21b   :  { %v1516_v33 = vpop.eup %1515  ;;  %v2315_v59 = vadd.f32 1e-06, %v618_v3  ;;  %v2317_v7 = vadd.f32 1e-06, %v619_v17  ;;  %vm719_vm15 = vcmp.eq.f32.partialorder %v2300_v50, inf  ;;  %v681_v36 = vsel %vm679_vm5, %v680_v1, %v678_v14 }
 0x21c   :  { %v544_v5 = vpop.xlane.xlu1 %543  ;;  %v547_v46 = vpop.xlane.xlu0 %546  ;;  %v683_v54 = vmul.f32 %v1516_v33, %v2209_v48  ;;  %vm721_vm0 = vcmp.eq.f32.partialorder %v2300_v50, 0.0  ;;  %v2352_v1 = vadd.f32 1e-06, %v681_v36 }
 0x21d   :  { %v1518_v16 = vpop.eup %1517  ;;  %v620_v29 = vmul.f32 0.032258064, %v544_v5  ;;  %v621_v18 = vmul.f32 0.032258064, %v547_v46  ;;  %1527 = vrsqrt.f32 %v2315_v59  ;;  %v722_v46 = vand.u32 2147483648, %v2300_v50 }
 0x21e   :  { %v690_v38 = vmul.f32 %v1518_v16, %v2211_v11  ;;  %1529 = vrsqrt.f32 %v2317_v7  ;;  %vm726_vm1 = vcmp.eq.f32.partialorder %v2315_v59, inf  ;;  %vm728_vm2 = vcmp.eq.f32.partialorder %v2315_v59, 0.0 }
 0x21f   :  { %v1520_v34 = vpop.eup %1519  ;;  %v2333_v62 = vadd.f32 1e-06, %v620_v29  ;;  %v2342_v5 = vadd.f32 1e-06, %v621_v18  ;;  %v2357_v29 = vsel %vm684_vm7, %v2209_v48, %v683_v54  ;;  %v729_v54 = vand.u32 2147483648, %v2315_v59 }
 0x220   :  { %v550_v8 = vpop.xlane.xlu1 %549  ;;  %v553_v52 = vpop.xlane.xlu0 %552  ;;  %v692_v3 = vsel %vm691_vm6, %v2211_v11, %v690_v38  ;;  %v697_v17 = vmul.f32 %v1520_v34, %v2255_v28  ;;  %vm733_vm4 = vcmp.eq.f32.partialorder %v2317_v7, inf  ;;  %vm735_vm5 = vcmp.eq.f32.partialorder %v2317_v7, 0.0 }
 0x221   :  { %v1522_v58 = vpop.eup %1521  ;;  %1531 = vrsqrt.f32 %v2333_v62  ;;  %v622_v16 = vmul.f32 0.032258064, %v550_v8  ;;  %v695_v18 = vsel %vm693_vm8, %v694_v61, %v692_v3  ;;  %v736_v61 = vand.u32 2147483648, %v2317_v7 }
 0x222   :  { %v704_v33 = vmul.f32 %v1522_v58, %v2257_v39  ;;  %v699_v22 = vsel %vm698_vm9, %v2255_v28, %v697_v17  ;;  %1533 = vrsqrt.f32 %v2342_v5  ;;  %vm740_vm6 = vcmp.eq.f32.partialorder %v2333_v62, inf }
 0x223   :  { %v1524_v14 = vpop.eup %1523  ;;  %v702_v36 = vsel %vm700_vm10, %v701_v37, %v699_v22  ;;  %v2373_v3 = vadd.f32 1e-06, %v622_v16  ;;  %v623_v37 = vmul.f32 0.032258064, %v553_v52  ;;  %vm742_vm7 = vcmp.eq.f32.partialorder %v2333_v62, 0.0 }
 0x224   :  { %v706_v38 = vsel %vm705_vm11, %v2257_v39, %v704_v33  ;;  %v556_v34 = vpop.xlane.xlu1 %555  ;;  %v559_v8 = vpop.xlane.xlu0 %558  ;;  %v711_v17 = vmul.f32 %v1524_v14, %v2298_v43  ;;  %v939_v33 = vadd.f32 1e-06, %v695_v18  ;;  %v940_v14 = vadd.f32 1e-06, %v702_v36 }
 0x225   :  { %v1526_v58 = vpop.eup %1525  ;;  %v709_v41 = vsel %vm707_vm12, %v708_v53, %v706_v38  ;;  %1535 = vrsqrt.f32 %v2373_v3  ;;  %v624_v52 = vmul.f32 0.032258064, %v556_v34  ;;  %vm747_vm8 = vcmp.eq.f32.partialorder %v2342_v5, inf }
 0x226   :  { %v718_v11 = vmul.f32 %v1526_v58, %v2300_v50  ;;  %v713_v28 = vsel %vm712_vm13, %v2298_v43, %v711_v17  ;;  %v941_v38 = vadd.f32 1e-06, %v709_v41  ;;  %1537 = vrcp.f32 %v939_v33 }
 0x227   :  { %v1528_v22 = vpop.eup %1527  ;;  %v716_v58 = vsel %vm714_vm14, %v715_v40, %v713_v28  ;;  %v743_v40 = vand.u32 2147483648, %v2333_v62  ;;  %1539 = vrcp.f32 %v940_v14  ;;  %vm749_vm9 = vcmp.eq.f32.partialorder %v2342_v5, 0.0 }
 0x228   :  { %v720_v12 = vsel %vm719_vm15, %v2300_v50, %v718_v11  ;;  %v1530_v16 = vpop.eup %1529  ;;  %v725_v53 = vmul.f32 %v1528_v22, %v2315_v59  ;;  %v562_v18 = vpop.xlane.xlu1 %561  ;;  %v942_v17 = vadd.f32 1e-06, %v716_v58  ;;  %v2396_v50 = vadd.f32 1e-06, %v623_v37 }
 0x229   :  { %v723_v39 = vsel %vm721_vm0, %v722_v46, %v720_v12  ;;  %v732_v43 = vmul.f32 %v1530_v16, %v2317_v7  ;;  %v565_v36 = vpop.xlane.xlu0 %564  ;;  %v2407_v37 = vadd.f32 1e-06, %v624_v52  ;;  %vm686_vm10 = vcmp.eq.f32.partialorder %v2209_v48, 0.0 }
 0x22a   :  { %v727_v12 = vsel %vm726_vm1, %v2315_v59, %v725_v53  ;;  %v943_v34 = vadd.f32 1e-06, %v723_v39  ;;  %1541 = vrsqrt.f32 %v2396_v50  ;;  %v625_v59 = vmul.f32 0.032258064, %v559_v8 }
 0x22b   :  { %v1532_v46 = vpop.eup %1531  ;;  %v730_v41 = vsel %vm728_vm2, %v729_v54, %v727_v12  ;;  %v734_v11 = vsel %vm733_vm4, %v2317_v7, %v732_v43  ;;  %1543 = vrcp.f32 %v941_v38  ;;  %v750_v53 = vand.u32 2147483648, %v2342_v5 }
 0x22c   :  { %v1534_v28 = vpop.eup %1533  ;;  %v737_v33 = vsel %vm735_vm5, %v736_v61, %v734_v11  ;;  %v739_v22 = vmul.f32 %v1532_v46, %v2333_v62  ;;  %v944_v14 = vadd.f32 1e-06, %v730_v41  ;;  %1545 = vrcp.f32 %v942_v17  ;;  %v568_v7 = vpop.xlane.xlu1 %567 }
 0x22d   :  { %v746_v58 = vmul.f32 %v1534_v28, %v2342_v5  ;;  %1547 = vrcp.f32 %v943_v34  ;;  %v945_v61 = vadd.f32 1e-06, %v737_v33  ;;  %v571_v8 = vpop.xlane.xlu0 %570  ;;  %vm754_vm11 = vcmp.eq.f32.partialorder %v2373_v3, inf }
 0x22e   :  { %v741_v54 = vsel %vm740_vm6, %v2333_v62, %v739_v22  ;;  %vm756_vm12 = vcmp.eq.f32.partialorder %v2373_v3, 0.0  ;;  %1549 = vrsqrt.f32 %v2407_v37  ;;  %v2423_v38 = vadd.f32 1e-06, %v625_v59 }
 0x22f   :  { %v744_v16 = vsel %vm742_vm7, %v743_v40, %v741_v54  ;;  %v748_v39 = vsel %vm747_vm8, %v2342_v5, %v746_v58  ;;  %1551 = vrcp.f32 %v944_v14  ;;  %v626_v43 = vmul.f32 0.032258064, %v562_v18  ;;  %v1536_v17 = vpop.eup %1535 }
 0x230   :  { %v946_v52 = vadd.f32 1e-06, %v744_v16  ;;  %v751_v62 = vsel %vm749_vm9, %v750_v53, %v748_v39  ;;  %v627_v40 = vmul.f32 0.032258064, %v565_v36  ;;  %v628_v12 = vmul.f32 0.032258064, %v568_v7  ;;  %v2430_v11 = vpop.eup %1537  ;;  %v574_v36 = vpop.xlane.xlu1 %573 }
 0x231   :  { %v629_v46 = vmul.f32 0.032258064, %v571_v8  ;;  %1553 = vrcp.f32 %v945_v61  ;;  %v753_v34 = vmul.f32 %v1536_v17, %v2373_v3  ;;  %v757_v41 = vand.u32 2147483648, %v2373_v3  ;;  %v2438_v28 = vpop.eup %1539  ;;  %v577_v53 = vpop.xlane.xlu0 %576 }
 0x232   :  { %vm761_vm13 = vcmp.eq.f32.partialorder %v2396_v50, inf  ;;  %vm763_vm14 = vcmp.eq.f32.partialorder %v2396_v50, 0.0  ;;  %1555 = vrsqrt.f32 %v2423_v38  ;;  %v2434_v18 = vadd.f32 1e-06, %v626_v43 }
 0x233   :  { %v2436_v5 = vadd.f32 1e-06, %v627_v40  ;;  %1557 = vrcp.f32 %v946_v52  ;;  %v947_v33 = vadd.f32 1e-06, %v751_v62  ;;  %v755_v22 = vsel %vm754_vm11, %v2373_v3, %v753_v34 }
 0x234   :  { %v2443_v14 = vadd.f32 1e-06, %v628_v12  ;;  %v1542_v58 = vpop.eup %1541  ;;  %v758_v59 = vsel %vm756_vm12, %v757_v41, %v755_v22  ;;  %v764_v54 = vand.u32 2147483648, %v2396_v50  ;;  %1559 = vrsqrt.f32 %v2434_v18 }
 0x235   :  { %v2449_v7 = vadd.f32 1e-06, %v629_v46  ;;  %v2451_v61 = vpop.eup %1543  ;;  %v760_v16 = vmul.f32 %v1542_v58, %v2396_v50  ;;  %vm768_vm15 = vcmp.eq.f32.partialorder %v2407_v37, inf  ;;  %vm770_vm0 = vcmp.eq.f32.partialorder %v2407_v37, 0.0 }
 0x236   :  { %1561 = vrsqrt.f32 %v2436_v5  ;;  %v2457_v39 = vpop.eup %1545  ;;  %v771_v3 = vand.u32 2147483648, %v2407_v37  ;;  %v630_v8 = vmul.f32 0.032258064, %v574_v36  ;;  %v2999_v52 = vand.u32 2147483648, %v2209_v48  ;;  %v580_v48 = vpop.xlane.xlu1 %579 }
 0x237   :  { %1563 = vrsqrt.f32 %v2443_v14  ;;  %v2466_v17 = vpop.eup %1547  ;;  %v948_v62 = vadd.f32 1e-06, %v758_v59  ;;  %v762_v40 = vsel %vm761_vm13, %v2396_v50, %v760_v16  ;;  %vm775_vm1 = vcmp.eq.f32.partialorder %v2423_v38, inf }
 0x238   :  { %v688_v43 = vsel %vm686_vm10, %v2999_v52, %v2357_v29  ;;  %1565 = vrcp.f32 %v947_v33  ;;  %v1550_v12 = vpop.eup %1549  ;;  %vm777_vm2 = vcmp.eq.f32.partialorder %v2423_v38, 0.0  ;;  %v778_v46 = vand.u32 2147483648, %v2423_v38 }
 0x239   :  { %vm782_vm4 = vcmp.eq.f32.partialorder %v2434_v18, inf  ;;  %1567 = vrsqrt.f32 %v2449_v7  ;;  %v2476_v29 = vpop.eup %1551  ;;  %v765_v34 = vsel %vm763_vm14, %v764_v54, %v762_v40  ;;  %v767_v41 = vmul.f32 %v1550_v12, %v2407_v37 }
 0x23a   :  { %vm784_vm5 = vcmp.eq.f32.partialorder %v2434_v18, 0.0  ;;  %v785_v36 = vand.u32 2147483648, %v2434_v18  ;;  %vm789_vm6 = vcmp.eq.f32.partialorder %v2436_v5, inf  ;;  %v2484_v33 = vadd.f32 1e-06, %v630_v8 }
 0x23b   :  { %v631_v22 = vmul.f32 0.032258064, %v577_v53  ;;  %v938_v58 = vadd.f32 1e-06, %v688_v43  ;;  %1569 = vrcp.f32 %v2352_v1  ;;  %v2487_v59 = vpop.eup %1553  ;;  %v769_v50 = vsel %vm768_vm15, %v2407_v37, %v767_v41  ;;  %v583_v1 = vpop.xlane.xlu0 %582 }
 0x23c   :  { %1571 = vrcp.f32 %v948_v62  ;;  %vm791_vm7 = vcmp.eq.f32.partialorder %v2436_v5, 0.0  ;;  %v632_v54 = vmul.f32 0.032258064, %v580_v48  ;;  %v1556_v16 = vpop.eup %1555  ;;  %v792_v52 = vand.u32 2147483648, %v2436_v5 }
 0x23d   :  { %vm796_vm8 = vcmp.eq.f32.partialorder %v2443_v14, inf  ;;  %vm798_vm9 = vcmp.eq.f32.partialorder %v2443_v14, 0.0  ;;  %1573 = vrsqrt.f32 %v2484_v33  ;;  %v2497_v8 = vpop.eup %1557  ;;  %v949_v53 = vadd.f32 1e-06, %v765_v34 }
 0x23e   :  { %v772_v43 = vsel %vm770_vm0, %v771_v3, %v769_v50  ;;  %v774_v62 = vmul.f32 %v1556_v16, %v2423_v38  ;;  %v2502_v40 = vadd.f32 1e-06, %v631_v22  ;;  %v1560_v12 = vpop.eup %1559  ;;  %v799_v48 = vand.u32 2147483648, %v2443_v14 }
 0x23f   :  { %vm803_vm10 = vcmp.eq.f32.partialorder %v2449_v7, inf  ;;  %1575 = vrcp.f32 %v938_v58  ;;  %v2506_v41 = vadd.f32 1e-06, %v632_v54  ;;  %v781_v37 = vmul.f32 %v1560_v12, %v2434_v18 }
 0x240   :  { %v1562_v47 = vpop.eup %1561  ;;  %v776_v34 = vsel %vm775_vm1, %v2423_v38, %v774_v62  ;;  %vm805_vm11 = vcmp.eq.f32.partialorder %v2449_v7, 0.0  ;;  %v806_v3 = vand.u32 2147483648, %v2449_v7  ;;  %v633_v22 = vmul.f32 0.032258064, %v583_v1 }
 0x241   :  { %v1564_v50 = vpop.eup %1563  ;;  %v950_v16 = vadd.f32 1e-06, %v772_v43  ;;  %v779_v30 = vsel %vm777_vm2, %v778_v46, %v776_v34  ;;  %v788_v58 = vmul.f32 %v1562_v47, %v2436_v5  ;;  %1577 = vrsqrt.f32 %v2502_v40 }
 0x242   :  { %v2518_v54 = vpop.eup %1565  ;;  %1579 = vrcp.f32 %v949_v53  ;;  %v951_v62 = vadd.f32 1e-06, %v779_v30  ;;  %v783_v12 = vsel %vm782_vm4, %v2434_v18, %v781_v37  ;;  %v795_v20 = vmul.f32 %v1564_v50, %v2443_v14  ;;  %v586_v50 = vpop.xlane.xlu1 %585 }
 0x243   :  { %v1568_v1 = vpop.eup %1567  ;;  %v786_v43 = vsel %vm784_vm5, %v785_v36, %v783_v12  ;;  %v790_v47 = vsel %vm789_vm6, %v2436_v5, %v788_v58  ;;  %vm810_vm12 = vcmp.eq.f32.partialorder %v2484_v33, inf  ;;  %1581 = vrsqrt.f32 %v2506_v41  ;;  %v2557_v12 = vld [vmem:[%s2990_s4] ss:$0 sm:$0xff] }
 0x244   :  { %v952_v38 = vadd.f32 1e-06, %v786_v43  ;;  %v793_v30 = vsel %vm791_vm7, %v792_v52, %v790_v47  ;;  %v797_v46 = vsel %vm796_vm8, %v2443_v14, %v795_v20  ;;  %v2536_v53 = vadd.f32 1e-06, %v633_v22 }
 0x245   :  { %v1570_v18 = vpop.eup %1569  ;;  %1583 = vrcp.f32 %v950_v16  ;;  %v953_v36 = vadd.f32 1e-06, %v793_v30  ;;  %v800_v34 = vsel %vm798_vm9, %v799_v48, %v797_v46  ;;  %v802_v37 = vmul.f32 %v1568_v1, %v2449_v7  ;;  %v589_v16 = vpop.xlane.xlu0 %588 }
 0x246   :  { %v2541_v58 = vpop.eup %1571  ;;  %1585 = vrcp.f32 %v951_v62  ;;  %v954_v5 = vadd.f32 1e-06, %v800_v34  ;;  %vm812_vm13 = vcmp.eq.f32.partialorder %v2484_v33, 0.0  ;;  %v813_v52 = vand.u32 2147483648, %v2484_v33 }
 0x247   :  { %v1574_v20 = vpop.eup %1573  ;;  %1587 = vrcp.f32 %v952_v38  ;;  %v804_v22 = vsel %vm803_vm10, %v2449_v7, %v802_v37  ;;  %v970_v14 = vmul.f32 %v1570_v18, %v2179_v15  ;;  %v974_v48 = vmul.f32 %v2430_v11, %v2174_v21 }
 0x248   :  { %1589 = vrcp.f32 %v953_v36  ;;  %v809_v62 = vmul.f32 %v1574_v20, %v2484_v33  ;;  %vm817_vm14 = vcmp.eq.f32.partialorder %v2502_v40, inf  ;;  %vm819_vm15 = vcmp.eq.f32.partialorder %v2502_v40, 0.0  ;;  %v592_v36 = vpop.xlane.xlu1 %591 }
 0x249   :  { %v1576_v1 = vpop.eup %1575  ;;  %v807_v15 = vsel %vm805_vm11, %v806_v3, %v804_v22  ;;  %v820_v43 = vand.u32 2147483648, %v2502_v40  ;;  %1591 = vrsqrt.f32 %v2536_v53  ;;  %v976_v21 = vmul.f32 %v2438_v28, %v2183_v45 }
 0x24a   :  { %1593 = vrcp.f32 %v954_v5  ;;  %v811_v11 = vsel %vm810_vm12, %v2484_v33, %v809_v62  ;;  %v972_v47 = vmul.f32 %v1576_v1, %v2187_v24  ;;  %v634_v38 = vmul.f32 0.032258064, %v586_v50 }
 0x24b   :  { %v1578_v30 = vpop.eup %1577  ;;  %v1039_v46 = vadd.f32 %v2557_v12, %v970_v14  ;;  %v1041_v7 = vadd.f32 %v2557_v12, %v974_v48  ;;  %v1042_v3 = vadd.f32 %v2557_v12, %v976_v21  ;;  %v635_v18 = vmul.f32 0.032258064, %v589_v16  ;;  %v595_v48 = vpop.xlane.xlu0 %594 }
 0x24c   :  { %v2572_v34 = vpop.eup %1579  ;;  %v955_v45 = vadd.f32 1e-06, %v807_v15  ;;  %v816_v28 = vmul.f32 %v1578_v30, %v2502_v40  ;;  %v1040_v37 = vadd.f32 %v2557_v12, %v972_v47  ;;  %v2576_v5 = vadd.f32 1e-06, %v634_v38 }
 0x24d   :  { %v1582_v24 = vpop.eup %1581  ;;  %v814_v50 = vsel %vm812_vm13, %v813_v52, %v811_v11  ;;  %v1072_v20 = vpack.c.bf16 %v1042_v3, %v1041_v7  ;;  %v2580_v22 = vadd.f32 1e-06, %v635_v18  ;;  %v978_v14 = vmul.f32 %v2451_v61, %v2191_v49 }
 0x24e   :  { %v818_v16 = vsel %vm817_vm14, %v2502_v40, %v816_v28  ;;  %v1071_v62 = vpack.c.bf16 %v1040_v37, %v1039_v46  ;;  %v823_v1 = vmul.f32 %v1582_v24, %v2506_v41  ;;  %v980_v15 = vmul.f32 %v2457_v39, %v2195_v25 }
 0x24f   :  { %v2590_v21 = vpop.eup %1583  ;;  %v821_v33 = vsel %vm819_vm15, %v820_v43, %v818_v16  ;;  %vm824_vm0 = vcmp.eq.f32.partialorder %v2506_v41, inf  ;;  %vm826_vm1 = vcmp.eq.f32.partialorder %v2506_v41, 0.0  ;;  %1595 = vrsqrt.f32 %v2576_v5  ;;  %v598_v43 = vpop.xlane.xlu1 %597 }
 0x250   :  { %v2597_v49 = vpop.eup %1585  ;;  %v956_v61 = vadd.f32 1e-06, %v814_v50  ;;  %1475 = vmatprep.mubr.msk.bf16.mxu1 %vm321_vm3, %v1071_v62  ;;  %v825_v52 = vsel %vm824_vm0, %v2506_v41, %v823_v1  ;;  %v827_v25 = vand.u32 2147483648, %v2506_v41  ;;  %1597 = vrsqrt.f32 %v2580_v22  ;;  %v601_v37 = vpop.xlane.xlu0 %600 }
 0x251   :  { %v2603_v39 = vpop.eup %1587  ;;  %1599 = vrcp.f32 %v955_v45  ;;  %vm831_vm2 = vcmp.eq.f32.partialorder %v2536_v53, inf  ;;  %vm833_vm4 = vcmp.eq.f32.partialorder %v2536_v53, 0.0  ;;  %v834_v40 = vand.u32 2147483648, %v2536_v53  ;;  %1476 = vmatmul.mubr.msk.bf16.vlgmr.msra.gmra.mrb[0].mxu1 %vm321_vm3, %v1072_v20 }
 0x252   :  { %v2609_v11 = vpop.eup %1589  ;;  %v957_v47 = vadd.f32 1e-06, %v821_v33  ;;  %v828_v38 = vsel %vm826_vm1, %v827_v25, %v825_v52  ;;  %v1043_v30 = vadd.f32 %v2557_v12, %v978_v14  ;;  %v1044_v46 = vadd.f32 %v2557_v12, %v980_v15 }
 0x253   :  { %v1592_v7 = vpop.eup %1591  ;;  %v636_v3 = vmul.f32 0.032258064, %v592_v36  ;;  %v637_v18 = vmul.f32 0.032258064, %v595_v48  ;;  %v982_v45 = vmul.f32 %v2466_v17, %v2199_v55  ;;  %v984_v28 = vmul.f32 %v2476_v29, %v2203_v63  ;;  %v604_v33 = vpop.xlane.xlu1 %603 }
 0x254   :  { %v2619_v24 = vpop.eup %1593  ;;  %1601 = vrcp.f32 %v956_v61  ;;  %v830_v41 = vmul.f32 %v1592_v7, %v2536_v53  ;;  %v1073_v50 = vpack.c.bf16 %v1044_v46, %v1043_v30  ;;  %v638_v20 = vmul.f32 0.032258064, %v598_v43  ;;  %v607_v52 = vpop.xlane.xlu0 %606 }
 0x255   :  { %vm838_vm5 = vcmp.eq.f32.partialorder %v2576_v5, inf  ;;  %v2623_v14 = vadd.f32 1e-06, %v636_v3  ;;  %v2625_v36 = vadd.f32 1e-06, %v637_v18  ;;  %v1046_v48 = vadd.f32 %v2557_v12, %v984_v28 }
 0x256   :  { %1603 = vrcp.f32 %v957_v47  ;;  %v958_v55 = vadd.f32 1e-06, %v828_v38  ;;  %v832_v63 = vsel %vm831_vm2, %v2536_v53, %v830_v41  ;;  %1479 = vmatprep.mubr.msk.bf16.mxu1 %vm321_vm3, %v1073_v50  ;;  %v2632_v17 = vadd.f32 1e-06, %v638_v20 }
 0x257   :  { %v835_v29 = vsel %vm833_vm4, %v834_v40, %v832_v63  ;;  %1605 = vrsqrt.f32 %v2623_v14  ;;  %v1045_v16 = vadd.f32 %v2557_v12, %v982_v45  ;;  %v639_v62 = vmul.f32 0.032258064, %v601_v37  ;;  %v610_v50 = vpop.xlane.xlu1 %609 }
 0x258   :  { %v959_v1 = vadd.f32 1e-06, %v835_v29  ;;  %vm840_vm6 = vcmp.eq.f32.partialorder %v2576_v5, 0.0  ;;  %v841_v15 = vand.u32 2147483648, %v2576_v5  ;;  %1607 = vrsqrt.f32 %v2625_v36 }
 0x259   :  { %v1596_v61 = vpop.eup %1595  ;;  %vm845_vm7 = vcmp.eq.f32.partialorder %v2580_v22, inf  ;;  %vm847_vm8 = vcmp.eq.f32.partialorder %v2580_v22, 0.0  ;;  %v1074_v53 = vpack.c.bf16 %v1046_v48, %v1045_v16  ;;  %1609 = vrsqrt.f32 %v2632_v17 }
 0x25a   :  { %v1598_v25 = vpop.eup %1597  ;;  %1611 = vrcp.f32 %v958_v55  ;;  %v837_v40 = vmul.f32 %v1596_v61, %v2576_v5  ;;  %v848_v43 = vand.u32 2147483648, %v2580_v22  ;;  %v986_v47 = vmul.f32 %v2487_v59, %v2207_v2 }
 0x25b   :  { %v2648_v38 = vpop.eup %1599  ;;  %v844_v30 = vmul.f32 %v1598_v25, %v2580_v22  ;;  %vm852_vm9 = vcmp.eq.f32.partialorder %v2623_v14, inf  ;;  %v855_v46 = vand.u32 2147483648, %v2623_v14  ;;  %1480 = vmatmul.mubr.msk.bf16.gmra.mrb[4].mxu1 %vm321_vm3, %v1074_v53  ;;  %v2654_v7 = vadd.f32 1e-06, %v639_v62 }
 0x25c   :  { %v988_v3 = vmul.f32 %v2497_v8, %v2215_v19  ;;  %1613 = vrcp.f32 %v959_v1  ;;  %v839_v2 = vsel %vm838_vm5, %v2576_v5, %v837_v40  ;;  %vm854_vm10 = vcmp.eq.f32.partialorder %v2623_v14, 0.0 }
 0x25d   :  { %vm859_vm11 = vcmp.eq.f32.partialorder %v2625_v36, inf  ;;  %v640_v59 = vmul.f32 0.032258064, %v604_v33  ;;  %v641_v18 = vmul.f32 0.032258064, %v607_v52  ;;  %v842_v45 = vsel %vm840_vm6, %v841_v15, %v839_v2 }
 0x25e   :  { %v846_v28 = vsel %vm845_vm7, %v2580_v22, %v844_v30  ;;  %vm861_vm12 = vcmp.eq.f32.partialorder %v2625_v36, 0.0  ;;  %v862_v19 = vand.u32 2147483648, %v2625_v36  ;;  %1615 = vrsqrt.f32 %v2654_v7  ;;  %v2671_v8 = vpop.eup %1601 }
 0x25f   :  { %v960_v37 = vadd.f32 1e-06, %v842_v45  ;;  %v849_v41 = vsel %vm847_vm8, %v848_v43, %v846_v28  ;;  %vm866_vm13 = vcmp.eq.f32.partialorder %v2632_v17, inf  ;;  %v1047_v5 = vadd.f32 %v2557_v12, %v986_v47 }
 0x260   :  { %v961_v20 = vadd.f32 1e-06, %v849_v41  ;;  %v1048_v48 = vadd.f32 %v2557_v12, %v988_v3  ;;  %v2678_v55 = vadd.f32 1e-06, %v640_v59  ;;  %v2680_v63 = vadd.f32 1e-06, %v641_v18  ;;  %v2682_v29 = vpop.eup %1603 }
 0x261   :  { %1617 = vrcp.f32 %v960_v37  ;;  %vm868_vm14 = vcmp.eq.f32.partialorder %v2632_v17, 0.0  ;;  %v990_v22 = vmul.f32 %v2518_v54, %v2219_v6  ;;  %v992_v16 = vmul.f32 %v2541_v58, %v2223_v42  ;;  %v1606_v62 = vpop.eup %1605 }
 0x262   :  { %1619 = vrcp.f32 %v961_v20  ;;  %v869_v1 = vand.u32 2147483648, %v2632_v17  ;;  %v1075_v15 = vpack.c.bf16 %v1048_v48, %v1047_v5  ;;  %v642_v33 = vmul.f32 0.032258064, %v610_v50  ;;  %v1608_v61 = vpop.eup %1607 }
 0x263   :  { %v851_v53 = vmul.f32 %v1606_v62, %v2623_v14  ;;  %vm873_vm15 = vcmp.eq.f32.partialorder %v2654_v7, inf  ;;  %vm875_vm0 = vcmp.eq.f32.partialorder %v2654_v7, 0.0  ;;  %1621 = vrsqrt.f32 %v2678_v55  ;;  %v1610_v52 = vpop.eup %1609 }
 0x264   :  { %v858_v6 = vmul.f32 %v1608_v61, %v2625_v36  ;;  %v876_v42 = vand.u32 2147483648, %v2654_v7  ;;  %1483 = vmatprep.mubr.msk.bf16.mxu1 %vm321_vm3, %v1075_v15  ;;  %v883_v54 = vand.u32 2147483648, %v2678_v55  ;;  %1623 = vrsqrt.f32 %v2680_v63  ;;  %v2699_v58 = vpop.eup %1611 }
 0x265   :  { %v853_v25 = vsel %vm852_vm9, %v2623_v14, %v851_v53  ;;  %v865_v40 = vmul.f32 %v1610_v52, %v2632_v17  ;;  %v1049_v43 = vadd.f32 %v2557_v12, %v990_v22  ;;  %v1050_v47 = vadd.f32 %v2557_v12, %v992_v16 }
 0x266   :  { %v856_v30 = vsel %vm854_vm10, %v855_v46, %v853_v25  ;;  %v860_v3 = vsel %vm859_vm11, %v2625_v36, %v858_v6  ;;  %v2712_v2 = vadd.f32 1e-06, %v642_v33  ;;  %v994_v59 = vmul.f32 %v2572_v34, %v2227_v10  ;;  %v1614_v18 = vpop.eup %1613 }
 0x267   :  { %v962_v45 = vadd.f32 1e-06, %v856_v30  ;;  %v863_v28 = vsel %vm861_vm12, %v862_v19, %v860_v3  ;;  %v867_v37 = vsel %vm866_vm13, %v2632_v17, %v865_v40  ;;  %vm880_vm1 = vcmp.eq.f32.partialorder %v2678_v55, inf }
 0x268   :  { %v1076_v14 = vpack.c.bf16 %v1050_v47, %v1049_v43  ;;  %v1616_v46 = vpop.eup %1615  ;;  %v963_v41 = vadd.f32 1e-06, %v863_v28  ;;  %v870_v5 = vsel %vm868_vm14, %v869_v1, %v867_v37  ;;  %vm882_vm2 = vcmp.eq.f32.partialorder %v2678_v55, 0.0 }
 0x269   :  { %vm887_vm4 = vcmp.eq.f32.partialorder %v2680_v63, inf  ;;  %1625 = vrsqrt.f32 %v2712_v2  ;;  %v964_v10 = vadd.f32 1e-06, %v870_v5  ;;  %v872_v34 = vmul.f32 %v1616_v46, %v2654_v7 }
 0x26a   :  { %1627 = vrcp.f32 %v962_v45  ;;  %vm889_vm5 = vcmp.eq.f32.partialorder %v2680_v63, 0.0  ;;  %1484 = vmatmul.mubr.msk.bf16.gmra.mrb[8].mxu1 %vm321_vm3, %v1076_v14  ;;  %v890_v36 = vand.u32 2147483648, %v2680_v63  ;;  %v996_v17 = vmul.f32 %v2590_v21, %v2231_v26 }
 0x26b   :  { %1629 = vrcp.f32 %v963_v41  ;;  %v1051_v19 = vadd.f32 %v2557_v12, %v994_v59  ;;  %v1618_v50 = vpop.eup %1617  ;;  %v874_v20 = vsel %vm873_vm15, %v2654_v7, %v872_v34  ;;  %v998_v48 = vmul.f32 %v2597_v49, %v2236_v51 }
 0x26c   :  { %1631 = vrcp.f32 %v964_v10  ;;  %v1000_v22 = vmul.f32 %v2603_v39, %v2240_v56  ;;  %v1620_v16 = vpop.eup %1619  ;;  %v877_v62 = vsel %vm875_vm0, %v876_v42, %v874_v20  ;;  %vm894_vm6 = vcmp.eq.f32.partialorder %v2712_v2, inf }
 0x26d   :  { %v1052_v26 = vadd.f32 %v2557_v12, %v996_v17  ;;  %v1002_v21 = vmul.f32 %v2609_v11, %v2244_v4  ;;  %v1004_v1 = vmul.f32 %v2619_v24, %v2249_v13  ;;  %v1622_v15 = vpop.eup %1621  ;;  %v965_v33 = vadd.f32 1e-06, %v877_v62 }
 0x26e   :  { %vm896_vm7 = vcmp.eq.f32.partialorder %v2712_v2, 0.0  ;;  %v1053_v51 = vadd.f32 %v2557_v12, %v998_v48  ;;  %v1054_v56 = vadd.f32 %v2557_v12, %v1000_v22  ;;  %v1006_v49 = vmul.f32 %v2648_v38, %v2253_v23  ;;  %v1624_v39 = vpop.eup %1623 }
 0x26f   :  { %v879_v7 = vmul.f32 %v1622_v15, %v2678_v55  ;;  %v1077_v61 = vpack.c.bf16 %v1052_v26, %v1051_v19  ;;  %v1055_v4 = vadd.f32 %v2557_v12, %v1002_v21  ;;  %v1056_v11 = vadd.f32 %v2557_v12, %v1004_v1  ;;  %v3002_v1 = vld [vmem:[#allocation4_spill] sm:$0xff] }
 0x270   :  { %1633 = vrcp.f32 %v965_v33  ;;  %v886_v13 = vmul.f32 %v1624_v39, %v2680_v63  ;;  %v1078_v24 = vpack.c.bf16 %v1054_v56, %v1053_v51  ;;  %v1008_v53 = vmul.f32 %v2671_v8, %v2261_v44 }
 0x271   :  { %v881_v52 = vsel %vm880_vm1, %v2678_v55, %v879_v7  ;;  %1487 = vmatprep.mubr.msk.bf16.mxu1 %vm321_vm3, %v1077_v61  ;;  %v1079_v23 = vpack.c.bf16 %v1056_v11, %v1055_v4  ;;  %v1057_v38 = vadd.f32 %v2557_v12, %v1006_v49  ;;  %v1010_v6 = vmul.f32 %v2682_v29, %v2265_v9  ;;  %v3003_v7 = vld [vmem:[#allocation5_spill] sm:$0xff] }
 0x272   :  { %v884_v42 = vsel %vm882_vm2, %v883_v54, %v881_v52  ;;  %v888_v44 = vsel %vm887_vm4, %v2680_v63, %v886_v13  ;;  %1488 = vmatmul.mubr.msk.bf16.gmra.mrb[12].mxu1 %vm321_vm3, %v1078_v24  ;;  %v1058_v8 = vadd.f32 %v2557_v12, %v1008_v53  ;;  %v1012_v25 = vmul.f32 %v2699_v58, %v2269_v57  ;;  %v2823_v13 = vld [vmem:[%s2991_s6] ss:$0 sm:$0xff] }
 0x273   :  { %v1626_v40 = vpop.eup %1625  ;;  %v966_v43 = vadd.f32 1e-06, %v884_v42  ;;  %v891_v9 = vsel %vm889_vm5, %v890_v36, %v888_v44  ;;  %1491 = vmatprep.mubr.msk.bf16.mxu1 %vm321_vm3, %v1079_v23  ;;  %v1059_v55 = vadd.f32 %v2557_v12, %v1010_v6  ;;  %v1014_v29 = vmul.f32 %v1614_v18, %v2273_v32 }
 0x274   :  { %v1628_v54 = vpop.eup %1627  ;;  %v967_v47 = vadd.f32 1e-06, %v891_v9  ;;  %v893_v30 = vmul.f32 %v1626_v40, %v2712_v2  ;;  %v1080_v3 = vpack.c.bf16 %v1058_v8, %v1057_v38  ;;  %v1060_v59 = vadd.f32 %v2557_v12, %v1012_v25 }
 0x275   :  { %v1630_v45 = vpop.eup %1629  ;;  %1635 = vrcp.f32 %v966_v43  ;;  %v897_v57 = vand.u32 2147483648, %v2712_v2  ;;  %v1016_v63 = vmul.f32 %v1618_v50, %v2277_v31  ;;  %v1018_v58 = vmul.f32 %v1620_v16, %v2282_v0  ;;  %v3000_v50 = vld [vmem:[#allocation2_spill] sm:$0xff] }
 0x276   :  { %v1632_v28 = vpop.eup %1631  ;;  %1637 = vrcp.f32 %v967_v47  ;;  %v895_v32 = vsel %vm894_vm6, %v2712_v2, %v893_v30  ;;  %v1081_v18 = vpack.c.bf16 %v1060_v59, %v1059_v55  ;;  %v1020_v37 = vmul.f32 %v1628_v54, %v2286_v60 }
 0x277   :  { %v898_v14 = vsel %vm896_vm7, %v897_v57, %v895_v32  ;;  %v1061_v46 = vadd.f32 %v2557_v12, %v1014_v29  ;;  %v1062_v41 = vadd.f32 %v2557_v12, %v1016_v63  ;;  %v1022_v31 = vmul.f32 %v1630_v45, %v2290_v27  ;;  %v1641_v27 = vld [vmem:[%s2988_s3] ss:$0 sm:$0xff] }
 0x278   :  { %v968_v5 = vadd.f32 1e-06, %v898_v14  ;;  %v1063_v0 = vadd.f32 %v2557_v12, %v1018_v58  ;;  %v1064_v10 = vadd.f32 %v2557_v12, %v1020_v37  ;;  %v1024_v34 = vmul.f32 %v1632_v28, %v2295_v35  ;;  %v3001_v35 = vld [vmem:[#allocation3_spill] sm:$0xff] }
 0x279   :  { %v1082_v36 = vpack.c.bf16 %v1062_v41, %v1061_v46  ;;  %v1065_v2 = vadd.f32 %v2557_v12, %v1022_v31  ;;  %v933_v20 = vmul.f32 %v1641_v27, %v3000_v50  ;;  %v934_v22 = vmul.f32 %v1641_v27, %v3001_v35 }
 0x27a   :  { %v1634_v17 = vpop.eup %1633  ;;  %1639 = vrcp.f32 %v968_v5  ;;  %1492 = vmatmul.mubr.msk.bf16.gmra.mrb[16].mxu1 %vm321_vm3, %v1080_v3  ;;  %v1083_v60 = vpack.c.bf16 %v1064_v10, %v1063_v0  ;;  %v1066_v19 = vadd.f32 %v2557_v12, %v1024_v34 }
 0x27b   :  { %1495 = vmatprep.mubr.msk.bf16.mxu1 %vm321_vm3, %v1081_v18  ;;  %v1026_v16 = vmul.f32 %v1634_v17, %v933_v20 }
 0x27c   :  { %v1084_v48 = vpack.c.bf16 %v1066_v19, %v1065_v2 }
 0x27d   :  { %v1067_v33 = vadd.f32 %v2557_v12, %v1026_v16 }
 0x27f   :  { %v1636_v62 = vpop.eup %1635 }
 0x280   :  { %v1638_v26 = vpop.eup %1637  ;;  %v1028_v21 = vmul.f32 %v1636_v62, %v934_v22 }
 0x281   :  { %v1030_v15 = vmul.f32 %v1638_v26, %v3002_v1 }
 0x282   :  { %1496 = vmatmul.mubr.msk.bf16.gmra.mrb[20].mxu1 %vm321_vm3, %v1082_v36  ;;  %v1068_v51 = vadd.f32 %v2557_v12, %v1028_v21 }
 0x283   :  { %1499 = vmatprep.mubr.msk.bf16.mxu1 %vm321_vm3, %v1083_v60  ;;  %v1069_v56 = vadd.f32 %v2557_v12, %v1030_v15 }
 0x284   :  { %v1640_v49 = vpop.eup %1639  ;;  %v1085_v39 = vpack.c.bf16 %v1068_v51, %v1067_v33 }
 0x285   :  { %v1032_v61 = vmul.f32 %v1640_v49, %v3003_v7 }
 0x287   :  { %v1070_v4 = vadd.f32 %v2557_v12, %v1032_v61 }
 0x289   :  { %v1086_v11 = vpack.c.bf16 %v1070_v4, %v1069_v56 }
 0x28a   :  { %1500 = vmatmul.mubr.msk.bf16.gmra.mrb[24].mxu1 %vm321_vm3, %v1084_v48 }
 0x28b   :  { %1503 = vmatprep.mubr.msk.bf16.mxu1 %vm321_vm3, %v1085_v39 }
 0x292   :  { %1504 = vmatmul.mubr.msk.bf16.gmra.mrb[28].mxu1 %vm321_vm3, %v1086_v11 }
 0x324   :  { %v1477_v24 = vpop.f32.mrb[0].mxu1 }
 0x325   :  { %v1201_v53 = vadd.f32 %v1477_v24, %v2823_v13  ;;  %v1192_v52 = vpop.f32.mrb[1].mxu1 }
 0x326   :  { %v1193_v23 = vadd.f32 %v2823_v13, %v1192_v52  ;;  %v1478_v38 = vpop.f32.mrb[2].mxu1 }
 0x327   :  { %1321 = vst.msk [vmem:[%s2992_s7 + $0x10] sm:$0xff] %vm321_vm3, %v1201_v53  ;;  %v1204_v12 = vadd.f32 %v1478_v38, %v2823_v13  ;;  %v1195_v6 = vpop.f32.mrb[3].mxu1 }
 0x328   :  { %1319 = vst.msk [vmem:[%s2992_s7] sm:$0xff] %vm321_vm3, %v1193_v23  ;;  %v1196_v42 = vadd.f32 %v2823_v13, %v1195_v6 }
 0x329   :  { %1322 = vst.msk [vmem:[%s2992_s7 + $0x18] sm:$0xff] %vm321_vm3, %v1204_v12 }
 0x32a   :  { %1320 = vst.msk [vmem:[%s2992_s7 + $0x8] sm:$0xff] %vm321_vm3, %v1196_v42 }
 0x32e   :  { %v1481_v44 = vpop.f32.mrb[4].mxu1 }
 0x32f   :  { %v1217_v8 = vadd.f32 %v1481_v44, %v2823_v13  ;;  %v1208_v25 = vpop.f32.mrb[5].mxu1 }
 0x330   :  { %v1209_v40 = vadd.f32 %v2823_v13, %v1208_v25  ;;  %v1482_v43 = vpop.f32.mrb[6].mxu1 }
 0x331   :  { %1325 = vst.msk [vmem:[%s2992_s7 + $0x30] sm:$0xff] %vm321_vm3, %v1217_v8  ;;  %v1220_v9 = vadd.f32 %v1482_v43, %v2823_v13  ;;  %v1211_v55 = vpop.f32.mrb[7].mxu1 }
 0x332   :  { %1323 = vst.msk [vmem:[%s2992_s7 + $0x20] sm:$0xff] %vm321_vm3, %v1209_v40  ;;  %v1212_v29 = vadd.f32 %v2823_v13, %v1211_v55 }
 0x333   :  { %1326 = vst.msk [vmem:[%s2992_s7 + $0x38] sm:$0xff] %vm321_vm3, %v1220_v9 }
 0x334   :  { %1324 = vst.msk [vmem:[%s2992_s7 + $0x28] sm:$0xff] %vm321_vm3, %v1212_v29 }
 0x33d   :  { %v1485_v54 = vpop.f32.mrb[8].mxu1 }
 0x33e   :  { %v1233_v47 = vadd.f32 %v1485_v54, %v2823_v13  ;;  %v1224_v30 = vpop.f32.mrb[9].mxu1 }
 0x33f   :  { %v1225_v3 = vadd.f32 %v2823_v13, %v1224_v30  ;;  %v1486_v59 = vpop.f32.mrb[10].mxu1 }
 0x340   :  { %1329 = vst.msk [vmem:[%s2992_s7 + $0x50] sm:$0xff] %vm321_vm3, %v1233_v47  ;;  %v1236_v45 = vadd.f32 %v1486_v59, %v2823_v13  ;;  %v1227_v57 = vpop.f32.mrb[11].mxu1 }
 0x341   :  { %1327 = vst.msk [vmem:[%s2992_s7 + $0x40] sm:$0xff] %vm321_vm3, %v1225_v3  ;;  %v1228_v63 = vadd.f32 %v2823_v13, %v1227_v57 }
 0x342   :  { %1330 = vst.msk [vmem:[%s2992_s7 + $0x58] sm:$0xff] %vm321_vm3, %v1236_v45 }
 0x343   :  { %1328 = vst.msk [vmem:[%s2992_s7 + $0x48] sm:$0xff] %vm321_vm3, %v1228_v63 }
 0x345   :  { %v1489_v58 = vpop.f32.mrb[12].mxu1 }
 0x346   :  { %v1249_v28 = vadd.f32 %v1489_v58, %v2823_v13  ;;  %v1240_v32 = vpop.f32.mrb[13].mxu1 }
 0x347   :  { %v1241_v18 = vadd.f32 %v2823_v13, %v1240_v32  ;;  %v1490_v37 = vpop.f32.mrb[14].mxu1 }
 0x348   :  { %1333 = vst.msk [vmem:[%s2992_s7 + $0x70] sm:$0xff] %vm321_vm3, %v1249_v28  ;;  %v1252_v14 = vadd.f32 %v1490_v37, %v2823_v13  ;;  %v1243_v46 = vpop.f32.mrb[15].mxu1 }
 0x349   :  { %1331 = vst.msk [vmem:[%s2992_s7 + $0x60] sm:$0xff] %vm321_vm3, %v1241_v18  ;;  %v1244_v41 = vadd.f32 %v2823_v13, %v1243_v46 }
 0x34a   :  { %1334 = vst.msk [vmem:[%s2992_s7 + $0x78] sm:$0xff] %vm321_vm3, %v1252_v14 }
 0x34b   :  { %1332 = vst.msk [vmem:[%s2992_s7 + $0x68] sm:$0xff] %vm321_vm3, %v1244_v41 }
 0x34d   :  { %v1493_v31 = vpop.f32.mrb[16].mxu1 }
 0x34e   :  { %v1265_v5 = vadd.f32 %v1493_v31, %v2823_v13  ;;  %v1256_v0 = vpop.f32.mrb[17].mxu1 }
 0x34f   :  { %v1257_v10 = vadd.f32 %v2823_v13, %v1256_v0  ;;  %v1494_v34 = vpop.f32.mrb[18].mxu1 }
 0x350   :  { %1337 = vst.msk [vmem:[%s2992_s7 + $0x90] sm:$0xff] %vm321_vm3, %v1265_v5  ;;  %v1268_v36 = vadd.f32 %v1494_v34, %v2823_v13  ;;  %v1259_v17 = vpop.f32.mrb[19].mxu1 }
 0x351   :  { %1335 = vst.msk [vmem:[%s2992_s7 + $0x80] sm:$0xff] %vm321_vm3, %v1257_v10  ;;  %v1260_v60 = vadd.f32 %v2823_v13, %v1259_v17 }
 0x352   :  { %1338 = vst.msk [vmem:[%s2992_s7 + $0x98] sm:$0xff] %vm321_vm3, %v1268_v36 }
 0x353   :  { %1336 = vst.msk [vmem:[%s2992_s7 + $0x88] sm:$0xff] %vm321_vm3, %v1260_v60 }
 0x355   :  { %v1497_v2 = vpop.f32.mrb[20].mxu1 }
 0x356   :  { %v1281_v19 = vadd.f32 %v1497_v2, %v2823_v13  ;;  %v1272_v27 = vpop.f32.mrb[21].mxu1 }
 0x357   :  { %v1273_v50 = vadd.f32 %v2823_v13, %v1272_v27  ;;  %v1498_v20 = vpop.f32.mrb[22].mxu1 }
 0x358   :  { %1341 = vst.msk [vmem:[%s2992_s7 + $0xb0] sm:$0xff] %vm321_vm3, %v1281_v19  ;;  %v1284_v48 = vadd.f32 %v1498_v20, %v2823_v13  ;;  %v1275_v35 = vpop.f32.mrb[23].mxu1 }
 0x359   :  { %1339 = vst.msk [vmem:[%s2992_s7 + $0xa0] sm:$0xff] %vm321_vm3, %v1273_v50  ;;  %v1276_v22 = vadd.f32 %v2823_v13, %v1275_v35 }
 0x35a   :  { %1342 = vst.msk [vmem:[%s2992_s7 + $0xb8] sm:$0xff] %vm321_vm3, %v1284_v48 }
 0x35b   :  { %1340 = vst.msk [vmem:[%s2992_s7 + $0xa8] sm:$0xff] %vm321_vm3, %v1276_v22 }
 0x35d   :  { %v1501_v16 = vpop.f32.mrb[24].mxu1 }
 0x35e   :  { %v1297_v62 = vadd.f32 %v1501_v16, %v2823_v13  ;;  %v1288_v26 = vpop.f32.mrb[25].mxu1 }
 0x35f   :  { %v1289_v21 = vadd.f32 %v2823_v13, %v1288_v26  ;;  %v1502_v1 = vpop.f32.mrb[26].mxu1 }
 0x360   :  { %1345 = vst.msk [vmem:[%s2992_s7 + $0xd0] sm:$0xff] %vm321_vm3, %v1297_v62  ;;  %v1300_v15 = vadd.f32 %v1502_v1, %v2823_v13  ;;  %v1291_v33 = vpop.f32.mrb[27].mxu1 }
 0x361   :  { %1343 = vst.msk [vmem:[%s2992_s7 + $0xc0] sm:$0xff] %vm321_vm3, %v1289_v21  ;;  %v1292_v51 = vadd.f32 %v2823_v13, %v1291_v33 }
 0x362   :  { %1346 = vst.msk [vmem:[%s2992_s7 + $0xd8] sm:$0xff] %vm321_vm3, %v1300_v15 }
 0x363   :  { %1344 = vst.msk [vmem:[%s2992_s7 + $0xc8] sm:$0xff] %vm321_vm3, %v1292_v51 }
 0x365   :  { %v1505_v56 = vpop.f32.mrb[28].mxu1 }
 0x366   :  { %v1313_v49 = vadd.f32 %v1505_v56, %v2823_v13  ;;  %v1304_v39 = vpop.f32.mrb[29].mxu1 }
 0x367   :  { %v1305_v7 = vadd.f32 %v2823_v13, %v1304_v39  ;;  %v1506_v61 = vpop.f32.mrb[30].mxu1 }
 0x368   :  { %1349 = vst.msk [vmem:[%s2992_s7 + $0xf0] sm:$0xff] %vm321_vm3, %v1313_v49  ;;  %v1316_v4 = vadd.f32 %v1506_v61, %v2823_v13  ;;  %v1307_v11 = vpop.f32.mrb[31].mxu1 }
 0x369   :  { %1347 = vst.msk [vmem:[%s2992_s7 + $0xe0] sm:$0xff] %vm321_vm3, %v1305_v7  ;;  %v1308_v24 = vadd.f32 %v2823_v13, %v1307_v11 }
 0x36a   :  { %1350 = vst.msk [vmem:[%s2992_s7 + $0xf8] sm:$0xff] %vm321_vm3, %v1316_v4 }
 0x36b   :  { %1348 = vst.msk [vmem:[%s2992_s7 + $0xe8] sm:$0xff] %vm321_vm3, %v1308_v24 }

// kernel: _lambda_.15
= control target key start
LH: loop header
LB: loop body
LE: loop exit
PB: predicated region body
PF: predicated region fallthrough
CT: control target
= control target key end

     0   :  { %vm47_vm0 = vcmask 1041408   ;;  %vm40_vm1 = vcmask 162816   ;;  %vm100_vm2 = vcmask 261120   ;;  %s182_s1 = inlined_call_operand.vmem [shape: bf16[20,32], index: 1, kind: input, shape index: {}]   ;;  %s183_s0 = inlined_call_operand.vmem [shape: f32[32,20], index: 0, kind: input, shape index: {}]   ;;  %s184_s2 = inlined_call_operand.vmem [shape: f32[1,32], index: 2, kind: input, shape index: {}]   ;;  %s185_s3 = inlined_call_operand.vmem [shape: f32[32,32], index: 3, kind: output, shape index: {}]  }
   0x1   :  { %v127_v0 = vld [vmem:[%s182_s1] sm:$0xff]   ;;  %v128_v1 = vld [vmem:[%s182_s1 + $0x8] ss:$0 sps:$4 sm:$0x33]   ;;  %v17_v5 = vld [vmem:[%s183_s0 + $0x10] sm:$0xff] }
   0x2   :  { %v15_v2 = vld [vmem:[%s183_s0] sm:$0xff]  ;;  %v16_v3 = vld [vmem:[%s183_s0 + $0x8] sm:$0xff]  ;;  %118 = vmatprep.subr.bf16.mxu0 %v127_v0  ;;  %v18_v6 = vld [vmem:[%s183_s0 + $0x18] sm:$0xff]  ;;  %v49_v7 = vsel %vm47_vm0, %v128_v1, 0 }
   0x3   :  { %v19_v4 = vpack.c.bf16 %v16_v3, %v15_v2  ;;  %119 = vmatpush3.bf16.msra.mxu0 %v127_v0  ;;  %v20_v8 = vpack.c.bf16 %v18_v6, %v17_v5  ;;  %v109_v9 = vld [vmem:[%s184_s2] ss:$0 sm:$0xff] }
   0x4   :  { %126 = vmatprep.subr.msk.bf16.mxu0 %vm47_vm0, %v128_v1 }
   0x5   :  { %122 = vmatprep.mubr.msk.bf16.mxu0 %vm40_vm1, %v19_v4 }
   0x7   :  { %121 = vmatpush3.bf16.msra.mxu0 %v49_v7 }
   0xa   :  { %123 = vmatmul.mubr.msk.bf16.vlgmr.msra.gmra.mrb[0].mxu0 %vm40_vm1, %v20_v8 }
  0xdd   :  { %v124_v10 = vpop.f32.mrb[0].mxu0 }
  0xde   :  { %v94_v11 = vadd.f32 %v124_v10, %v109_v9  ;;  %v85_v12 = vpop.f32.mrb[1].mxu0 }
  0xdf   :  { %v86_v13 = vadd.f32 %v109_v9, %v85_v12  ;;  %v125_v14 = vpop.f32.mrb[2].mxu0 }
  0xe0   :  { %103 = vst.msk [vmem:[%s185_s3 + $0x10] sm:$0xff] %vm100_vm2, %v94_v11  ;;  %v97_v15 = vadd.f32 %v125_v14, %v109_v9  ;;  %v88_v16 = vpop.f32.mrb[3].mxu0 }
  0xe1   :  { %101 = vst.msk [vmem:[%s185_s3] sm:$0xff] %vm100_vm2, %v86_v13  ;;  %v89_v17 = vadd.f32 %v109_v9, %v88_v16 }
  0xe2   :  { %104 = vst.msk [vmem:[%s185_s3 + $0x18] sm:$0xff] %vm100_vm2, %v97_v15 }
  0xe3   :  { %102 = vst.msk [vmem:[%s185_s3 + $0x8] sm:$0xff] %vm100_vm2, %v89_v17 }

// kernel: _lambda_.12
= control target key start
LH: loop header
LB: loop body
LE: loop exit
PB: predicated region body
PF: predicated region fallthrough
CT: control target
= control target key end

     0   :  { %s2944_s21 = smov 0   ;;  %s2948_s6 = smov 0   ;;  %s3291_s0 = inlined_call_operand.vmem [shape: f32[2,16,32], index: 0, kind: input, shape index: {}]   ;;  %s3292_s1 = inlined_call_operand.vmem [shape: bf16[2,128,32], index: 1, kind: input, shape index: {}]   ;;  %s3293_s2 = inlined_call_operand.vmem [shape: s32[2,16,8,1], index: 2, kind: input, shape index: {}]   ;;  %s3294_s3 = inlined_call_operand.vmem [shape: bf16[2,16,32], index: 3, kind: input, shape index: {}]   ;;  %s3295_s4 = inlined_call_operand.vmem [shape: f32[2,16,1], index: 4, kind: input, shape index: {}]   ;;  %s3296_s5 = inlined_call_operand.vmem [shape: f32[2,16,8,1], index: 5, kind: input, shape index: {}]   ;;  %s3297_s6 = inlined_call_operand.vmem [shape: f32[2,16,8,1], index: 6, kind: input, shape index: {}]   ;;  %s3298_s7 = inlined_call_operand.vmem [shape: bf16[32,32], index: 7, kind: input, shape index: {}]   ;;  %s3299_s8 = inlined_call_operand.vmem [shape: bf16[32,32], index: 8, kind: input, shape index: {}]   ;;  %s3300_s9 = inlined_call_operand.vmem [shape: bf16[32,64], index: 9, kind: input, shape index: {}]   ;;  %s3301_s10 = inlined_call_operand.vmem [shape: bf16[32,64], index: 10, kind: input, shape index: {}]   ;;  %s3302_s11 = inlined_call_operand.vmem [shape: bf16[32,32], index: 11, kind: input, shape index: {}]   ;;  %s3303_s12 = inlined_call_operand.vmem [shape: f32[1,32], index: 12, kind: input, shape index: {}]   ;;  %s3304_s13 = inlined_call_operand.vmem [shape: f32[1,32], index: 13, kind: input, shape index: {}]   ;;  %s3305_s14 = inlined_call_operand.vmem [shape: f32[1,32], index: 14, kind: input, shape index: {}]   ;;  %s3306_s15 = inlined_call_operand.vmem [shape: f32[1,32], index: 15, kind: input, shape index: {}]   ;;  %s3307_s16 = inlined_call_operand.vmem [shape: bf16[32,128], index: 16, kind: input, shape index: {}]   ;;  %s3308_s17 = inlined_call_operand.vmem [shape: f32[1,128], index: 17, kind: input, shape index: {}]   ;;  %s3309_s18 = inlined_call_operand.vmem [shape: bf16[128,32], index: 18, kind: input, shape index: {}]   ;;  %s3310_s19 = inlined_call_operand.vmem [shape: f32[1,32], index: 19, kind: input, shape index: {}]   ;;  %s3311_s20 = inlined_call_operand.vmem [shape: f32[2,16,32], index: 20, kind: output, shape index: {}]  }
   0x1   :  { %3313 = sst [smem:[#allocation5_spill]] %s3291_s0  ;;  %s2950_s22 = smov 0  }
   0x2   :  { %3314 = sst [smem:[#allocation6_spill]] %s3292_s1  ;;  %s2946_s1 = smov 0  }
   0x3   :  { %3315 = sst [smem:[#allocation7_spill]] %s3293_s2  ;;  %s2952_s23 = smov 0  }
   0x4   :  { %3316 = sst [smem:[#allocation8_spill]] %s3294_s3 }
   0x5   :  { %3317 = sst [smem:[#allocation9_spill]] %s3295_s4 }
   0x6   :  { %3318 = sst [smem:[#allocation10_spill]] %s3296_s5 }
   0x7 LB: > { %3319 = sst [smem:[#allocation2_spill]] %s2828_s22  ;;  %s39_s2 = sadd.s32 1, %s2824_s6  ;;  %s2832_s23 = sphi %s2952_s23, %s30_s23   ;;  %s2828_s22 = sphi %s2950_s22, %s3330_s22   ;;  %s2824_s6 = sphi %s2948_s6, %s3332_s6   ;;  %s2820_s1 = sphi %s2946_s1, %s3328_s1   ;;  %s2816_s21 = sphi %s2944_s21, %s3331_s21  }
   0x8   : > { %s42_s24 = sadd.s32 1, %s2828_s22  ;;  %p40_p0 = scmp.ge.s32.totalorder %s39_s2, 2 }
   0x9   : > { %p2436_p1 = scmp.ge.s32.totalorder %s2832_s23, 1  ;;  %p674_p2 = scmp.lt.s32.totalorder %s2832_s23, 5 }
   0xa   : > { %s3334_s2 = smov (%p40_p0, %s39_s2), 0  ;;  %s3336_s24 = smov (!%p40_p0, %s42_s24), %s2828_s22 }
   0xb   : > { %3320 = sst [smem:[#allocation3_spill]] %s3334_s2  ;;  %p675_p3 = pnand %p2436_p1, %p674_p2 }
   0xc   : > { %p44_p4 = scmp.ge.s32.totalorder %s3336_s24, 2  ;;  %p787_p5 = scmp.lt.s32.totalorder (!%p675_p3), %s2820_s1, 1  ;;  %v2834_v0 = vmov (!%p675_p3), 0   ;;  %v2835_v16 = vmov (!%p675_p3), 0.0   ;;  %v2730_v27 = vld [vmem:[%s3301_s10] sm:$0xff] (!%p675_p3)   ;;  %v874_v28 = vlaneseq (!%p675_p3)  ;;  %vm960_vm12 = vcmask (!%p675_p3), 130048  }
   0xd   : > { %678 = sbr.rel (%p675_p3) target bundleno = 2240 (0x8c0), region = 100  ;;  %s2439_s3 = sshll.u32 (!%p675_p3), %s2816_s21, 3  ;;  %2708 = vset.pattern.permute.xlu1 (!%p675_p3), %v2834_v0  ;;  %2707 = vset.pattern.permute.xlu0 (!%p675_p3), %v2834_v0  ;;  %v2731_v50 = vld [vmem:[%s3301_s10 + $0x8] sm:$0xff] (!%p675_p3)   ;;  %v2732_v51 = vld [vmem:[%s3299_s8] sm:$0xff] (!%p675_p3)  }
   0xe   : > { %s3338_s24 = smov (%p44_p4, %s3336_s24), 0  ;;  %p798_p6 = scmp.lt.s32.totalorder (!%p675_p3), %s2439_s3, 15  ;;  %2574 = vmatprep.subr.bf16.mxu1 (!%p675_p3), %v2730_v27  ;;  %v875_v29 = vand.u32 (!%p675_p3), 127, %v874_v28  ;;  %v2733_v52 = vld [vmem:[%s3300_s9] sm:$0xff] (!%p675_p3)   ;;  %v2734_v53 = vld [vmem:[%s3299_s8 + $0x8] sm:$0xff] (!%p675_p3)  }
   0xf   : > { %3321 = sst [smem:[#allocation4_spill]] %s3338_s24  ;;  %s3322_s29 = sld [smem:[#allocation7_spill]] (!%p675_p3)  ;;  %2575 = vmatpush3.bf16.msra.mxu1 (!%p675_p3), %v2730_v27  ;;  %v2735_v62 = vld [vmem:[%s3300_s9 + $0x8] sm:$0xff] (!%p675_p3)  }
  0x10   : > { %s3323_s5 = sld [smem:[#allocation10_spill]] (!%p675_p3)  ;;  %2576 = vmatprep.subr.bf16.mxu1 (!%p675_p3), %v2731_v50  ;;  %p789_p7 = scmp.lt.s32.totalorder (!%p675_p3), %s2816_s21, 1 }
  0x13   : > { %2577 = vmatpush3.bf16.msra.mxu1 (!%p675_p3), %v2731_v50 }
  0x14   : > { %s3340_s1 = smov (!%p787_p5, %s2820_s1), 1  ;;  %s3342_s3 = smov (!%p798_p6, %s2439_s3), 15  ;;  %2586 = vmatprep.subr.bf16.mxu1 %v2733_v52 }
  0x15   : > { %s2440_s25 = sshll.u32 %s3340_s1, 4  ;;  %s3344_s21 = smov (!%p789_p7, %s2816_s21), 1 }
  0x16   : > { %s801_s26 = sadd.s32 %s2440_s25, %s3342_s3  ;;  %s2518_s3 = sshll.u32 %s3340_s1, 3 }
  0x17   : > { %s2444_s27 = sshll.u32 %s801_s26, 3  ;;  %s2441_s25 = sshll.u32 %s801_s26, 2 }
  0x18   : > { %s813_s30 = scalar_lea.vmem %s3322_s29, %s2444_s27  ;;  %s2988_s2 = scalar_lea.vmem %s3323_s5, %s2444_s27 }
  0x19   : > { %v868_v1 = vld [vmem:[%s813_s30 + $0x10] sm:$0xff]  ;;  %v866_v2 = vld [vmem:[%s813_s30] sm:$0xff]  ;;  %v869_v3 = vld [vmem:[%s813_s30 + $0x18] sm:$0xff]  ;;  %s3324_s27 = sld [smem:[#allocation8_spill]]  ;;  %s3325_s5 = sld [smem:[#allocation6_spill]] }
  0x1a   : > { %883 = vperm.xlu1 %2708, %v868_v1   ;;  %877 = vperm.xlu0 %2707, %v866_v2   ;;  %v867_v4 = vld [vmem:[%s813_s30 + $0x8] sm:$0xff]  ;;  %v1521_v6 = vld [vmem:[%s2988_s2] sm:$0xff]  ;;  %v1524_v7 = vld [vmem:[%s2988_s2 + $0x18] sm:$0xff] }
  0x1b   : > { %v1522_v5 = vld [vmem:[%s2988_s2 + $0x8] sm:$0xff]  ;;  %vm1529_vm1 = vcmp.gt.f32.partialorder %v1521_v6, 0.0  ;;  %v1523_v8 = vld [vmem:[%s2988_s2 + $0x10] sm:$0xff]  ;;  %v870_v10 = vld [vmem:[%s813_s30 + $0x20] sm:$0xff]  ;;  %vm1532_vm2 = vcmp.gt.f32.partialorder %v1524_v7, 0.0 }
  0x1c   : > { %vm1530_vm0 = vcmp.gt.f32.partialorder %v1522_v5, 0.0  ;;  %v871_v9 = vld [vmem:[%s813_s30 + $0x28] sm:$0xff]  ;;  %v873_v13 = vld [vmem:[%s813_s30 + $0x38] sm:$0xff]  ;;  %v872_v14 = vld [vmem:[%s813_s30 + $0x30] sm:$0xff]  ;;  %v1537_v15 = vsel %vm1529_vm1, 1, %v2834_v0  ;;  %vm1531_vm3 = vcmp.gt.f32.partialorder %v1523_v8, 0.0 }
  0x1d   : > { %v1538_v11 = vsel %vm1530_vm0, 1, %v2834_v0  ;;  %v1526_v17 = vld [vmem:[%s2988_s2 + $0x28] sm:$0xff]  ;;  %v1525_v18 = vld [vmem:[%s2988_s2 + $0x20] sm:$0xff]  ;;  %v1540_v19 = vsel %vm1532_vm2, 1, %v2834_v0  ;;  %v1539_v20 = vsel %vm1531_vm3, 1, %v2834_v0  ;;  %v1528_v21 = vld [vmem:[%s2988_s2 + $0x38] sm:$0xff] }
  0x1e   : > { %886 = vperm.xlu1 %2708, %v869_v3   ;;  %880 = vperm.xlu0 %2707, %v867_v4   ;;  %vm1534_vm4 = vcmp.gt.f32.partialorder %v1526_v17, 0.0  ;;  %vm1533_vm5 = vcmp.gt.f32.partialorder %v1525_v18, 0.0  ;;  %v1527_v22 = vld [vmem:[%s2988_s2 + $0x30] sm:$0xff]  ;;  %vm1536_vm6 = vcmp.gt.f32.partialorder %v1528_v21, 0.0  ;;  %s3326_s30 = sld [smem:[#allocation5_spill]]  ;;  %vm1062_vm1 = vcmask 261120  }
  0x1f   : > { %s819_s28 = scalar_lea.vmem %s3324_s27, %s2518_s3  ;;  %s3001_s22 = scalar_lea.vmem %s3325_s5, %s2441_s25  ;;  %v1542_v23 = vsel %vm1534_vm4, 1, %v2834_v0  ;;  %v1541_v24 = vsel %vm1533_vm5, 1, %v2834_v0  ;;  %vm1535_vm7 = vcmp.gt.f32.partialorder %v1527_v22, 0.0  ;;  %v1544_v25 = vsel %vm1536_vm6, 1, %v2834_v0 }
  0x20   : > { %v2729_v12 = vld [vmem:[%s819_s28] sm:$0xff]   ;;  %v1543_v26 = vsel %vm1535_vm7, 1, %v2834_v0  ;;  %s2437_s27 = sshll.u32 %s3340_s1, 1  ;;  %vm2836_vm2 = vmmov 0  }
  0x21   : > { %2564 = vmatprep.subr.bf16.mxu0 %v2729_v12  ;;  %s792_s28 = sadd.s32 %s2437_s27, %s3344_s21 }
  0x22   : > { %892 = vperm.xlu1 %2708, %v871_v9   ;;  %889 = vperm.xlu0 %2707, %v870_v10   ;;  %s3049_s5 = sshll.u32 %s792_s28, 3 }
  0x23   : > { %2565 = vmatpush3.bf16.msra.mxu0 %v2729_v12  ;;  %s855_s28 = scalar_lea.vmem %s3311_s20, %s3049_s5 }
  0x24   : > { %2598 = vmatprep.subr.bf16.mxu0 %v2835_v16  ;;  %s794_s3 = scalar_lea.vmem %s3326_s30, %s3049_s5 }
  0x25   : > { %v3055_v54 = vld [vmem:[%s794_s3] sm:$0xff]  ;;  %s3327_s3 = sld [smem:[#allocation9_spill]] }
  0x26   : > { %898 = vperm.xlu1 %2708, %v873_v13   ;;  %895 = vperm.xlu0 %2707, %v872_v14   ;;  %v1257_v55 = vpack.c.bf16 %v3055_v54, %v3055_v54  ;;  %v2740_v13 = vld [vmem:[%s3298_s7] sm:$0xff]   ;;  %v2741_v14 = vld [vmem:[%s3298_s7 + $0x8] sm:$0xff]  }
  0x2a   : > { %1549 = vperm.xlu1 %2708, %v1538_v11   ;;  %1546 = vperm.xlu0 %2707, %v1537_v15   ;;  %v2837_v15 = vmov 1966171168  }
  0x2b   : > { %s827_s21 = scalar_lea.vmem %s3327_s3, %s3049_s5 }
  0x2e   : > { %1555 = vperm.xlu1 %2708, %v1540_v19   ;;  %1552 = vperm.xlu0 %2707, %v1539_v20   ;;  %v1324_v19 = vshrl.u32 %v874_v28, 7 }
  0x32   : > { %1561 = vperm.xlu1 %2708, %v1542_v23   ;;  %1558 = vperm.xlu0 %2707, %v1541_v24  }
  0x36   : > { %1567 = vperm.xlu1 %2708, %v1544_v25   ;;  %1564 = vperm.xlu0 %2707, %v1543_v26  }
  0x3a   : > { %1744 = vperm.xlu1 %2708, %v1522_v5   ;;  %1739 = vperm.xlu0 %2707, %v1521_v6   ;;  %v2736_v5 = vld [vmem:[%s3001_s22] sm:$0xff]   ;;  %v2737_v6 = vld [vmem:[%s3001_s22 + $0x8] sm:$0xff]  }
  0x3e   : > { %1754 = vperm.xlu1 %2708, %v1524_v7   ;;  %1749 = vperm.xlu0 %2707, %v1523_v8   ;;  %v2738_v7 = vld [vmem:[%s3001_s22 + $0x10] sm:$0xff]   ;;  %v2739_v8 = vld [vmem:[%s3001_s22 + $0x18] sm:$0xff]   ;;  %s2838_s22 = smov 96  }
  0x42   : > { %1764 = vperm.xlu1 %2708, %v1526_v17   ;;  %1759 = vperm.xlu0 %2707, %v1525_v18   ;;  %v1321_v17 = vunpack.c.l.s4 %v2837_v15 }
  0x44   : > { %v1322_v18 = vunpack.c.0.s8 %v1321_v17 }
  0x46   : > { %1774 = vperm.xlu1 %2708, %v1528_v21   ;;  %1769 = vperm.xlu0 %2707, %v1527_v22   ;;  %v1325_v21 = vsub.s32 %v1322_v18, %v1324_v19 }
  0x99   : > { %v884_v30 = vpop.permute.xlu1 %883  ;;  %v878_v31 = vpop.permute.xlu0 %877 }
  0x9a   : > { %vm902_vm8 = vcmp.eq.s32.totalorder %v884_v30, %v875_v29  ;;  %vm900_vm9 = vcmp.eq.s32.totalorder %v878_v31, %v875_v29  ;;  %v1378_v30 = vsub.s32 0, %v1324_v19 }
  0x9b   : > { %v2456_v34 = vsel %vm902_vm8, 1.0, %v2835_v16  ;;  %v2454_v35 = vsel %vm900_vm9, 1.0, %v2835_v16 }
  0x9d   : > { %v887_v32 = vpop.permute.xlu1 %886  ;;  %v881_v33 = vpop.permute.xlu0 %880 }
  0x9e   : > { %vm903_vm10 = vcmp.eq.s32.totalorder %v887_v32, %v875_v29  ;;  %vm901_vm11 = vcmp.eq.s32.totalorder %v881_v33, %v875_v29 }
  0x9f   : > { %v2457_v36 = vsel %vm903_vm10, 1.0, %v2835_v16  ;;  %v2455_v37 = vsel %vm901_vm11, 1.0, %v2835_v16  ;;  %vm1909_vm11 = vcmask 1041409  }
  0xa0   : > { %v2520_v38 = vpack.c.bf16 %v2457_v36, %v2456_v34  ;;  %v2519_v39 = vpack.c.bf16 %v2455_v37, %v2454_v35 }
  0xa1   : > { %v893_v40 = vpop.permute.xlu1 %892  ;;  %v890_v41 = vpop.permute.xlu0 %889 }
  0xa2   : > { %vm905_vm13 = vcmp.eq.s32.totalorder %v893_v40, %v875_v29  ;;  %vm904_vm14 = vcmp.eq.s32.totalorder %v890_v41, %v875_v29  ;;  %2566 = vmatprep.mubr.msk.bf16.mxu0 %vm960_vm12, %v2519_v39 }
  0xa3   : > { %v2459_v42 = vsel %vm905_vm13, 1.0, %v2835_v16  ;;  %v2458_v43 = vsel %vm904_vm14, 1.0, %v2835_v16  ;;  %2567 = vmatmul.mubr.msk.bf16.vlgmr.msra.gmra.mrb[0].mxu0 %vm960_vm12, %v2520_v38  ;;  %vm1913_vm13 = vcmask 1043459   ;;  %vm1915_vm14 = vcmask 1044484  }
  0xa4   : > { %v2521_v44 = vpack.c.bf16 %v2459_v42, %v2458_v43  ;;  %2599 = vmatpush3.bf16.msra.mxu0 %v2732_v51 }
  0xa5   : > { %v899_v45 = vpop.permute.xlu1 %898  ;;  %v896_v46 = vpop.permute.xlu0 %895  ;;  %2600 = vmatprep.subr.bf16.mxu0 %v2835_v16 }
  0xa6   : > { %vm907_vm15 = vcmp.eq.s32.totalorder %v899_v45, %v875_v29  ;;  %vm906_vm0 = vcmp.eq.s32.totalorder %v896_v46, %v875_v29  ;;  %2570 = vmatprep.mubr.msk.bf16.mxu0 %vm960_vm12, %v2521_v44 }
  0xa7   : > { %v2461_v47 = vsel %vm907_vm15, 1.0, %v2835_v16  ;;  %v2460_v48 = vsel %vm906_vm0, 1.0, %v2835_v16  ;;  %vm1917_vm15 = vcmask 1045509   ;;  %vm1919_vm0 = vcmask 1046534  }
  0xa8   : > { %v2522_v49 = vpack.c.bf16 %v2461_v47, %v2460_v48  ;;  %2601 = vmatpush3.bf16.msra.mxu0 %v2734_v53 }
  0xa9   : > { %2606 = vmatprep.subr.bf16.mxu0 %v2740_v13 }
  0xab   : > { %2571 = vmatmul.mubr.msk.bf16.gmra.mrb[4].mxu0 %vm960_vm12, %v2522_v49  ;;  %vm1911_vm12 = vcmask 1042434  }
  0xac   : > { %2602 = vmatprep.mubr.msk.bf16.mxu0 %vm2836_vm2, %v2835_v16 }
  0xb3   : > { %2603 = vmatmul.mubr.msk.bf16.vlgmr.msra.gmra.mrb[8].mxu0 %vm1062_vm1, %v1257_v55 }
  0xb4   : > { %2607 = vmatpush3.bf16.msra.mxu0 %v2740_v13 }
  0xb5   : > { %2608 = vmatprep.subr.bf16.mxu0 %v2741_v14 }
  0xb8   : > { %2609 = vmatpush3.bf16.msra.mxu0 %v2741_v14 }
  0xb9   : > { %2618 = vmatprep.subr.bf16.mxu0 %v2835_v16 }
 0x176   : > { %v2568_v56 = vpop.f32.mrb[0].mxu0 }
 0x177   : > { %v1007_v57 = vpop.f32.mrb[1].mxu0 }
 0x178   : > { %v2569_v58 = vpop.f32.mrb[2].mxu0 }
 0x179   : > { %v1043_v59 = vpack.c.bf16 %v2569_v58, %v2568_v56  ;;  %v1010_v60 = vpop.f32.mrb[3].mxu0 }
 0x17a   : > { %v1042_v61 = vpack.c.bf16 %v1010_v60, %v1007_v57 }
 0x17c   : > { %2578 = vmatprep.mubr.msk.bf16.mxu1 %vm1062_vm1, %v1042_v61 }
 0x17d   : > { %2579 = vmatmul.mubr.msk.bf16.vlgmr.msra.gmra.mrb[0].mxu1 %vm1062_vm1, %v1043_v59 }
 0x17e   : > { %2587 = vmatpush3.bf16.msra.mxu1 %v2733_v52  ;;  %v2572_v63 = vpop.f32.mrb[4].mxu0 }
 0x17f   : > { %v1023_v0 = vpop.f32.mrb[5].mxu0  ;;  %2588 = vmatprep.subr.bf16.mxu1 %v2735_v62 }
 0x180   : > { %v2573_v1 = vpop.f32.mrb[6].mxu0 }
 0x181   : > { %v1045_v2 = vpack.c.bf16 %v2573_v1, %v2572_v63  ;;  %v1026_v3 = vpop.f32.mrb[7].mxu0 }
 0x182   : > { %v1044_v4 = vpack.c.bf16 %v1026_v3, %v1023_v0  ;;  %2589 = vmatpush3.bf16.msra.mxu1 %v2735_v62 }
 0x183   : > { %2634 = vmatprep.subr.bf16.mxu1 %v2835_v16 }
 0x184   : > { %2582 = vmatprep.mubr.msk.bf16.mxu1 %vm1062_vm1, %v1044_v4 }
 0x185   : > { %2583 = vmatmul.mubr.msk.bf16.gmra.mrb[4].mxu1 %vm1062_vm1, %v1045_v2 }
 0x186   : > { %2590 = vmatprep.mubr.msk.bf16.mxu1 %vm1062_vm1, %v2736_v5  ;;  %v1311_v9 = vpop.f32.mrb[8].mxu0 }
 0x187   : > { %v2604_v10 = vpop.f32.mrb[9].mxu0  ;;  %v1317_v20 = vmul.f32 0.35355338, %v1311_v9 }
 0x188   : > { %v1314_v11 = vpop.f32.mrb[10].mxu0 }
 0x189   : > { %v2605_v12 = vpop.f32.mrb[11].mxu0  ;;  %v1326_v22 = vrot.slane %v1317_v20, %v1325_v21  ;;  %v1319_v24 = vcombine.high %v1317_v20, %v1317_v20 }
 0x18b   : > { %v1334_v23 = vcombine.high %v1326_v22, %v1326_v22  ;;  %v1342_v25 = vrot.slane %v1326_v22, %v1325_v21  ;;  %v1333_v27 = vrot.slane %v1319_v24, %v1325_v21  ;;  %v2742_v22 = vld [vmem:[%s3302_s11] sm:$0xff]   ;;  %v1547_v24 = vpop.permute.xlu0 %1546 }
 0x18c   : > { %vm1569_vm4 = vcmp.eq.s32.totalorder %v1547_v24, 1 }
 0x18d   : > { %2591 = vmatmul.mubr.msk.bf16.vlgmr.msra.gmra.mrb[0].mxu1 %vm1062_vm1, %v2737_v6  ;;  %v1356_v26 = vrot.slane %v1334_v23, %v1325_v21  ;;  %v1364_v29 = vcombine.high %v1342_v25, %v1342_v25  ;;  %v1335_v33 = vcombine.high %v1333_v27, %v1333_v27  ;;  %v1379_v38 = vrot.slane %v1342_v25, %v1378_v30  ;;  %v2743_v23 = vld [vmem:[%s3302_s11 + $0x8] sm:$0xff]   ;;  %v1550_v25 = vpop.permute.xlu1 %1549 }
 0x18e   : > { %2594 = vmatprep.mubr.msk.bf16.mxu1 %vm1062_vm1, %v2738_v7  ;;  %v1349_v28 = vrot.slane %v1333_v27, %v1325_v21  ;;  %vm1570_vm6 = vcmp.eq.s32.totalorder %v1550_v25, 1 }
 0x18f   : > { %v1366_v31 = vcombine.high %v1356_v26, %v1356_v26  ;;  %v1387_v35 = vrot.slane %v1364_v29, %v1378_v30  ;;  %v1383_v46 = vrot.slane %v1356_v26, %v1378_v30  ;;  %v1363_v47 = vrot.slane %v1335_v33, %v1325_v21  ;;  %v1553_v26 = vpop.permute.xlu0 %1552 }
 0x190   : > { %v1365_v55 = vcombine.high %v1349_v28, %v1349_v28  ;;  %v1395_v7 = vrot.slane %v1349_v28, %v1378_v30  ;;  %vm1571_vm3 = vcmp.eq.s32.totalorder %v1553_v26, 1 }
 0x191   : > { %v1391_v42 = vrot.slane %v1366_v31, %v1378_v30  ;;  %v1367_v62 = vcombine.high %v1363_v47, %v1363_v47  ;;  %v1399_v14 = vrot.slane %v1363_v47, %v1378_v30  ;;  %v1556_v27 = vpop.permute.xlu1 %1555 }
 0x192   : > { %v1403_v3 = vrot.slane %v1365_v55, %v1378_v30  ;;  %vm1572_vm5 = vcmp.eq.s32.totalorder %v1556_v27, 1 }
 0x193   : > { %v1407_v11 = vrot.slane %v1367_v62, %v1378_v30  ;;  %v1559_v29 = vpop.permute.xlu0 %1558 }
 0x194   : > { %vm1573_vm8 = vcmp.eq.s32.totalorder %v1559_v29, 1 }
 0x195   : > { %2595 = vmatmul.mubr.msk.bf16.gmra.mrb[4].mxu1 %vm1062_vm1, %v2739_v8  ;;  %v3102_v30 = vpop.permute.xlu1 %1561 }
 0x196   : > { %2650 = vmatprep.mubr.msk.bf16.mxu1 %vm2836_vm2, %v2835_v16  ;;  %vm1574_vm7 = vcmp.eq.s32.totalorder %v3102_v30, 1 }
 0x199   : > { %v1568_v47 = vpop.permute.xlu1 %1567 }
 0x19a   : > { %vm1576_vm10 = vcmp.eq.s32.totalorder %v1568_v47, 1 }
 0x260   : > { %v2592_v32 = vpop.f32.mrb[0].mxu1 }
 0x261   : > { %v1251_v34 = vpack.c.bf16 %v2592_v32, %v2592_v32  ;;  %v1218_v36 = vpop.f32.mrb[1].mxu1 }
 0x262   : > { %v1249_v37 = vpack.c.bf16 %v1218_v36, %v1218_v36  ;;  %v2593_v39 = vpop.f32.mrb[2].mxu1 }
 0x263   : > { %v1370_v40 = vunpack.c.l.bf16 %v1251_v34  ;;  %v1252_v41 = vpack.c.bf16 %v2593_v39, %v2593_v39  ;;  %v1221_v43 = vpop.f32.mrb[3].mxu1 }
 0x264   : > { %v1368_v44 = vunpack.c.l.bf16 %v1249_v37  ;;  %v1250_v45 = vpack.c.bf16 %v1221_v43, %v1221_v43  ;;  %v1565_v43 = vpop.permute.xlu0 %1564 }
 0x265   : > { %v1418_v48 = vmul.f32 %v1387_v35, %v1370_v40  ;;  %v1371_v49 = vunpack.c.l.bf16 %v1252_v41  ;;  %vm1575_vm9 = vcmp.eq.s32.totalorder %v1565_v43, 1 }
 0x266   : > { %v1416_v50 = vmul.f32 %v1379_v38, %v1368_v44  ;;  %v1369_v51 = vunpack.c.l.bf16 %v1250_v45 }
 0x267   : > { %v2709_v52 = vpack.i.bf16 %v1371_v49, %v1370_v40  ;;  %v1419_v53 = vmul.f32 %v1391_v42, %v1371_v49 }
 0x268   : > { %v2714_v56 = vpack.i.bf16 %v1369_v51, %v1368_v44  ;;  %v1417_v57 = vmul.f32 %v1383_v46, %v1369_v51  ;;  %v2596_v58 = vpop.f32.mrb[4].mxu1 }
 0x269   : > { %v1425_v59 = vpack.c.bf16 %v1419_v53, %v1418_v48  ;;  %v1255_v60 = vpack.c.bf16 %v2596_v58, %v2596_v58  ;;  %2710 = vrot.lane.b32.xlu1 %v2709_v52, %s2838_s22  ;;  %v1234_v61 = vpop.f32.mrb[5].mxu1 }
 0x26a   : > { %v1424_v63 = vpack.c.bf16 %v1417_v57, %v1416_v50  ;;  %v1253_v0 = vpack.c.bf16 %v1234_v61, %v1234_v61  ;;  %2715 = vrot.lane.b32.xlu0 %v2714_v56, %s2838_s22  ;;  %v2597_v1 = vpop.f32.mrb[6].mxu1 }
 0x26b   : > { %v1374_v2 = vunpack.c.l.bf16 %v1255_v60  ;;  %v1256_v4 = vpack.c.bf16 %v2597_v1, %v2597_v1  ;;  %v1237_v5 = vpop.f32.mrb[7].mxu1 }
 0x26c   : > { %v1372_v6 = vunpack.c.l.bf16 %v1253_v0  ;;  %v1254_v8 = vpack.c.bf16 %v1237_v5, %v1237_v5  ;;  %2610 = vmatprep.mubr.msk.bf16.mxu0 %vm1062_vm1, %v1424_v63 }
 0x26d   : > { %v1422_v9 = vmul.f32 %v1403_v3, %v1374_v2  ;;  %v1375_v10 = vunpack.c.l.bf16 %v1256_v4  ;;  %2611 = vmatmul.mubr.msk.bf16.vlgmr.msra.gmra.mrb[12].mxu0 %vm1062_vm1, %v1425_v59 }
 0x26e   : > { %v1420_v12 = vmul.f32 %v1395_v7, %v1372_v6  ;;  %v1373_v13 = vunpack.c.l.bf16 %v1254_v8  ;;  %2619 = vmatpush3.bf16.msra.mxu0 %v2742_v22 }
 0x26f   : > { %v2724_v15 = vpack.i.bf16 %v1375_v10, %v1374_v2  ;;  %v1423_v17 = vmul.f32 %v1407_v11, %v1375_v10  ;;  %2620 = vmatprep.subr.bf16.mxu0 %v2835_v16 }
 0x270   : > { %v2719_v18 = vpack.i.bf16 %v1373_v13, %v1372_v6  ;;  %v1421_v19 = vmul.f32 %v1399_v14, %v1373_v13 }
 0x271   : > { %v1427_v20 = vpack.c.bf16 %v1423_v17, %v1422_v9  ;;  %2725 = vrot.lane.b32.xlu1 %v2724_v15, %s2838_s22 }
 0x272   : > { %v1426_v21 = vpack.c.bf16 %v1421_v19, %v1420_v12  ;;  %2720 = vrot.lane.b32.xlu0 %v2719_v18, %s2838_s22  ;;  %2621 = vmatpush3.bf16.msra.mxu0 %v2743_v23 }
 0x273   : > { %2626 = vmatprep.subr.bf16.mxu0 %v2835_v16 }
 0x274   : > { %2614 = vmatprep.mubr.msk.bf16.mxu0 %vm1062_vm1, %v1426_v21 }
 0x275   : > { %2615 = vmatmul.mubr.msk.bf16.gmra.mrb[16].mxu0 %vm1062_vm1, %v1427_v20 }
 0x276   : > { %2622 = vmatprep.mubr.msk.bf16.mxu0 %vm2836_vm2, %v2835_v16 }
 0x340   : > { %v2612_v31 = vpop.f32.mrb[12].mxu0 }
 0x341   : > { %v3104_v32 = vsel %vm1571_vm3, %v2612_v31, -3.4028235e+38  ;;  %v1490_v33 = vpop.f32.mrb[13].mxu0  ;;  %vm1921_vm3 = vcmask 1047559  }
 0x342   : > { %v1599_v34 = vsel %vm1062_vm1, %v3104_v32, -inf  ;;  %v3108_v35 = vsel %vm1569_vm4, %v1490_v33, -3.4028235e+38  ;;  %v2613_v36 = vpop.f32.mrb[14].mxu0 }
 0x343   : > { %v1600_v37 = vrot.slane %v1599_v34, 4  ;;  %v1585_v38 = vsel %vm1062_vm1, %v3108_v35, -inf  ;;  %v3112_v39 = vsel %vm1572_vm5, %v2613_v36, -3.4028235e+38  ;;  %v1493_v28 = vpop.f32.mrb[15].mxu0 }
 0x344   : > { %v1586_v40 = vrot.slane %v1585_v38, 4  ;;  %v1606_v41 = vsel %vm1062_vm1, %v3112_v39, -inf  ;;  %v3116_v42 = vsel %vm1570_vm6, %v1493_v28, -3.4028235e+38 }
 0x345   : > { %v1601_v44 = vmax.f32 %v1599_v34, %v1600_v37  ;;  %v1607_v45 = vrot.slane %v1606_v41, 4  ;;  %v1592_v46 = vsel %vm1062_vm1, %v3116_v42, -inf }
 0x346   : > { %v1587_v48 = vmax.f32 %v1585_v38, %v1586_v40  ;;  %v1593_v49 = vrot.slane %v1592_v46, 4 }
 0x347   : > { %v1602_v50 = vrot.slane %v1601_v44, 2  ;;  %v1608_v51 = vmax.f32 %v1606_v41, %v1607_v45 }
 0x348   : > { %v1588_v52 = vrot.slane %v1587_v48, 2  ;;  %v1594_v53 = vmax.f32 %v1592_v46, %v1593_v49  ;;  %v2616_v55 = vpop.f32.mrb[16].mxu0 }
 0x349   : > { %v1603_v56 = vmax.f32 %v1601_v44, %v1602_v50  ;;  %v1609_v57 = vrot.slane %v1608_v51, 2  ;;  %v1583_v58 = vsel %vm1575_vm9, %v2616_v55, -3.4028235e+38  ;;  %v1506_v59 = vpop.f32.mrb[17].mxu0 }
 0x34a   : > { %v1589_v60 = vmax.f32 %v1587_v48, %v1588_v52  ;;  %v1595_v61 = vrot.slane %v1594_v53, 2  ;;  %v1627_v62 = vsel %vm1062_vm1, %v1583_v58, -inf  ;;  %v1581_v63 = vsel %vm1573_vm8, %v1506_v59, -3.4028235e+38  ;;  %v2617_v0 = vpop.f32.mrb[18].mxu0 }
 0x34b   : > { %v1604_v1 = vrot.slane %v1603_v56, 1  ;;  %v1610_v2 = vmax.f32 %v1608_v51, %v1609_v57  ;;  %v1628_v3 = vrot.slane %v1627_v62, 4  ;;  %v1613_v4 = vsel %vm1062_vm1, %v1581_v63, -inf  ;;  %v1509_v5 = vpop.f32.mrb[19].mxu0 }
 0x34c   : > { %v1590_v6 = vrot.slane %v1589_v60, 1  ;;  %v1596_v7 = vmax.f32 %v1594_v53, %v1595_v61  ;;  %v1614_v8 = vrot.slane %v1613_v4, 4  ;;  %v1584_v9 = vsel %vm1576_vm10, %v2617_v0, -3.4028235e+38  ;;  %v3140_v61 = vpop.permute.xlu1 %1744 }
 0x34d   : > { %v1605_v10 = vmax.f32 %v1603_v56, %v1604_v1  ;;  %v1611_v11 = vrot.slane %v1610_v2, 1  ;;  %v1629_v12 = vmax.f32 %v1627_v62, %v1628_v3  ;;  %v1634_v13 = vsel %vm1062_vm1, %v1584_v9, -inf }
 0x34e   : > { %v1591_v14 = vmax.f32 %v1589_v60, %v1590_v6  ;;  %v1597_v15 = vrot.slane %v1596_v7, 1  ;;  %v1615_v17 = vmax.f32 %v1613_v4, %v1614_v8  ;;  %v1635_v18 = vrot.slane %v1634_v13, 4 }
 0x34f   : > { %v1643_v19 = vsub.f32 %v3104_v32, %v1605_v10  ;;  %v1612_v20 = vmax.f32 %v1610_v2, %v1611_v11  ;;  %v1630_v21 = vrot.slane %v1629_v12, 2  ;;  %v1582_v22 = vsel %vm1574_vm7, %v1509_v5, -3.4028235e+38  ;;  %v3146_v2 = vpop.permute.xlu0 %1739 }
 0x350   : > { %v1641_v23 = vsub.f32 %v3108_v35, %v1591_v14  ;;  %v1598_v24 = vmax.f32 %v1596_v7, %v1597_v15  ;;  %v1616_v25 = vrot.slane %v1615_v17, 2  ;;  %v1636_v26 = vmax.f32 %v1634_v13, %v1635_v18 }
 0x351   : > { %v1653_v27 = vmul.f32 1.442695, %v1643_v19  ;;  %v1644_v29 = vsub.f32 %v3112_v39, %v1612_v20  ;;  %v1631_v31 = vmax.f32 %v1629_v12, %v1630_v21  ;;  %v1620_v33 = vsel %vm1062_vm1, %v1582_v22, -inf }
 0x352   : > { %v1649_v34 = vmul.f32 1.442695, %v1641_v23  ;;  %v1642_v36 = vsub.f32 %v3116_v42, %v1598_v24  ;;  %v1617_v32 = vmax.f32 %v1615_v17, %v1616_v25  ;;  %v1637_v37 = vrot.slane %v1636_v26, 2  ;;  %v3154_v17 = vpop.permute.xlu1 %1754 }
 0x353   : > { %2754 = vpow2.f32 %v1653_v27  ;;  %v1655_v38 = vmul.f32 1.442695, %v1644_v29  ;;  %v1632_v30 = vrot.slane %v1631_v31, 1  ;;  %v1621_v28 = vrot.slane %v1620_v33, 4  ;;  %v1750_v21 = vpop.permute.xlu0 %1749 }
 0x354   : > { %2756 = vpow2.f32 %v1649_v34  ;;  %v1651_v35 = vmul.f32 1.442695, %v1642_v36  ;;  %v1618_v40 = vrot.slane %v1617_v32, 1  ;;  %v1638_v41 = vmax.f32 %v1636_v26, %v1637_v37 }
 0x355   : > { %2758 = vpow2.f32 %v1655_v38  ;;  %v1633_v43 = vmax.f32 %v1631_v31, %v1632_v30  ;;  %v1622_v44 = vmax.f32 %v1620_v33, %v1621_v28 }
 0x356   : > { %2760 = vpow2.f32 %v1651_v35  ;;  %v1619_v39 = vmax.f32 %v1617_v32, %v1618_v40  ;;  %v1639_v45 = vrot.slane %v1638_v41, 1 }
 0x357   : > { %v1647_v46 = vsub.f32 %v1583_v58, %v1633_v43  ;;  %v1623_v47 = vrot.slane %v1622_v44, 2  ;;  %v3166_v43 = vpop.permute.xlu1 %1764 }
 0x358   : > { %v1645_v48 = vsub.f32 %v1581_v63, %v1619_v39  ;;  %v1640_v42 = vmax.f32 %v1638_v41, %v1639_v45  ;;  %v3168_v45 = vpop.permute.xlu0 %1759 }
 0x359   : > { %v1661_v49 = vmul.f32 1.442695, %v1647_v46  ;;  %v1624_v50 = vmax.f32 %v1622_v44, %v1623_v47 }
 0x35a   : > { %v1657_v51 = vmul.f32 1.442695, %v1645_v48  ;;  %v1648_v52 = vsub.f32 %v1584_v9, %v1640_v42 }
 0x35b   : > { %2762 = vpow2.f32 %v1661_v49  ;;  %v1625_v53 = vrot.slane %v1624_v50, 1 }
 0x35c   : > { %2764 = vpow2.f32 %v1657_v51  ;;  %v1663_v55 = vmul.f32 1.442695, %v1648_v52 }
 0x35d   : > { %v3132_v56 = vpop.eup %2754  ;;  %v1626_v57 = vmax.f32 %v1624_v50, %v1625_v53 }
 0x35e   : > { %v3134_v59 = vpop.eup %2756  ;;  %v1679_v60 = vsel %vm1062_vm1, %v3132_v56, 0.0  ;;  %2766 = vpow2.f32 %v1663_v55 }
 0x35f   : > { %v3138_v58 = vpop.eup %2758  ;;  %v1680_v62 = vrot.slane %v1679_v60, 4  ;;  %v1665_v63 = vsel %vm1062_vm1, %v3134_v59, 0.0  ;;  %v1646_v0 = vsub.f32 %v1582_v22, %v1626_v57 }
 0x360   : > { %v3144_v1 = vpop.eup %2760  ;;  %v1666_v3 = vrot.slane %v1665_v63, 4  ;;  %v1686_v4 = vsel %vm1062_vm1, %v3138_v58, 0.0 }
 0x361   : > { %v1681_v5 = vadd.f32 %v1680_v62, %v1679_v60  ;;  %v1687_v6 = vrot.slane %v1686_v4, 4  ;;  %v1672_v7 = vsel %vm1062_vm1, %v3144_v1, 0.0  ;;  %v1659_v8 = vmul.f32 1.442695, %v1646_v0  ;;  %v3174_v62 = vpop.permute.xlu1 %1774 }
 0x362   : > { %v1667_v9 = vadd.f32 %v1666_v3, %v1665_v63  ;;  %v1673_v10 = vrot.slane %v1672_v7, 4  ;;  %v1770_v3 = vpop.permute.xlu0 %1769 }
 0x363   : > { %v1682_v11 = vrot.slane %v1681_v5, 2  ;;  %v1688_v12 = vadd.f32 %v1687_v6, %v1686_v4  ;;  %2768 = vpow2.f32 %v1659_v8 }
 0x364   : > { %v1668_v13 = vrot.slane %v1667_v9, 2  ;;  %v1674_v14 = vadd.f32 %v1673_v10, %v1672_v7 }
 0x365   : > { %v3152_v15 = vpop.eup %2762  ;;  %v1683_v18 = vadd.f32 %v1682_v11, %v1681_v5  ;;  %v1689_v19 = vrot.slane %v1688_v12, 2 }
 0x366   : > { %v3156_v20 = vpop.eup %2764  ;;  %v1669_v22 = vadd.f32 %v1668_v13, %v1667_v9  ;;  %v1675_v23 = vrot.slane %v1674_v14, 2  ;;  %v1707_v24 = vsel %vm1062_vm1, %v3152_v15, 0.0  ;;  %v2711_v9 = vpop.permute.xlu1 %2710 }
 0x367   : > { %v1684_v25 = vrot.slane %v1683_v18, 1  ;;  %v1690_v26 = vadd.f32 %v1689_v19, %v1688_v12  ;;  %v1708_v27 = vrot.slane %v1707_v24, 4  ;;  %v1693_v29 = vsel %vm1062_vm1, %v3156_v20, 0.0  ;;  %v2716_v12 = vpop.permute.xlu0 %2715 }
 0x368   : > { %v3162_v31 = vpop.eup %2766  ;;  %v1670_v33 = vrot.slane %v1669_v22, 1  ;;  %v1676_v34 = vadd.f32 %v1675_v23, %v1674_v14  ;;  %v1694_v36 = vrot.slane %v1693_v29, 4  ;;  %v2712_v23 = vunpack.i.l.bf16 %v2711_v9 }
 0x369   : > { %v1685_v32 = vadd.f32 %v1684_v25, %v1683_v18  ;;  %v1691_v37 = vrot.slane %v1690_v26, 1  ;;  %v1709_v38 = vadd.f32 %v1708_v27, %v1707_v24  ;;  %v1714_v30 = vsel %vm1062_vm1, %v3162_v31, 0.0 }
 0x36a   : > { %v1671_v28 = vadd.f32 %v1670_v33, %v1669_v22  ;;  %v1677_v35 = vrot.slane %v1676_v34, 1  ;;  %v1695_v40 = vadd.f32 %v1694_v36, %v1693_v29  ;;  %v1715_v41 = vrot.slane %v1714_v30, 4 }
 0x36b   : > { %2770 = vrcp.f32 %v1685_v32  ;;  %v1692_v44 = vadd.f32 %v1691_v37, %v1690_v26  ;;  %v1710_v39 = vrot.slane %v1709_v38, 2  ;;  %v2717_v26 = vunpack.i.l.bf16 %v2716_v12  ;;  %v2726_v37 = vpop.permute.xlu1 %2725 }
 0x36c   : > { %2772 = vrcp.f32 %v1671_v28  ;;  %v1678_v46 = vadd.f32 %v1677_v35, %v1676_v34  ;;  %v1696_v47 = vrot.slane %v1695_v40, 2  ;;  %v1716_v48 = vadd.f32 %v1715_v41, %v1714_v30  ;;  %v3184_v28 = vpop.permute.xlu0 %2720 }
 0x36d   : > { %v3170_v42 = vpop.eup %2768  ;;  %2774 = vrcp.f32 %v1692_v44  ;;  %v1711_v49 = vadd.f32 %v1710_v39, %v1709_v38  ;;  %v2713_v34 = vunpack.i.h.bf16 %v2711_v9  ;;  %v2718_v32 = vunpack.i.h.bf16 %v2716_v12 }
 0x36e   : > { %2776 = vrcp.f32 %v1678_v46  ;;  %v1697_v50 = vadd.f32 %v1696_v47, %v1695_v40  ;;  %v1717_v51 = vrot.slane %v1716_v48, 2  ;;  %v1700_v52 = vsel %vm1062_vm1, %v3170_v42, 0.0 }
 0x36f   : > { %v1712_v53 = vrot.slane %v1711_v49, 1  ;;  %v1701_v55 = vrot.slane %v1700_v52, 4  ;;  %v2727_v41 = vunpack.i.l.bf16 %v2726_v37 }
 0x370   : > { %v1698_v57 = vrot.slane %v1697_v50, 1  ;;  %v1718_v60 = vadd.f32 %v1717_v51, %v1716_v48 }
 0x371   : > { %v1713_v63 = vadd.f32 %v1712_v53, %v1711_v49  ;;  %v1702_v0 = vadd.f32 %v1701_v55, %v1700_v52 }
 0x372   : > { %v1699_v4 = vadd.f32 %v1698_v57, %v1697_v50  ;;  %v1719_v5 = vrot.slane %v1718_v60, 1  ;;  %v2722_v50 = vunpack.i.l.bf16 %v3184_v28 }
 0x373   : > { %2778 = vrcp.f32 %v1713_v63  ;;  %v1703_v6 = vrot.slane %v1702_v0, 2 }
 0x374   : > { %2780 = vrcp.f32 %v1699_v4  ;;  %v1720_v7 = vadd.f32 %v1719_v5, %v1718_v60 }
 0x375   : > { %v2771_v8 = vpop.eup %2770  ;;  %v1704_v10 = vadd.f32 %v1703_v6, %v1702_v0 }
 0x376   : > { %v2773_v11 = vpop.eup %2772  ;;  %v1731_v13 = vmul.f32 %v2771_v8, %v3132_v56  ;;  %2782 = vrcp.f32 %v1720_v7  ;;  %v2728_v8 = vunpack.i.h.bf16 %v2726_v37 }
 0x377   : > { %v2775_v14 = vpop.eup %2774  ;;  %v1729_v18 = vmul.f32 %v2773_v11, %v3134_v59  ;;  %v1705_v19 = vrot.slane %v1704_v10, 1 }
 0x378   : > { %v2777_v22 = vpop.eup %2776  ;;  %v1779_v24 = vmul.f32 %v1750_v21, %v1731_v13  ;;  %v1732_v25 = vmul.f32 %v2775_v14, %v3138_v58 }
 0x379   : > { %v1777_v27 = vmul.f32 %v3146_v2, %v1729_v18  ;;  %v1730_v29 = vmul.f32 %v2777_v22, %v3144_v1  ;;  %v1706_v33 = vadd.f32 %v1705_v19, %v1704_v10 }
 0x37a   : > { %v1819_v36 = vmul.f32 %v2712_v23, %v1779_v24  ;;  %v1780_v56 = vmul.f32 %v3154_v17, %v1732_v25 }
 0x37b   : > { %v1817_v38 = vmul.f32 %v2717_v26, %v1777_v27  ;;  %v1778_v59 = vmul.f32 %v3140_v61, %v1730_v29  ;;  %2784 = vrcp.f32 %v1706_v33 }
 0x37c   : > { %v1839_v21 = vsel %vm1062_vm1, %v1819_v36, 0.0  ;;  %v1820_v30 = vmul.f32 %v2713_v34, %v1780_v56  ;;  %v2723_v34 = vunpack.i.h.bf16 %v3184_v28 }
 0x37d   : > { %v2779_v58 = vpop.eup %2778  ;;  %v1840_v2 = vrot.slane %v1839_v21, 4  ;;  %v1825_v1 = vsel %vm1062_vm1, %v1817_v38, 0.0  ;;  %v1818_v35 = vmul.f32 %v2718_v32, %v1778_v59 }
 0x37e   : > { %v2781_v40 = vpop.eup %2780  ;;  %v1826_v44 = vrot.slane %v1825_v1, 4  ;;  %v1846_v17 = vsel %vm1062_vm1, %v1820_v30, 0.0  ;;  %v1735_v39 = vmul.f32 %v2779_v58, %v3152_v15 }
 0x37f   : > { %v1841_v46 = vadd.f32 %v1840_v2, %v1839_v21  ;;  %v1847_v61 = vrot.slane %v1846_v17, 4  ;;  %v1832_v47 = vsel %vm1062_vm1, %v1818_v35, 0.0  ;;  %v1733_v48 = vmul.f32 %v2781_v40, %v3156_v20 }
 0x380   : > { %v2783_v49 = vpop.eup %2782  ;;  %v1827_v51 = vadd.f32 %v1826_v44, %v1825_v1  ;;  %v1833_v52 = vrot.slane %v1832_v47, 4  ;;  %v1783_v53 = vmul.f32 %v1770_v3, %v1735_v39 }
 0x381   : > { %v1842_v55 = vrot.slane %v1841_v46, 2  ;;  %v1848_v57 = vadd.f32 %v1847_v61, %v1846_v17  ;;  %v1781_v60 = vmul.f32 %v3168_v45, %v1733_v48  ;;  %v1736_v63 = vmul.f32 %v2783_v49, %v3162_v31 }
 0x382   : > { %v1828_v0 = vrot.slane %v1827_v51, 2  ;;  %v1834_v15 = vadd.f32 %v1833_v52, %v1832_v47  ;;  %v1823_v4 = vmul.f32 %v2727_v41, %v1783_v53 }
 0x383   : > { %v1843_v5 = vadd.f32 %v1842_v55, %v1841_v46  ;;  %v1849_v6 = vrot.slane %v1848_v57, 2  ;;  %v1821_v7 = vmul.f32 %v2722_v50, %v1781_v60  ;;  %v1784_v20 = vmul.f32 %v3174_v62, %v1736_v63 }
 0x384   : > { %v1829_v9 = vadd.f32 %v1828_v0, %v1827_v51  ;;  %v1835_v10 = vrot.slane %v1834_v15, 2  ;;  %v1867_v11 = vsel %vm1062_vm1, %v1823_v4, 0.0 }
 0x385   : > { %v2785_v3 = vpop.eup %2784  ;;  %v1844_v12 = vrot.slane %v1843_v5, 1  ;;  %v1850_v13 = vadd.f32 %v1849_v6, %v1848_v57  ;;  %v1868_v14 = vrot.slane %v1867_v11, 4  ;;  %v1853_v45 = vsel %vm1062_vm1, %v1821_v7, 0.0 }
 0x386   : > { %v1830_v31 = vrot.slane %v1829_v9, 1  ;;  %v1836_v18 = vadd.f32 %v1835_v10, %v1834_v15  ;;  %v1854_v19 = vrot.slane %v1853_v45, 4  ;;  %v1824_v22 = vmul.f32 %v2728_v8, %v1784_v20 }
 0x387   : > { %v1845_v23 = vadd.f32 %v1844_v12, %v1843_v5  ;;  %v1851_v24 = vrot.slane %v1850_v13, 1  ;;  %v1869_v25 = vadd.f32 %v1868_v14, %v1867_v11  ;;  %v1734_v62 = vmul.f32 %v2785_v3, %v3170_v42 }
 0x388   : > { %v1831_v26 = vadd.f32 %v1830_v31, %v1829_v9  ;;  %v1837_v27 = vrot.slane %v1836_v18, 1  ;;  %v1855_v29 = vadd.f32 %v1854_v19, %v1853_v45  ;;  %v1874_v33 = vsel %vm1062_vm1, %v1824_v22, 0.0 }
 0x389   : > { %v1852_v36 = vadd.f32 %v1851_v24, %v1850_v13  ;;  %v1870_v56 = vrot.slane %v1869_v25, 2  ;;  %v1875_v32 = vrot.slane %v1874_v33, 4  ;;  %v1782_v21 = vmul.f32 %v3166_v43, %v1734_v62 }
 0x38a   : > { %v1881_v37 = vpack.c.bf16 %v1831_v26, %v1831_v26  ;;  %v1838_v38 = vadd.f32 %v1837_v27, %v1836_v18  ;;  %v1856_v59 = vrot.slane %v1855_v29, 2  ;;  %v1883_v30 = vpack.c.bf16 %v1845_v23, %v1845_v23 }
 0x38b   : > { %v1876_v58 = vadd.f32 %v1875_v32, %v1874_v33  ;;  %v1884_v2 = vpack.c.bf16 %v1852_v36, %v1852_v36  ;;  %v1822_v35 = vmul.f32 %v2723_v34, %v1782_v21  ;;  %v1871_v40 = vadd.f32 %v1870_v56, %v1869_v25  ;;  %v2236_v33 = vld [vmem:[%s827_s21] sm:$0xff]  ;;  %v2745_v34 = vld [vmem:[%s3307_s16 + $0x8] sm:$0xff]   ;;  %v2748_v32 = vld [vmem:[%s3309_s18 + $0x10] sm:$0xff]  }
 0x38c   : > { %v1882_v1 = vpack.c.bf16 %v1838_v38, %v1838_v38  ;;  %v1857_v42 = vadd.f32 %v1856_v59, %v1855_v29  ;;  %v1901_v44 = vunpack.c.l.b16 %v1881_v37  ;;  %v1903_v46 = vunpack.c.l.b16 %v1883_v30  ;;  %v2746_v36 = vld [vmem:[%s3309_s18] sm:$0xff]   ;;  %v2747_v56 = vld [vmem:[%s3309_s18 + $0x8] sm:$0xff]   ;;  %v2749_v37 = vld [vmem:[%s3309_s18 + $0x18] sm:$0xff]  }
 0x38d   : > { %v1877_v41 = vrot.slane %v1876_v58, 2  ;;  %v1860_v39 = vsel %vm1062_vm1, %v1822_v35, 0.0  ;;  %v1904_v43 = vunpack.c.l.b16 %v1884_v2  ;;  %v1872_v52 = vrot.slane %v1871_v40, 1  ;;  %2635 = vmatpush3.bf16.msra.mxu1 %v2746_v36  ;;  %v2750_v38 = vld [vmem:[%s3309_s18 + $0x20] sm:$0xff]   ;;  %v2751_v59 = vld [vmem:[%s3309_s18 + $0x28] sm:$0xff]  }
 0x38e   : > { %v1902_v28 = vunpack.c.l.b16 %v1882_v1  ;;  %v1858_v17 = vrot.slane %v1857_v42, 1  ;;  %v1861_v47 = vrot.slane %v1860_v39, 4  ;;  %2636 = vmatprep.subr.bf16.mxu1 %v2835_v16 }
 0x38f   : > { %v1878_v61 = vadd.f32 %v1877_v41, %v1876_v58  ;;  %v1873_v15 = vadd.f32 %v1872_v52, %v1871_v40 }
 0x390   : > { %v1910_v48 = vsel %vm1909_vm11, %v1902_v28, %v1901_v44  ;;  %v1859_v49 = vadd.f32 %v1858_v17, %v1857_v42  ;;  %v1862_v50 = vadd.f32 %v1861_v47, %v1860_v39  ;;  %v2499_v44 = vld [vmem:[%s3303_s12] ss:$0 sm:$0xff] }
 0x391   : > { %v1912_v51 = vsel %vm1911_vm12, %v1903_v46, %v1910_v48  ;;  %v1879_v57 = vrot.slane %v1878_v61, 1  ;;  %v1887_v20 = vpack.c.bf16 %v1873_v15, %v1873_v15  ;;  %2637 = vmatpush3.bf16.msra.mxu1 %v2747_v56  ;;  %v2500_v39 = vld [vmem:[%s3304_s13] ss:$0 sm:$0xff]  ;;  %v2753_v48 = vld [vmem:[%s3309_s18 + $0x38] sm:$0xff]  }
 0x392   : > { %v1885_v53 = vpack.c.bf16 %v1859_v49, %v1859_v49  ;;  %v1914_v55 = vsel %vm1913_vm13, %v1904_v43, %v1912_v51  ;;  %v1863_v60 = vrot.slane %v1862_v50, 2  ;;  %2638 = vmatprep.subr.bf16.mxu1 %v2835_v16  ;;  %v2752_v43 = vld [vmem:[%s3309_s18 + $0x30] sm:$0xff]   ;;  %v2501_v49 = vld [vmem:[%s3308_s17] ss:$0 sm:$0xff] }
 0x393   : > { %v1880_v6 = vadd.f32 %v1879_v57, %v1878_v61  ;;  %v1907_v11 = vunpack.c.l.b16 %v1887_v20 }
 0x394   : > { %v1905_v63 = vunpack.c.l.b16 %v1885_v53  ;;  %v1864_v0 = vadd.f32 %v1863_v60, %v1862_v50 }
 0x395   : > { %v1888_v9 = vpack.c.bf16 %v1880_v6, %v1880_v6  ;;  %2639 = vmatpush3.bf16.msra.mxu1 %v2748_v32 }
 0x396   : > { %v1916_v4 = vsel %vm1915_vm14, %v1905_v63, %v1914_v55  ;;  %v1865_v5 = vrot.slane %v1864_v0, 1  ;;  %2640 = vmatprep.subr.bf16.mxu1 %v2835_v16 }
 0x397   : > { %v1908_v3 = vunpack.c.l.b16 %v1888_v9 }
 0x398   : > { %v1866_v7 = vadd.f32 %v1865_v5, %v1864_v0 }
 0x399   : > { %2641 = vmatpush3.bf16.msra.mxu1 %v2749_v37 }
 0x39a   : > { %v1886_v8 = vpack.c.bf16 %v1866_v7, %v1866_v7  ;;  %2642 = vmatprep.subr.bf16.mxu1 %v2835_v16 }
 0x39c   : > { %v1906_v10 = vunpack.c.l.b16 %v1886_v8 }
 0x39d   : > { %2643 = vmatpush3.bf16.msra.mxu1 %v2750_v38 }
 0x39e   : > { %v1918_v12 = vsel %vm1917_vm15, %v1906_v10, %v1916_v4  ;;  %2644 = vmatprep.subr.bf16.mxu1 %v2835_v16 }
 0x39f   : > { %v1920_v13 = vsel %vm1919_vm0, %v1907_v11, %v1918_v12 }
 0x3a0   : > { %v1922_v14 = vsel %vm1921_vm3, %v1908_v3, %v1920_v13 }
 0x3a1   : > { %v1923_v45 = vpack.c.b16 %v1922_v14, %v1922_v14  ;;  %2645 = vmatpush3.bf16.msra.mxu1 %v2751_v59 }
 0x3a2   : > { %2646 = vmatprep.subr.bf16.mxu1 %v2835_v16 }
 0x3a3   : > { %2623 = vmatmul.mubr.msk.bf16.vlgmr.msra.gmra.mrb[20].mxu0 %vm1062_vm1, %v1923_v45 }
 0x3a4   : > { %2630 = vmatprep.mubr.msk.bf16.mxu0 %vm2836_vm2, %v2835_v16 }
 0x3a5   : > { %2647 = vmatpush3.bf16.msra.mxu1 %v2752_v43 }
 0x3a6   : > { %2648 = vmatprep.subr.bf16.mxu1 %v2835_v16 }
 0x3a9   : > { %2649 = vmatpush3.bf16.msra.mxu1 %v2753_v48 }
 0x476   : > { %v1973_v31 = vpop.f32.mrb[20].mxu0 }
 0x477   : > { %v1979_v18 = vadd.f32 %v1973_v31, %v3055_v54  ;;  %v2624_v19 = vpop.f32.mrb[21].mxu0  ;;  %v2744_v54 = vld [vmem:[%s3307_s16] sm:$0xff]  }
 0x478   : > { %v1976_v22 = vpop.f32.mrb[22].mxu0  ;;  %2627 = vmatpush3.bf16.msra.mxu0 %v2744_v54 }
 0x479   : > { %v2625_v23 = vpop.f32.mrb[23].mxu0  ;;  %v1982_v24 = vsel %vm1062_vm1, %v1979_v18, 0.0  ;;  %2628 = vmatprep.subr.bf16.mxu0 %v2835_v16  ;;  %v2505_v16 = vld [vmem:[%s3310_s19] ss:$0 sm:$0xff] }
 0x47a   : > { %1983 = vadd.xlane.f32.xlu0 %v1982_v24  ;;  %v2514_v23 = vld [vmem:[%s3305_s14] ss:$0 sm:$0xff] }
 0x47c   : > { %2629 = vmatpush3.bf16.msra.mxu0 %v2745_v34 }
 0x507   : > { %v1984_v25 = vpop.xlane.xlu0 %1983 }
 0x508   : > { %v1986_v62 = vmul.f32 0.03125, %v1984_v25 }
 0x50a   : > { %v1987_v26 = vsub.f32 %v1979_v18, %v1986_v62  ;;  %v2515_v62 = vld [vmem:[%s3306_s15] ss:$0 sm:$0xff] }
 0x50c   : > { %v1988_v27 = vmul.f32 %v1987_v26, %v1987_v26  ;;  %v2007_v28 = vmul.f32 %v2499_v44, %v1987_v26 }
 0x50e   : > { %v1989_v29 = vsel %vm1062_vm1, %v1988_v27, 0.0 }
 0x50f   : > { %1990 = vadd.xlane.f32.xlu1 %v1989_v29 }
 0x520   : > { %2239 = vperm.xlu1 %2708, %v2236_v33  }
 0x59c   : > { %v1991_v21 = vpop.xlane.xlu1 %1990 }
 0x59d   : > { %v1992_v30 = vmul.f32 0.032258064, %v1991_v21 }
 0x59f   : > { %v1993_v58 = vadd.f32 1e-06, %v1992_v30 }
 0x5a0   : > { %v2240_v29 = vpop.permute.xlu1 %2239 }
 0x5a1   : > { %2786 = vrsqrt.f32 %v1993_v58  ;;  %vm1996_vm2 = vcmp.eq.f32.partialorder %v1993_v58, inf  ;;  %v1999_v42 = vand.u32 2147483648, %v1993_v58  ;;  %vm1998_vm4 = vcmp.eq.f32.partialorder %v1993_v58, 0.0 }
 0x5ab   : > { %v2787_v2 = vpop.eup %2786 }
 0x5ac   : > { %v1995_v1 = vmul.f32 %v2787_v2, %v1993_v58 }
 0x5ae   : > { %v1997_v35 = vsel %vm1996_vm2, %v1993_v58, %v1995_v1 }
 0x5af   : > { %v2000_v40 = vsel %vm1998_vm4, %v1999_v42, %v1997_v35 }
 0x5b0   : > { %v2008_v41 = vadd.f32 1e-06, %v2000_v40 }
 0x5b2   : > { %2788 = vrcp.f32 %v2008_v41 }
 0x5bc   : > { %v2789_v17 = vpop.eup %2788 }
 0x5bd   : > { %v2010_v46 = vmul.f32 %v2789_v17, %v2007_v28 }
 0x5bf   : > { %v2017_v61 = vadd.f32 %v2500_v39, %v2010_v46 }
 0x5c1   : > { %v2018_v47 = vpack.c.bf16 %v2017_v61, %v2017_v61 }
 0x5c3   : > { %2631 = vmatmul.mubr.msk.bf16.vlgmr.msra.gmra.mrb[24].mxu0 %vm1062_vm1, %v2018_v47 }
 0x696   : > { %v2079_v50 = vpop.f32.mrb[24].mxu0 }
 0x697   : > { %v2080_v51 = vadd.f32 %v2501_v49, %v2079_v50  ;;  %v2632_v52 = vpop.f32.mrb[25].mxu0 }
 0x698   : > { %v2082_v53 = vpop.f32.mrb[26].mxu0 }
 0x699   : > { %v2085_v55 = vmax.f32 %v2080_v51, 0.0  ;;  %v2633_v57 = vpop.f32.mrb[27].mxu0 }
 0x69b   : > { %v2086_v60 = vpack.c.bf16 %v2085_v55, %v2085_v55 }
 0x69d   : > { %2651 = vmatmul.mubr.bf16.vlgmr.msra.gmra.mrb[8].mxu1 %v2086_v60 }
 0x770   : > { %v2192_v63 = vpop.f32.mrb[8].mxu1 }
 0x771   : > { %v2193_v0 = vadd.f32 %v2505_v16, %v2192_v63  ;;  %v2652_v15 = vpop.f32.mrb[9].mxu1 }
 0x772   : > { %v2195_v4 = vpop.f32.mrb[10].mxu1 }
 0x773   : > { %v2653_v5 = vpop.f32.mrb[11].mxu1  ;;  %v2198_v6 = vadd.f32 %v2193_v0, %v2017_v61 }
 0x775   : > { %v2201_v7 = vsel %vm1062_vm1, %v2198_v6, 0.0 }
 0x776   : > { %2202 = vadd.xlane.f32.xlu0 %v2201_v7 }
 0x803   : > { %v2203_v20 = vpop.xlane.xlu0 %2202 }
 0x804   : > { %v2204_v8 = vmul.f32 0.03125, %v2203_v20 }
 0x806   : > { %v2205_v9 = vsub.f32 %v2198_v6, %v2204_v8 }
 0x808   : > { %v2206_v10 = vmul.f32 %v2205_v9, %v2205_v9  ;;  %v2225_v24 = vmul.f32 %v2514_v23, %v2205_v9 }
 0x80a   : > { %v2207_v11 = vsel %vm1062_vm1, %v2206_v10, 0.0 }
 0x80b   : > { %2208 = vadd.xlane.f32.xlu0 %v2207_v11 }
 0x898   : > { %v2209_v3 = vpop.xlane.xlu0 %2208 }
 0x899   : > { %v2210_v12 = vmul.f32 0.032258064, %v2209_v3 }
 0x89b   : > { %v2211_v13 = vadd.f32 1e-06, %v2210_v12 }
 0x89d   : > { %2790 = vrsqrt.f32 %v2211_v13  ;;  %vm2214_vm5 = vcmp.eq.f32.partialorder %v2211_v13, inf  ;;  %v2217_v31 = vand.u32 2147483648, %v2211_v13  ;;  %vm2216_vm6 = vcmp.eq.f32.partialorder %v2211_v13, 0.0 }
 0x8a7   : > { %v2791_v14 = vpop.eup %2790 }
 0x8a8   : > { %v2213_v45 = vmul.f32 %v2791_v14, %v2211_v13 }
 0x8aa   : > { %v2215_v18 = vsel %vm2214_vm5, %v2211_v13, %v2213_v45 }
 0x8ab   : > { %v2218_v19 = vsel %vm2216_vm6, %v2217_v31, %v2215_v18 }
 0x8ac   : > { %v2226_v22 = vadd.f32 1e-06, %v2218_v19 }
 0x8ae   : > { %2792 = vrcp.f32 %v2226_v22 }
 0x8b8   : > { %v2793_v25 = vpop.eup %2792 }
 0x8b9   : > { %v2228_v26 = vmul.f32 %v2793_v25, %v2225_v24 }
 0x8bb   : > { %v2235_v27 = vadd.f32 %v2515_v62, %v2228_v26 }
 0x8bd   : > { %v2242_v33 = vmul.f32 %v2240_v29, %v2235_v27 }
 0x8bf   : > { %2243 = vst.msk [vmem:[%s855_s28] sm:$0xff] %vm1062_vm1, %v2242_v33 }
 0x8c0 PF: > { %s30_s23 = sadd.s32 1, %s2832_s23   ;;  %s3328_s1 = sld [smem:[#allocation2_spill]] }
 0x8c1   : > { %p27_p8 = scmp.ge.s32.totalorder %s30_s23, 6   ;;  %s3329_s29 = sld [smem:[#allocation3_spill]] }
 0x8c2   : > { %s3330_s22 = sld [smem:[#allocation4_spill]]  ;;  %s3331_s21 = smov %s2824_s6 }
 0x8c3   :  { %29 = sbr.rel (!%p27_p8) target bundleno = 7 (0x7), region = 148 }
 0x8c7   : > { %s3332_s6 = smov %s3329_s29 }

// kernel: _lambda_.19
= control target key start
LH: loop header
LB: loop body
LE: loop exit
PB: predicated region body
PF: predicated region fallthrough
CT: control target
= control target key end

     0   :  { %vm45_vm0 = vcmask 261120   ;;  %s350_s0 = inlined_call_operand.vmem [shape: f32[32,32], index: 0, kind: input, shape index: {}]   ;;  %s351_s1 = inlined_call_operand.vmem [shape: bf16[32,20], index: 1, kind: input, shape index: {}]   ;;  %s352_s2 = inlined_call_operand.vmem [shape: f32[1,20], index: 2, kind: input, shape index: {}]   ;;  %s353_s3 = inlined_call_operand.hbm [shape: f32[32,20], index: 3, kind: output, shape index: {}]  }
   0x1   :  { %v218_v0 = vld [vmem:[%s351_s1] sm:$0xff]   ;;  %v219_v1 = vld [vmem:[%s351_s1 + $0x8] sm:$0xff]   ;;  %v18_v5 = vld [vmem:[%s350_s0 + $0x10] sm:$0xff] }
   0x2   :  { %207 = vmatprep.subr.bf16.mxu0 %v218_v0  ;;  %v16_v2 = vld [vmem:[%s350_s0] sm:$0xff]  ;;  %v17_v3 = vld [vmem:[%s350_s0 + $0x8] sm:$0xff]  ;;  %v19_v6 = vld [vmem:[%s350_s0 + $0x18] sm:$0xff] }
   0x3   :  { %208 = vmatpush3.bf16.msra.mxu0 %v218_v0  ;;  %v20_v4 = vpack.c.bf16 %v17_v3, %v16_v2 }
   0x4   :  { %8 = vsyncpa [#allocation3], 0  ;;  %209 = vmatprep.subr.bf16.mxu0 %v219_v1  ;;  %v21_v7 = vpack.c.bf16 %v19_v6, %v18_v5  ;;  %v198_v8 = vld [vmem:[%s352_s2] ss:$0 sm:$0xff]  ;;  %vm129_vm1 = vcmask 162816   ;;  %s276_s0 = smov [#allocation2]  }
   0x5   :  { %211 = vmatprep.mubr.msk.bf16.mxu0 %vm45_vm0, %v20_v4  ;;  %s187_s2 = sshll.u32 %s276_s0, 4  ;;  %s188_s2 = int_to_ptr.vmem [resolvable:$true] %s187_s2 }
   0x6   :  { %s252_s25 = scalar_lea.vmem %s188_s2, 512  ;;  %p257_p1 = scmp.lt.s32.totalorder %s188_s2, %s188_s2 }
   0x7   :  { %210 = vmatpush3.bf16.msra.mxu0 %v219_v1  ;;  %p253_p0 = scmp.ne.s32.totalorder %s188_s2, %s252_s25  ;;  %p258_p2 = scmp.lt.s32.totalorder %s252_s25, %s252_s25 }
   0x9   :  { %p259_p3 = por %p258_p2, %p257_p1 }
   0xa   :  { %212 = vmatmul.mubr.msk.bf16.vlgmr.msra.gmra.mrb[0].mxu0 %vm45_vm0, %v21_v7 }
   0xb   :  { %p260_p4 = pnand %p259_p3, %p253_p0 }
  0xdd   :  { %v213_v9 = vpop.f32.mrb[0].mxu0 }
  0xde   :  { %v95_v10 = vadd.f32 %v213_v9, %v198_v8  ;;  %v86_v11 = vpop.f32.mrb[1].mxu0 }
  0xdf   :  { %v87_v12 = vadd.f32 %v198_v8, %v86_v11  ;;  %v214_v13 = vpop.f32.mrb[2].mxu0 }
  0xe0   :  { %v103_v14 = vsub.f32 0.0, %v95_v10  ;;  %v98_v15 = vadd.f32 %v214_v13, %v198_v8  ;;  %v89_v16 = vpop.f32.mrb[3].mxu0 }
  0xe1   :  { %v101_v17 = vsub.f32 0.0, %v87_v12  ;;  %v90_v18 = vadd.f32 %v198_v8, %v89_v16 }
  0xe2   :  { %v109_v19 = vmul.f32 1.442695, %v103_v14  ;;  %v104_v20 = vsub.f32 0.0, %v98_v15 }
  0xe3   :  { %v105_v21 = vmul.f32 1.442695, %v101_v17  ;;  %v102_v22 = vsub.f32 0.0, %v90_v18 }
  0xe4   :  { %220 = vpow2.f32 %v109_v19  ;;  %v111_v23 = vmul.f32 1.442695, %v104_v20 }
  0xe5   :  { %222 = vpow2.f32 %v105_v21  ;;  %v107_v24 = vmul.f32 1.442695, %v102_v22 }
  0xe6   :  { %224 = vpow2.f32 %v111_v23 }
  0xe7   :  { %226 = vpow2.f32 %v107_v24 }
  0xee   :  { %v221_v25 = vpop.eup %220 }
  0xef   :  { %v223_v26 = vpop.eup %222  ;;  %v115_v27 = vadd.f32 1.0, %v221_v25 }
  0xf0   :  { %v225_v28 = vpop.eup %224  ;;  %v113_v29 = vadd.f32 1.0, %v223_v26 }
  0xf1   :  { %v227_v30 = vpop.eup %226  ;;  %228 = vrcp.f32 %v115_v27  ;;  %v116_v31 = vadd.f32 1.0, %v225_v28 }
  0xf2   :  { %230 = vrcp.f32 %v113_v29  ;;  %v114_v32 = vadd.f32 1.0, %v227_v30 }
  0xf3   :  { %232 = vrcp.f32 %v116_v31 }
  0xf4   :  { %234 = vrcp.f32 %v114_v32 }
  0xfb   :  { %v229_v33 = vpop.eup %228 }
  0xfc   :  { %v231_v34 = vpop.eup %230  ;;  %v127_v35 = vmul.f32 %v229_v33, %v229_v33 }
  0xfd   :  { %v320_v36 = vpop.eup %232  ;;  %v125_v37 = vmul.f32 %v231_v34, %v231_v34 }
  0xfe   :  { %v322_v38 = vpop.eup %234  ;;  %v136_v39 = vsel %vm129_vm1, %v127_v35, 0.0  ;;  %v128_v40 = vmul.f32 %v320_v36, %v320_v36 }
  0xff   :  { %137 = vadd.xlane.f32.xlu1 %v136_v39  ;;  %v130_v41 = vsel %vm129_vm1, %v125_v37, 0.0  ;;  %v126_v42 = vmul.f32 %v322_v38, %v322_v38 }
 0x100   :  { %131 = vadd.xlane.f32.xlu0 %v130_v41  ;;  %v139_v43 = vsel %vm129_vm1, %v128_v40, 0.0 }
 0x101   :  { %v133_v44 = vsel %vm129_vm1, %v126_v42, 0.0 }
 0x103   :  { %140 = vadd.xlane.f32.xlu1 %v139_v43 }
 0x104   :  { %134 = vadd.xlane.f32.xlu0 %v133_v44 }
 0x18c   :  { %v138_v45 = vpop.xlane.xlu1 %137 }
 0x18d   :  { %236 = vrsqrt.f32 %v138_v45  ;;  %v132_v46 = vpop.xlane.xlu0 %131  ;;  %vm158_vm2 = vcmp.eq.f32.partialorder %v138_v45, inf  ;;  %v161_v52 = vand.u32 2147483648, %v138_v45  ;;  %vm160_vm3 = vcmp.eq.f32.partialorder %v138_v45, 0.0 }
 0x18e   :  { %238 = vrsqrt.f32 %v132_v46  ;;  %vm144_vm4 = vcmp.eq.f32.partialorder %v132_v46, inf  ;;  %v147_v55 = vand.u32 2147483648, %v132_v46  ;;  %vm146_vm5 = vcmp.eq.f32.partialorder %v132_v46, 0.0 }
 0x190   :  { %v141_v47 = vpop.xlane.xlu1 %140 }
 0x191   :  { %240 = vrsqrt.f32 %v141_v47  ;;  %v135_v48 = vpop.xlane.xlu0 %134  ;;  %vm165_vm6 = vcmp.eq.f32.partialorder %v141_v47, inf  ;;  %v168_v62 = vand.u32 2147483648, %v141_v47  ;;  %vm167_vm7 = vcmp.eq.f32.partialorder %v141_v47, 0.0 }
 0x192   :  { %242 = vrsqrt.f32 %v135_v48  ;;  %vm151_vm8 = vcmp.eq.f32.partialorder %v135_v48, inf  ;;  %v154_v1 = vand.u32 2147483648, %v135_v48  ;;  %vm153_vm9 = vcmp.eq.f32.partialorder %v135_v48, 0.0 }
 0x197   :  { %v237_v49 = vpop.eup %236 }
 0x198   :  { %v239_v50 = vpop.eup %238  ;;  %v157_v51 = vmul.f32 %v237_v49, %v138_v45 }
 0x199   :  { %v143_v53 = vmul.f32 %v239_v50, %v132_v46 }
 0x19a   :  { %v159_v54 = vsel %vm158_vm2, %v138_v45, %v157_v51 }
 0x19b   :  { %v241_v56 = vpop.eup %240  ;;  %v162_v57 = vsel %vm160_vm3, %v161_v52, %v159_v54  ;;  %v145_v58 = vsel %vm144_vm4, %v132_v46, %v143_v53 }
 0x19c   :  { %v243_v59 = vpop.eup %242  ;;  %244 = vrcp.f32 %v162_v57  ;;  %v148_v60 = vsel %vm146_vm5, %v147_v55, %v145_v58  ;;  %v164_v61 = vmul.f32 %v241_v56, %v141_v47 }
 0x19d   :  { %246 = vrcp.f32 %v148_v60  ;;  %v150_v63 = vmul.f32 %v243_v59, %v135_v48 }
 0x19e   :  { %v166_v0 = vsel %vm165_vm6, %v141_v47, %v164_v61 }
 0x19f   :  { %v169_v2 = vsel %vm167_vm7, %v168_v62, %v166_v0  ;;  %v152_v3 = vsel %vm151_vm8, %v135_v48, %v150_v63 }
 0x1a0   :  { %248 = vrcp.f32 %v169_v2  ;;  %v155_v4 = vsel %vm153_vm9, %v154_v1, %v152_v3 }
 0x1a1   :  { %250 = vrcp.f32 %v155_v4 }
 0x1a6   :  { %v245_v5 = vpop.eup %244 }
 0x1a7   :  { %v247_v6 = vpop.eup %246  ;;  %v175_v7 = vmul.f32 %v245_v5, %v229_v33 }
 0x1a8   :  { %v171_v8 = vmul.f32 %v247_v6, %v231_v34 }
 0x1a9   :  { %180 = vst.msk [vmem:[#allocation2 + $0x10] sm:$0xff] %vm129_vm1, %v175_v7 }
 0x1aa   :  { %v249_v9 = vpop.eup %248  ;;  %178 = vst.msk [vmem:[#allocation2] sm:$0xff] %vm129_vm1, %v171_v8 }
 0x1ab   :  { %v251_v10 = vpop.eup %250  ;;  %v177_v11 = vmul.f32 %v249_v9, %v320_v36 }
 0x1ac   :  { %v173_v12 = vmul.f32 %v251_v10, %v322_v38 }
 0x1ad   :  { %181 = vst.msk [vmem:[#allocation2 + $0x18] sm:$0xff] %vm129_vm1, %v177_v11 }
 0x1ae   :  { %179 = vst.msk [vmem:[#allocation2 + $0x8] sm:$0xff] %vm129_vm1, %v173_v12 }
 0x1af   :  { %263 = shalt.err (!%p260_p4)
}
 0x1b0   :  { %s264_s28 = scalar_lea.hbm %s353_s3, 512 }
 0x1b1   :  { %p265_p5 = scmp.ne.s32.totalorder %s353_s3, %s264_s28  ;;  %p268_p6 = scmp.lt.u32.totalorder %s264_s28, %s353_s3 }
 0x1b3   :  { %p270_p7 = pnand %p268_p6, %p265_p5 }
 0x1b5   :  { %273 = shalt.err (!%p270_p7)
}
 0x1b6   :  { %s277_s6 = smov 128   ;;  %s278_s7 = smov 8  }
 0x1b7   :  { %193 = dma.vmem_to_hbm [thread:$0]  %s188_s2, 512, %s353_s3, [#allocation3], %s277_s6, %s277_s6, %s278_s7  }
 0x1b8   :  { %274 = dma.done.wait [#allocation3], 512  }
 0x1b9   :  { %275 = vsyncadd [#allocation3], 4294966784 }
 0x1ba   :  { %197 = vsyncpa [#allocation3], 1 }

// kernel: _lambda_.16
= control target key start
LH: loop header
LB: loop body
LE: loop exit
PB: predicated region body
PF: predicated region fallthrough
CT: control target
= control target key end

     0   :  { %s2923_s5 = smov 0   ;;  %s2927_s21 = smov 0   ;;  %s3217_s0 = inlined_call_operand.vmem [shape: f32[2,16,32], index: 0, kind: input, shape index: {}]   ;;  %s3218_s1 = inlined_call_operand.vmem [shape: bf16[2,128,32], index: 1, kind: input, shape index: {}]   ;;  %s3219_s2 = inlined_call_operand.vmem [shape: s32[2,16,8,1], index: 2, kind: input, shape index: {}]   ;;  %s3220_s3 = inlined_call_operand.vmem [shape: bf16[2,16,64], index: 3, kind: input, shape index: {}]   ;;  %s3221_s4 = inlined_call_operand.vmem [shape: f32[2,16,1], index: 4, kind: input, shape index: {}]   ;;  %s3222_s5 = inlined_call_operand.vmem [shape: f32[2,16,8,1], index: 5, kind: input, shape index: {}]   ;;  %s3223_s6 = inlined_call_operand.vmem [shape: f32[2,16,8,1], index: 6, kind: input, shape index: {}]   ;;  %s3224_s7 = inlined_call_operand.vmem [shape: bf16[32,32], index: 7, kind: input, shape index: {}]   ;;  %s3225_s8 = inlined_call_operand.vmem [shape: bf16[32,32], index: 8, kind: input, shape index: {}]   ;;  %s3226_s9 = inlined_call_operand.vmem [shape: bf16[32,64], index: 9, kind: input, shape index: {}]   ;;  %s3227_s10 = inlined_call_operand.vmem [shape: bf16[64,64], index: 10, kind: input, shape index: {}]   ;;  %s3228_s11 = inlined_call_operand.vmem [shape: bf16[32,32], index: 11, kind: input, shape index: {}]   ;;  %s3229_s12 = inlined_call_operand.vmem [shape: f32[1,32], index: 12, kind: input, shape index: {}]   ;;  %s3230_s13 = inlined_call_operand.vmem [shape: f32[1,32], index: 13, kind: input, shape index: {}]   ;;  %s3231_s14 = inlined_call_operand.vmem [shape: f32[1,32], index: 14, kind: input, shape index: {}]   ;;  %s3232_s15 = inlined_call_operand.vmem [shape: f32[1,32], index: 15, kind: input, shape index: {}]   ;;  %s3233_s16 = inlined_call_operand.vmem [shape: bf16[32,128], index: 16, kind: input, shape index: {}]   ;;  %s3234_s17 = inlined_call_operand.vmem [shape: f32[1,128], index: 17, kind: input, shape index: {}]   ;;  %s3235_s18 = inlined_call_operand.vmem [shape: bf16[128,32], index: 18, kind: input, shape index: {}]   ;;  %s3236_s19 = inlined_call_operand.vmem [shape: f32[1,32], index: 19, kind: input, shape index: {}]   ;;  %s3237_s20 = inlined_call_operand.vmem [shape: f32[2,16,32], index: 20, kind: output, shape index: {}]  }
   0x1   :  { %3240 = sst [smem:[#allocation6_spill]] %s3217_s0  ;;  %s2929_s22 = smov 0  }
   0x2   :  { %3241 = sst [smem:[#allocation7_spill]] %s3218_s1  ;;  %s2925_s1 = smov 0  }
   0x3   :  { %3242 = sst [smem:[#allocation8_spill]] %s3219_s2  ;;  %s2931_s23 = smov 0  }
   0x4   :  { %3243 = sst [smem:[#allocation9_spill]] %s3220_s3 }
   0x5   :  { %3244 = sst [smem:[#allocation10_spill]] %s3221_s4 }
   0x6 LB: > { %3245 = sst [smem:[#allocation2_spill]] %s2803_s21  ;;  %s39_s2 = sadd.s32 1, %s2803_s21  ;;  %s2811_s23 = sphi %s2931_s23, %s30_s23   ;;  %s2807_s22 = sphi %s2929_s22, %s3257_s22   ;;  %s2803_s21 = sphi %s2927_s21, %s3256_s21   ;;  %s2799_s1 = sphi %s2925_s1, %s3255_s1   ;;  %s2795_s5 = sphi %s2923_s5, %s3254_s5  }
   0x7   : > { %3246 = sst [smem:[#allocation3_spill]] %s2807_s22  ;;  %s42_s24 = sadd.s32 1, %s2807_s22 }
   0x8   : > { %p40_p0 = scmp.ge.s32.totalorder %s39_s2, 2  ;;  %p2413_p1 = scmp.ge.s32.totalorder %s2811_s23, 1 }
   0x9   : > { %p674_p2 = scmp.lt.s32.totalorder %s2811_s23, 5 }
   0xa   : > { %s3259_s2 = smov (%p40_p0, %s39_s2), 0  ;;  %s3261_s24 = smov (!%p40_p0, %s42_s24), %s2807_s22 }
   0xb   : > { %3247 = sst [smem:[#allocation4_spill]] %s3259_s2  ;;  %p675_p3 = pnand %p2413_p1, %p674_p2 }
   0xc   : > { %p44_p4 = scmp.ge.s32.totalorder %s3261_s24, 2  ;;  %p787_p5 = scmp.lt.s32.totalorder (!%p675_p3), %s2799_s1, 1  ;;  %v2813_v0 = vmov (!%p675_p3), 0   ;;  %v2707_v18 = vld [vmem:[%s3227_s10] sm:$0xff] (!%p675_p3)   ;;  %v874_v20 = vlaneseq (!%p675_p3)  ;;  %vm960_vm4 = vcmask (!%p675_p3), 130048   ;;  %v2814_v26 = vmov (!%p675_p3), 0.0  }
   0xd   : > { %678 = sbr.rel (%p675_p3) target bundleno = 2240 (0x8c0), region = 100  ;;  %s2416_s3 = sshll.u32 (!%p675_p3), %s2795_s5, 3  ;;  %2685 = vset.pattern.permute.xlu1 (!%p675_p3), %v2813_v0  ;;  %2684 = vset.pattern.permute.xlu0 (!%p675_p3), %v2813_v0  ;;  %v2709_v19 = vld [vmem:[%s3226_s9] sm:$0xff] (!%p675_p3)   ;;  %v2708_v35 = vld [vmem:[%s3227_s10 + $0x8] sm:$0xff] (!%p675_p3)   ;;  %v2710_v41 = vld [vmem:[%s3227_s10 + $0x10] sm:$0xff] (!%p675_p3)   ;;  %vm1074_vm9 = vcmask (!%p675_p3), 261120  }
   0xe   : > { %s3263_s24 = smov (%p44_p4, %s3261_s24), 0  ;;  %p798_p6 = scmp.lt.s32.totalorder (!%p675_p3), %s2416_s3, 15  ;;  %2555 = vmatprep.subr.bf16.mxu1 (!%p675_p3), %v2709_v19  ;;  %v875_v21 = vand.u32 (!%p675_p3), 127, %v874_v20  ;;  %v2711_v45 = vld [vmem:[%s3226_s9 + $0x8] sm:$0xff] (!%p675_p3)   ;;  %v2712_v46 = vld [vmem:[%s3227_s10 + $0x18] sm:$0xff] (!%p675_p3)   ;;  %vm1188_vm10 = vcmask (!%p675_p3), 523264  }
   0xf   : > { %3248 = sst [smem:[#allocation5_spill]] %s3263_s24  ;;  %s3249_s29 = sld [smem:[#allocation8_spill]] (!%p675_p3)  ;;  %2556 = vmatpush3.bf16.msra.mxu1 (!%p675_p3), %v2709_v19  ;;  %v2715_v57 = vld [vmem:[%s3225_s8] sm:$0xff] (!%p675_p3)   ;;  %v2718_v59 = vld [vmem:[%s3225_s8 + $0x8] sm:$0xff] (!%p675_p3)   ;;  %vm2815_vm11 = vmmov (!%p675_p3), 0   ;;  %vm1886_vm12 = vcmask (!%p675_p3), 1041409  }
  0x10   : > { %s3250_s22 = sld [smem:[#allocation9_spill]] (!%p675_p3)  ;;  %2557 = vmatprep.subr.bf16.mxu1 (!%p675_p3), %v2711_v45  ;;  %s3251_s24 = sld [smem:[#allocation7_spill]] (!%p675_p3)  ;;  %vm1888_vm13 = vcmask (!%p675_p3), 1042434   ;;  %vm1890_vm14 = vcmask (!%p675_p3), 1043459   ;;  %vm1892_vm15 = vcmask (!%p675_p3), 1044484  }
  0x11   : > { %p789_p7 = scmp.lt.s32.totalorder (!%p675_p3), %s2795_s5, 1 }
  0x13   : > { %2558 = vmatpush3.bf16.msra.mxu1 (!%p675_p3), %v2711_v45 }
  0x14   : > { %s3265_s1 = smov (!%p787_p5, %s2799_s1), 1  ;;  %s3267_s3 = smov (!%p798_p6, %s2416_s3), 15 }
  0x15   : > { %s2417_s25 = sshll.u32 %s3265_s1, 4  ;;  %s2497_s0 = sshll.u32 %s3265_s1, 3 }
  0x16   : > { %s2959_s26 = sadd.s32 %s2417_s25, %s3267_s3  ;;  %s819_s21 = scalar_lea.vmem %s3250_s22, %s2497_s0 }
  0x17   : > { %s2421_s27 = sshll.u32 %s2959_s26, 3  ;;  %v2706_v7 = vld [vmem:[%s819_s21] sm:$0xff]   ;;  %s2418_s25 = sshll.u32 %s2959_s26, 2 }
  0x18   : > { %s813_s30 = scalar_lea.vmem %s3249_s29, %s2421_s27  ;;  %2545 = vmatprep.subr.bf16.mxu0 %v2706_v7  ;;  %s846_s4 = scalar_lea.vmem %s3223_s6, %s2421_s27 }
  0x19   : > { %v868_v1 = vld [vmem:[%s813_s30 + $0x10] sm:$0xff]  ;;  %v866_v2 = vld [vmem:[%s813_s30] sm:$0xff]  ;;  %v869_v3 = vld [vmem:[%s813_s30 + $0x18] sm:$0xff]  ;;  %2546 = vmatpush3.bf16.msra.mxu0 %v2706_v7  ;;  %s803_s27 = scalar_lea.vmem %s3251_s24, %s2418_s25  ;;  %s3269_s5 = smov (!%p789_p7, %s2795_s5), 1 }
  0x1a   : > { %883 = vperm.xlu1 %2685, %v868_v1   ;;  %877 = vperm.xlu0 %2684, %v866_v2   ;;  %v867_v4 = vld [vmem:[%s813_s30 + $0x8] sm:$0xff]  ;;  %v870_v6 = vld [vmem:[%s813_s30 + $0x20] sm:$0xff]  ;;  %v873_v8 = vld [vmem:[%s813_s30 + $0x38] sm:$0xff]  ;;  %s2414_s29 = sshll.u32 %s3265_s1, 1  ;;  %s2817_s26 = smov 96  }
  0x1b   : > { %v871_v5 = vld [vmem:[%s813_s30 + $0x28] sm:$0xff]  ;;  %v872_v9 = vld [vmem:[%s813_s30 + $0x30] sm:$0xff]  ;;  %v1282_v11 = vld [vmem:[%s846_s4] sm:$0xff]  ;;  %2567 = vmatprep.subr.bf16.mxu0 %v2707_v18  ;;  %s792_s30 = sadd.s32 %s2414_s29, %s3269_s5  ;;  %s3252_s5 = sld [smem:[#allocation6_spill]] }
  0x1c   : > { %v1283_v10 = vld [vmem:[%s846_s4 + $0x8] sm:$0xff]  ;;  %v1285_v12 = vld [vmem:[%s846_s4 + $0x18] sm:$0xff]  ;;  %v1284_v13 = vld [vmem:[%s846_s4 + $0x10] sm:$0xff]  ;;  %s3024_s25 = sshll.u32 %s792_s30, 3 }
  0x1d   : > { %v1287_v14 = vld [vmem:[%s846_s4 + $0x28] sm:$0xff]  ;;  %v1286_v15 = vld [vmem:[%s846_s4 + $0x20] sm:$0xff]  ;;  %v1289_v16 = vld [vmem:[%s846_s4 + $0x38] sm:$0xff]  ;;  %s855_s28 = scalar_lea.vmem %s3237_s20, %s3024_s25 }
  0x1e   : > { %886 = vperm.xlu1 %2685, %v869_v3   ;;  %880 = vperm.xlu0 %2684, %v867_v4   ;;  %v1288_v17 = vld [vmem:[%s846_s4 + $0x30] sm:$0xff]  ;;  %v2713_v47 = vld [vmem:[%s803_s27] sm:$0xff]   ;;  %v2714_v48 = vld [vmem:[%s803_s27 + $0x8] sm:$0xff]   ;;  %s3253_s4 = sld [smem:[#allocation10_spill]] }
  0x1f   : > { %2559 = vmatprep.mubr.msk.bf16.mxu1 %vm1074_vm9, %v2713_v47  ;;  %v2716_v49 = vld [vmem:[%s803_s27 + $0x10] sm:$0xff]   ;;  %v2717_v50 = vld [vmem:[%s803_s27 + $0x18] sm:$0xff]  }
  0x20   : > { %2560 = vmatmul.mubr.msk.bf16.vlgmr.msra.gmra.mrb[0].mxu1 %vm1074_vm9, %v2714_v48 }
  0x21   : > { %2563 = vmatprep.mubr.msk.bf16.mxu1 %vm1074_vm9, %v2716_v49  ;;  %s794_s21 = scalar_lea.vmem %s3252_s5, %s3024_s25 }
  0x22   : > { %892 = vperm.xlu1 %2685, %v871_v5   ;;  %889 = vperm.xlu0 %2684, %v870_v6   ;;  %v3035_v1 = vld [vmem:[%s794_s21] sm:$0xff] }
  0x23   : > { %v1346_v2 = vpack.c.bf16 %v3035_v1, %v3035_v1 }
  0x24   : > { %s827_s5 = scalar_lea.vmem %s3253_s4, %s3024_s25 }
  0x26   : > { %898 = vperm.xlu1 %2685, %v873_v8   ;;  %895 = vperm.xlu0 %2684, %v872_v9  }
  0x28   : > { %2564 = vmatmul.mubr.msk.bf16.gmra.mrb[4].mxu1 %vm1074_vm9, %v2717_v50 }
  0x2a   : > { %1297 = vperm.xlu1 %2685, %v1283_v10   ;;  %1292 = vperm.xlu0 %2684, %v1282_v11   ;;  %v2719_v11 = vld [vmem:[%s3224_s7] sm:$0xff]  }
  0x2b   : > { %2591 = vmatprep.subr.bf16.mxu1 %v2719_v11 }
  0x2c   : > { %2592 = vmatpush3.bf16.msra.mxu1 %v2719_v11 }
  0x2e   : > { %1307 = vperm.xlu1 %2685, %v1285_v12   ;;  %1302 = vperm.xlu0 %2684, %v1284_v13   ;;  %v2720_v12 = vld [vmem:[%s3224_s7 + $0x8] sm:$0xff]  }
  0x2f   : > { %2593 = vmatprep.subr.bf16.mxu1 %v2720_v12 }
  0x30   : > { %2594 = vmatpush3.bf16.msra.mxu1 %v2720_v12 }
  0x31   : > { %2619 = vmatprep.subr.bf16.mxu1 %v2814_v26 }
  0x32   : > { %1317 = vperm.xlu1 %2685, %v1287_v14   ;;  %1312 = vperm.xlu0 %2684, %v1286_v15  }
  0x36   : > { %1327 = vperm.xlu1 %2685, %v1289_v16   ;;  %1322 = vperm.xlu0 %2684, %v1288_v17  }
  0x99   : > { %v884_v22 = vpop.permute.xlu1 %883  ;;  %v878_v23 = vpop.permute.xlu0 %877 }
  0x9a   : > { %vm902_vm0 = vcmp.eq.s32.totalorder %v884_v22, %v875_v21  ;;  %vm900_vm1 = vcmp.eq.s32.totalorder %v878_v23, %v875_v21 }
  0x9b   : > { %v2433_v27 = vsel %vm902_vm0, 1.0, %v2814_v26  ;;  %v2431_v28 = vsel %vm900_vm1, 1.0, %v2814_v26  ;;  %vm1894_vm0 = vcmask 1045509   ;;  %vm1896_vm1 = vcmask 1046534  }
  0x9d   : > { %v887_v24 = vpop.permute.xlu1 %886  ;;  %v881_v25 = vpop.permute.xlu0 %880 }
  0x9e   : > { %vm903_vm2 = vcmp.eq.s32.totalorder %v887_v24, %v875_v21  ;;  %vm901_vm3 = vcmp.eq.s32.totalorder %v881_v25, %v875_v21 }
  0x9f   : > { %v2434_v29 = vsel %vm903_vm2, 1.0, %v2814_v26  ;;  %v2432_v30 = vsel %vm901_vm3, 1.0, %v2814_v26  ;;  %vm1898_vm2 = vcmask 1047559  }
  0xa0   : > { %v2499_v31 = vpack.c.bf16 %v2434_v29, %v2433_v27  ;;  %v2498_v32 = vpack.c.bf16 %v2432_v30, %v2431_v28 }
  0xa1   : > { %v893_v33 = vpop.permute.xlu1 %892  ;;  %v890_v34 = vpop.permute.xlu0 %889 }
  0xa2   : > { %vm905_vm5 = vcmp.eq.s32.totalorder %v893_v33, %v875_v21  ;;  %vm904_vm6 = vcmp.eq.s32.totalorder %v890_v34, %v875_v21  ;;  %2547 = vmatprep.mubr.msk.bf16.mxu0 %vm960_vm4, %v2498_v32 }
  0xa3   : > { %v2436_v36 = vsel %vm905_vm5, 1.0, %v2814_v26  ;;  %v2435_v37 = vsel %vm904_vm6, 1.0, %v2814_v26  ;;  %2548 = vmatmul.mubr.msk.bf16.vlgmr.msra.gmra.mrb[0].mxu0 %vm960_vm4, %v2499_v31 }
  0xa4   : > { %v2500_v38 = vpack.c.bf16 %v2436_v36, %v2435_v37  ;;  %2568 = vmatpush3.bf16.msra.mxu0 %v2707_v18 }
  0xa5   : > { %v899_v39 = vpop.permute.xlu1 %898  ;;  %v896_v40 = vpop.permute.xlu0 %895  ;;  %2569 = vmatprep.subr.bf16.mxu0 %v2708_v35 }
  0xa6   : > { %vm907_vm7 = vcmp.eq.s32.totalorder %v899_v39, %v875_v21  ;;  %vm906_vm8 = vcmp.eq.s32.totalorder %v896_v40, %v875_v21  ;;  %2551 = vmatprep.mubr.msk.bf16.mxu0 %vm960_vm4, %v2500_v38 }
  0xa7   : > { %v2438_v42 = vsel %vm907_vm7, 1.0, %v2814_v26  ;;  %v2437_v43 = vsel %vm906_vm8, 1.0, %v2814_v26 }
  0xa8   : > { %v2501_v44 = vpack.c.bf16 %v2438_v42, %v2437_v43  ;;  %2570 = vmatpush3.bf16.msra.mxu0 %v2708_v35 }
  0xa9   : > { %2571 = vmatprep.subr.bf16.mxu0 %v2710_v41  ;;  %v1293_v13 = vpop.permute.xlu0 %1292  ;;  %v1298_v14 = vpop.permute.xlu1 %1297 }
  0xab   : > { %2552 = vmatmul.mubr.msk.bf16.gmra.mrb[4].mxu0 %vm960_vm4, %v2501_v44 }
  0xac   : > { %2572 = vmatpush3.bf16.msra.mxu0 %v2710_v41  ;;  %v2816_v41 = vmov 1966171168  }
  0xad   : > { %2573 = vmatprep.subr.bf16.mxu0 %v2712_v46  ;;  %v1303_v16 = vpop.permute.xlu0 %1302  ;;  %v1308_v19 = vpop.permute.xlu1 %1307  ;;  %v1410_v42 = vunpack.c.l.s4 %v2816_v41 }
  0xb0   : > { %2574 = vmatpush3.bf16.msra.mxu0 %v2712_v46 }
  0xb1   : > { %2583 = vmatprep.subr.bf16.mxu0 %v2814_v26  ;;  %v1313_v31 = vpop.permute.xlu0 %1312  ;;  %v1318_v37 = vpop.permute.xlu1 %1317 }
  0xf3   : > { %v2561_v3 = vpop.f32.mrb[0].mxu1 }
  0xf4   : > { %v1121_v4 = vpop.f32.mrb[1].mxu1  ;;  %v1268_v15 = vmul.f32 2.0, %v2561_v3 }
  0xf5   : > { %v2562_v5 = vpop.f32.mrb[2].mxu1  ;;  %v1266_v17 = vmul.f32 2.0, %v1121_v4 }
  0xf6   : > { %v1124_v6 = vpop.f32.mrb[3].mxu1  ;;  %v1269_v18 = vmul.f32 2.0, %v2562_v5 }
  0xf7   : > { %v1267_v22 = vmul.f32 2.0, %v1124_v6 }
  0xfb   : > { %v2565_v7 = vpop.f32.mrb[4].mxu1 }
  0xfc   : > { %v1137_v8 = vpop.f32.mrb[5].mxu1  ;;  %v1272_v36 = vmul.f32 2.0, %v2565_v7 }
  0xfd   : > { %v2566_v9 = vpop.f32.mrb[6].mxu1  ;;  %v1270_v40 = vmul.f32 2.0, %v1137_v8 }
  0xfe   : > { %v1140_v10 = vpop.f32.mrb[7].mxu1  ;;  %v1273_v44 = vmul.f32 2.0, %v2566_v9 }
  0xff   : > { %v1271_v47 = vmul.f32 2.0, %v1140_v10 }
 0x176   : > { %v2549_v51 = vpop.f32.mrb[0].mxu0 }
 0x177   : > { %v1007_v52 = vpop.f32.mrb[1].mxu0 }
 0x178   : > { %v2550_v53 = vpop.f32.mrb[2].mxu0 }
 0x179   : > { %v1153_v54 = vpack.c.bf16 %v2550_v53, %v2549_v51  ;;  %v1010_v55 = vpop.f32.mrb[3].mxu0 }
 0x17a   : > { %v1152_v56 = vpack.c.bf16 %v1010_v55, %v1007_v52  ;;  %v1323_v52 = vpop.permute.xlu0 %1322 }
 0x17c   : > { %2575 = vmatprep.mubr.msk.bf16.mxu0 %vm1188_vm10, %v1152_v56 }
 0x17d   : > { %2576 = vmatmul.mubr.msk.bf16.vlgmr.msra.gmra.mrb[8].mxu0 %vm1188_vm10, %v1153_v54 }
 0x17e   : > { %2584 = vmatpush3.bf16.msra.mxu0 %v2715_v57  ;;  %v2553_v58 = vpop.f32.mrb[4].mxu0  ;;  %v1411_v57 = vunpack.c.0.s8 %v1410_v42 }
 0x17f   : > { %v1023_v60 = vpop.f32.mrb[5].mxu0  ;;  %2585 = vmatprep.subr.bf16.mxu0 %v2814_v26 }
 0x180   : > { %v2554_v61 = vpop.f32.mrb[6].mxu0 }
 0x181   : > { %v1155_v62 = vpack.c.bf16 %v2554_v61, %v2553_v58  ;;  %v1026_v63 = vpop.f32.mrb[7].mxu0 }
 0x182   : > { %v1154_v0 = vpack.c.bf16 %v1026_v63, %v1023_v60  ;;  %2586 = vmatpush3.bf16.msra.mxu0 %v2718_v59  ;;  %v1328_v63 = vpop.permute.xlu1 %1327 }
 0x183   : > { %2603 = vmatprep.subr.bf16.mxu0 %v2814_v26 }
 0x184   : > { %2579 = vmatprep.mubr.msk.bf16.mxu0 %vm1188_vm10, %v1154_v0 }
 0x185   : > { %2580 = vmatmul.mubr.msk.bf16.gmra.mrb[12].mxu0 %vm1188_vm10, %v1155_v62  ;;  %v1413_v62 = vshrl.u32 %v874_v20, 7 }
 0x186   : > { %2587 = vmatprep.mubr.msk.bf16.mxu0 %vm2815_vm11, %v2814_v26 }
 0x187   : > { %v1414_v9 = vsub.s32 %v1411_v57, %v1413_v62 }
 0x18d   : > { %2588 = vmatmul.mubr.msk.bf16.vlgmr.msra.gmra.mrb[16].mxu0 %vm1074_vm9, %v1346_v2 }
 0x18e   : > { %2607 = vmatprep.mubr.msk.bf16.mxu0 %vm2815_vm11, %v2814_v26 }
 0x250   : > { %v2577_v21 = vpop.f32.mrb[8].mxu0 }
 0x251   : > { %v1276_v23 = vadd.f32 %v2577_v21, %v1268_v15  ;;  %v1235_v24 = vpop.f32.mrb[9].mxu0 }
 0x252   : > { %v1274_v25 = vadd.f32 %v1266_v17, %v1235_v24  ;;  %v2578_v27 = vpop.f32.mrb[10].mxu0 }
 0x253   : > { %v1332_v28 = vmul.f32 %v1303_v16, %v1276_v23  ;;  %v1277_v29 = vadd.f32 %v2578_v27, %v1269_v18  ;;  %v1238_v30 = vpop.f32.mrb[11].mxu0  ;;  %v1467_v23 = vsub.s32 0, %v1413_v62 }
 0x254   : > { %v1330_v32 = vmul.f32 %v1293_v13, %v1274_v25  ;;  %v1275_v33 = vadd.f32 %v1267_v22, %v1238_v30 }
 0x255   : > { %v1340_v34 = vpack.c.bf16 %v1332_v28, %v1332_v28  ;;  %v1333_v35 = vmul.f32 %v1308_v19, %v1277_v29 }
 0x256   : > { %v1338_v38 = vpack.c.bf16 %v1330_v32, %v1330_v32  ;;  %v1331_v39 = vmul.f32 %v1298_v14, %v1275_v33 }
 0x257   : > { %v1341_v43 = vpack.c.bf16 %v1333_v35, %v1333_v35  ;;  %v3049_v48 = vunpack.c.l.bf16 %v1340_v34 }
 0x258   : > { %v1339_v45 = vpack.c.bf16 %v1331_v39, %v1331_v39  ;;  %v2581_v46 = vpop.f32.mrb[12].mxu0  ;;  %v1457_v53 = vunpack.c.l.bf16 %v1338_v38 }
 0x259   : > { %v3051_v49 = vunpack.c.l.bf16 %v1341_v43  ;;  %v1280_v50 = vadd.f32 %v2581_v46, %v1272_v36  ;;  %v1251_v51 = vpop.f32.mrb[13].mxu0 }
 0x25a   : > { %v1458_v54 = vunpack.c.l.bf16 %v1339_v45  ;;  %v1278_v55 = vadd.f32 %v1270_v40, %v1251_v51  ;;  %v2582_v56 = vpop.f32.mrb[14].mxu0 }
 0x25b   : > { %v1336_v58 = vmul.f32 %v1323_v52, %v1280_v50  ;;  %v1281_v59 = vadd.f32 %v2582_v56, %v1273_v44  ;;  %v1254_v60 = vpop.f32.mrb[15].mxu0  ;;  %v2686_v61 = vpack.i.bf16 %v3051_v49, %v3049_v48 }
 0x25c   : > { %v1334_v0 = vmul.f32 %v1313_v31, %v1278_v55  ;;  %v1279_v2 = vadd.f32 %v1271_v47, %v1254_v60  ;;  %v2691_v3 = vpack.i.bf16 %v1458_v54, %v1457_v53 }
 0x25d   : > { %v1344_v4 = vpack.c.bf16 %v1336_v58, %v1336_v58  ;;  %v1337_v5 = vmul.f32 %v1328_v63, %v1281_v59  ;;  %2687 = vrot.lane.b32.xlu1 %v2686_v61, %s2817_s26 }
 0x25e   : > { %v1342_v6 = vpack.c.bf16 %v1334_v0, %v1334_v0  ;;  %v1335_v7 = vmul.f32 %v1318_v37, %v1279_v2  ;;  %2692 = vrot.lane.b32.xlu0 %v2691_v3, %s2817_s26 }
 0x25f   : > { %v1345_v8 = vpack.c.bf16 %v1337_v5, %v1337_v5  ;;  %v1463_v12 = vunpack.c.l.bf16 %v1344_v4 }
 0x260   : > { %v1343_v10 = vpack.c.bf16 %v1335_v7, %v1335_v7  ;;  %v1400_v11 = vpop.f32.mrb[16].mxu0  ;;  %v1461_v20 = vunpack.c.l.bf16 %v1342_v6 }
 0x261   : > { %v1464_v13 = vunpack.c.l.bf16 %v1345_v8  ;;  %v1406_v14 = vmul.f32 0.35355338, %v1400_v11  ;;  %v2589_v15 = vpop.f32.mrb[17].mxu0 }
 0x262   : > { %v1462_v16 = vunpack.c.l.bf16 %v1343_v10  ;;  %v1403_v17 = vpop.f32.mrb[18].mxu0 }
 0x263   : > { %v1408_v18 = vcombine.high %v1406_v14, %v1406_v14  ;;  %v1415_v19 = vrot.slane %v1406_v14, %v1414_v9  ;;  %v2590_v21 = vpop.f32.mrb[19].mxu0  ;;  %v2701_v22 = vpack.i.bf16 %v1464_v13, %v1463_v12 }
 0x264   : > { %v2696_v24 = vpack.i.bf16 %v1462_v16, %v1461_v20 }
 0x265   : > { %v1422_v25 = vrot.slane %v1408_v18, %v1414_v9  ;;  %v1423_v27 = vcombine.high %v1415_v19, %v1415_v19  ;;  %v1431_v28 = vrot.slane %v1415_v19, %v1414_v9  ;;  %2702 = vrot.lane.b32.xlu1 %v2701_v22, %s2817_s26 }
 0x266   : > { %2697 = vrot.lane.b32.xlu0 %v2696_v24, %s2817_s26 }
 0x267   : > { %v1424_v29 = vcombine.high %v1422_v25, %v1422_v25  ;;  %v1438_v30 = vrot.slane %v1422_v25, %v1414_v9  ;;  %v1445_v31 = vrot.slane %v1423_v27, %v1414_v9  ;;  %v1453_v32 = vcombine.high %v1431_v28, %v1431_v28 }
 0x268   : > { %v1468_v33 = vrot.slane %v1431_v28, %v1467_v23 }
 0x269   : > { %v1452_v34 = vrot.slane %v1424_v29, %v1414_v9  ;;  %v1454_v35 = vcombine.high %v1438_v30, %v1438_v30  ;;  %v1455_v36 = vcombine.high %v1445_v31, %v1445_v31  ;;  %v1472_v37 = vrot.slane %v1445_v31, %v1467_v23 }
 0x26a   : > { %v1476_v38 = vrot.slane %v1453_v32, %v1467_v23  ;;  %v1484_v39 = vrot.slane %v1438_v30, %v1467_v23  ;;  %v1505_v40 = vmul.f32 %v1468_v33, %v1457_v53 }
 0x26b   : > { %v1456_v41 = vcombine.high %v1452_v34, %v1452_v34  ;;  %v1480_v42 = vrot.slane %v1455_v36, %v1467_v23  ;;  %v1488_v43 = vrot.slane %v1452_v34, %v1467_v23  ;;  %v1492_v44 = vrot.slane %v1454_v35, %v1467_v23 }
 0x26c   : > { %v1507_v45 = vmul.f32 %v1476_v38, %v3049_v48  ;;  %v1506_v46 = vmul.f32 %v1472_v37, %v1458_v54  ;;  %v1509_v47 = vmul.f32 %v1484_v39, %v1461_v20  ;;  %v2721_v48 = vld [vmem:[%s3228_s11] sm:$0xff]  }
 0x26d   : > { %v1508_v50 = vmul.f32 %v1480_v42, %v3051_v49  ;;  %v1510_v51 = vmul.f32 %v1488_v43, %v1462_v16  ;;  %v1496_v52 = vrot.slane %v1456_v41, %v1467_v23  ;;  %v1511_v55 = vmul.f32 %v1492_v44, %v1463_v12  ;;  %2604 = vmatpush3.bf16.msra.mxu0 %v2721_v48  ;;  %v2722_v49 = vld [vmem:[%s3228_s11 + $0x8] sm:$0xff]  }
 0x26e   : > { %v1513_v56 = vpack.c.bf16 %v1506_v46, %v1505_v40  ;;  %2605 = vmatprep.subr.bf16.mxu0 %v2814_v26 }
 0x26f   : > { %v1514_v57 = vpack.c.bf16 %v1508_v50, %v1507_v45  ;;  %v1515_v58 = vpack.c.bf16 %v1510_v51, %v1509_v47  ;;  %v1512_v59 = vmul.f32 %v1496_v52, %v1464_v13 }
 0x270   : > { %2595 = vmatprep.mubr.msk.bf16.mxu1 %vm1074_vm9, %v1513_v56 }
 0x271   : > { %2596 = vmatmul.mubr.msk.bf16.vlgmr.msra.gmra.mrb[8].mxu1 %vm1074_vm9, %v1514_v57  ;;  %v1516_v53 = vpack.c.bf16 %v1512_v59, %v1511_v55  ;;  %2606 = vmatpush3.bf16.msra.mxu0 %v2722_v49 }
 0x272   : > { %2599 = vmatprep.mubr.msk.bf16.mxu1 %vm1074_vm9, %v1515_v58  ;;  %2611 = vmatprep.subr.bf16.mxu0 %v2814_v26 }
 0x279   : > { %2600 = vmatmul.mubr.msk.bf16.gmra.mrb[12].mxu1 %vm1074_vm9, %v1516_v53 }
 0x27a   : > { %2635 = vmatprep.mubr.msk.bf16.mxu1 %vm2815_vm11, %v2814_v26 }
 0x344   : > { %v2597_v54 = vpop.f32.mrb[8].mxu1 }
 0x345   : > { %v1624_v60 = vsel %vm1074_vm9, %v2597_v54, -inf  ;;  %v1579_v61 = vpop.f32.mrb[9].mxu1 }
 0x346   : > { %v1625_v62 = vrot.slane %v1624_v60, 4  ;;  %v1610_v63 = vsel %vm1074_vm9, %v1579_v61, -inf  ;;  %v2598_v0 = vpop.f32.mrb[10].mxu1 }
 0x347   : > { %v1611_v2 = vrot.slane %v1610_v63, 4  ;;  %v1631_v3 = vsel %vm1074_vm9, %v2598_v0, -inf  ;;  %v1582_v4 = vpop.f32.mrb[11].mxu1 }
 0x348   : > { %v1626_v5 = vmax.f32 %v1624_v60, %v1625_v62  ;;  %v1632_v6 = vrot.slane %v1631_v3, 4  ;;  %v1617_v7 = vsel %vm1074_vm9, %v1582_v4, -inf }
 0x349   : > { %v1612_v8 = vmax.f32 %v1610_v63, %v1611_v2  ;;  %v1618_v9 = vrot.slane %v1617_v7, 4 }
 0x34a   : > { %v1627_v10 = vrot.slane %v1626_v5, 2  ;;  %v1633_v11 = vmax.f32 %v1631_v3, %v1632_v6 }
 0x34b   : > { %v1613_v12 = vrot.slane %v1612_v8, 2  ;;  %v1619_v13 = vmax.f32 %v1617_v7, %v1618_v9 }
 0x34c   : > { %v1628_v14 = vmax.f32 %v1626_v5, %v1627_v10  ;;  %v1634_v15 = vrot.slane %v1633_v11, 2  ;;  %v2601_v20 = vpop.f32.mrb[12].mxu1 }
 0x34d   : > { %v1614_v16 = vmax.f32 %v1612_v8, %v1613_v12  ;;  %v1620_v17 = vrot.slane %v1619_v13, 2  ;;  %v1652_v18 = vsel %vm1074_vm9, %v2601_v20, -inf  ;;  %v1595_v19 = vpop.f32.mrb[13].mxu1 }
 0x34e   : > { %v1629_v21 = vrot.slane %v1628_v14, 1  ;;  %v1635_v22 = vmax.f32 %v1633_v11, %v1634_v15  ;;  %v1653_v23 = vrot.slane %v1652_v18, 4  ;;  %v1638_v24 = vsel %vm1074_vm9, %v1595_v19, -inf  ;;  %v2602_v25 = vpop.f32.mrb[14].mxu1 }
 0x34f   : > { %v1615_v27 = vrot.slane %v1614_v16, 1  ;;  %v1621_v28 = vmax.f32 %v1619_v13, %v1620_v17  ;;  %v1639_v29 = vrot.slane %v1638_v24, 4  ;;  %v1659_v30 = vsel %vm1074_vm9, %v2602_v25, -inf  ;;  %v1598_v31 = vpop.f32.mrb[15].mxu1 }
 0x350   : > { %v1630_v32 = vmax.f32 %v1628_v14, %v1629_v21  ;;  %v1636_v33 = vrot.slane %v1635_v22, 1  ;;  %v1654_v34 = vmax.f32 %v1652_v18, %v1653_v23  ;;  %v1660_v35 = vrot.slane %v1659_v30, 4 }
 0x351   : > { %v1616_v36 = vmax.f32 %v1614_v16, %v1615_v27  ;;  %v1622_v37 = vrot.slane %v1621_v28, 1  ;;  %v1640_v38 = vmax.f32 %v1638_v24, %v1639_v29  ;;  %v1645_v39 = vsel %vm1074_vm9, %v1598_v31, -inf }
 0x352   : > { %v1668_v40 = vsub.f32 %v2597_v54, %v1630_v32  ;;  %v1637_v41 = vmax.f32 %v1635_v22, %v1636_v33  ;;  %v1655_v42 = vrot.slane %v1654_v34, 2  ;;  %v1661_v43 = vmax.f32 %v1659_v30, %v1660_v35 }
 0x353   : > { %v1666_v44 = vsub.f32 %v1579_v61, %v1616_v36  ;;  %v1623_v45 = vmax.f32 %v1621_v28, %v1622_v37  ;;  %v1641_v46 = vrot.slane %v1640_v38, 2  ;;  %v1646_v47 = vrot.slane %v1645_v39, 4 }
 0x354   : > { %v1678_v50 = vmul.f32 1.442695, %v1668_v40  ;;  %v1669_v51 = vsub.f32 %v2598_v0, %v1637_v41  ;;  %v1656_v52 = vmax.f32 %v1654_v34, %v1655_v42  ;;  %v1662_v55 = vrot.slane %v1661_v43, 2 }
 0x355   : > { %v1674_v56 = vmul.f32 1.442695, %v1666_v44  ;;  %v1667_v57 = vsub.f32 %v1582_v4, %v1623_v45  ;;  %v1642_v58 = vmax.f32 %v1640_v38, %v1641_v46  ;;  %v1647_v59 = vmax.f32 %v1645_v39, %v1646_v47 }
 0x356   : > { %2733 = vpow2.f32 %v1678_v50  ;;  %v1680_v53 = vmul.f32 1.442695, %v1669_v51  ;;  %v1657_v48 = vrot.slane %v1656_v52, 1  ;;  %v1663_v49 = vmax.f32 %v1661_v43, %v1662_v55 }
 0x357   : > { %2735 = vpow2.f32 %v1674_v56  ;;  %v1676_v54 = vmul.f32 1.442695, %v1667_v57  ;;  %v1643_v60 = vrot.slane %v1642_v58, 1  ;;  %v1648_v62 = vrot.slane %v1647_v59, 2 }
 0x358   : > { %2737 = vpow2.f32 %v1680_v53  ;;  %v1658_v61 = vmax.f32 %v1656_v52, %v1657_v48  ;;  %v1664_v63 = vrot.slane %v1663_v49, 1 }
 0x359   : > { %2739 = vpow2.f32 %v1676_v54  ;;  %v1644_v2 = vmax.f32 %v1642_v58, %v1643_v60  ;;  %v1649_v0 = vmax.f32 %v1647_v59, %v1648_v62 }
 0x35a   : > { %v1672_v3 = vsub.f32 %v2601_v20, %v1658_v61  ;;  %v1665_v5 = vmax.f32 %v1663_v49, %v1664_v63 }
 0x35b   : > { %v1670_v6 = vsub.f32 %v1595_v19, %v1644_v2  ;;  %v1650_v4 = vrot.slane %v1649_v0, 1 }
 0x35c   : > { %v1686_v7 = vmul.f32 1.442695, %v1672_v3  ;;  %v1673_v8 = vsub.f32 %v2602_v25, %v1665_v5 }
 0x35d   : > { %v1682_v9 = vmul.f32 1.442695, %v1670_v6  ;;  %v1651_v10 = vmax.f32 %v1649_v0, %v1650_v4 }
 0x35e   : > { %2741 = vpow2.f32 %v1686_v7  ;;  %v1688_v11 = vmul.f32 1.442695, %v1673_v8 }
 0x35f   : > { %2743 = vpow2.f32 %v1682_v9  ;;  %v1671_v12 = vsub.f32 %v1598_v31, %v1651_v10 }
 0x360   : > { %v3080_v13 = vpop.eup %2733  ;;  %2745 = vpow2.f32 %v1688_v11 }
 0x361   : > { %v3082_v14 = vpop.eup %2735  ;;  %v1704_v15 = vsel %vm1074_vm9, %v3080_v13, 0.0  ;;  %v1684_v20 = vmul.f32 1.442695, %v1671_v12  ;;  %v2688_v12 = vpop.permute.xlu1 %2687 }
 0x362   : > { %v3086_v16 = vpop.eup %2737  ;;  %v1705_v17 = vrot.slane %v1704_v15, 4  ;;  %v1690_v18 = vsel %vm1074_vm9, %v3082_v14, 0.0 }
 0x363   : > { %v3090_v19 = vpop.eup %2739  ;;  %v1691_v21 = vrot.slane %v1690_v18, 4  ;;  %v1711_v22 = vsel %vm1074_vm9, %v3086_v16, 0.0  ;;  %2747 = vpow2.f32 %v1684_v20 }
 0x364   : > { %v1706_v23 = vadd.f32 %v1705_v17, %v1704_v15  ;;  %v1712_v24 = vrot.slane %v1711_v22, 4  ;;  %v1697_v25 = vsel %vm1074_vm9, %v3090_v19, 0.0  ;;  %v2693_v17 = vpop.permute.xlu0 %2692 }
 0x365   : > { %v1692_v27 = vadd.f32 %v1691_v21, %v1690_v18  ;;  %v1698_v28 = vrot.slane %v1697_v25, 4 }
 0x366   : > { %v1707_v29 = vrot.slane %v1706_v23, 2  ;;  %v1713_v30 = vadd.f32 %v1712_v24, %v1711_v22 }
 0x367   : > { %v1693_v31 = vrot.slane %v1692_v27, 2  ;;  %v1699_v32 = vadd.f32 %v1698_v28, %v1697_v25 }
 0x368   : > { %v3096_v33 = vpop.eup %2741  ;;  %v1708_v34 = vadd.f32 %v1707_v29, %v1706_v23  ;;  %v1714_v35 = vrot.slane %v1713_v30, 2  ;;  %v2689_v23 = vunpack.i.l.bf16 %v2688_v12 }
 0x369   : > { %v3098_v36 = vpop.eup %2743  ;;  %v1694_v37 = vadd.f32 %v1693_v31, %v1692_v27  ;;  %v1700_v38 = vrot.slane %v1699_v32, 2  ;;  %v1732_v39 = vsel %vm1074_vm9, %v3096_v33, 0.0  ;;  %v2694_v27 = vunpack.i.l.bf16 %v2693_v17 }
 0x36a   : > { %v3102_v40 = vpop.eup %2745  ;;  %v1709_v41 = vrot.slane %v1708_v34, 1  ;;  %v1715_v42 = vadd.f32 %v1714_v35, %v1713_v30  ;;  %v1733_v43 = vrot.slane %v1732_v39, 4  ;;  %v1718_v44 = vsel %vm1074_vm9, %v3098_v36, 0.0 }
 0x36b   : > { %v1695_v45 = vrot.slane %v1694_v37, 1  ;;  %v1701_v46 = vadd.f32 %v1700_v38, %v1699_v32  ;;  %v1719_v47 = vrot.slane %v1718_v44, 4  ;;  %v1739_v50 = vsel %vm1074_vm9, %v3102_v40, 0.0 }
 0x36c   : > { %v1710_v51 = vadd.f32 %v1709_v41, %v1708_v34  ;;  %v1716_v52 = vrot.slane %v1715_v42, 1  ;;  %v1734_v55 = vadd.f32 %v1733_v43, %v1732_v39  ;;  %v1740_v56 = vrot.slane %v1739_v50, 4  ;;  %v2703_v39 = vpop.permute.xlu1 %2702 }
 0x36d   : > { %v3108_v57 = vpop.eup %2747  ;;  %v1696_v58 = vadd.f32 %v1695_v45, %v1694_v37  ;;  %v1702_v59 = vrot.slane %v1701_v46, 1  ;;  %v1720_v53 = vadd.f32 %v1719_v47, %v1718_v44  ;;  %v2690_v31 = vunpack.i.h.bf16 %v2688_v12 }
 0x36e   : > { %2749 = vrcp.f32 %v1710_v51  ;;  %v1717_v48 = vadd.f32 %v1716_v52, %v1715_v42  ;;  %v1735_v49 = vrot.slane %v1734_v55, 2  ;;  %v1741_v54 = vadd.f32 %v1740_v56, %v1739_v50 }
 0x36f   : > { %2751 = vrcp.f32 %v1696_v58  ;;  %v1703_v60 = vadd.f32 %v1702_v59, %v1701_v46  ;;  %v1721_v62 = vrot.slane %v1720_v53, 2  ;;  %v1725_v61 = vsel %vm1074_vm9, %v3108_v57, 0.0 }
 0x370   : > { %2753 = vrcp.f32 %v1717_v48  ;;  %v1736_v63 = vadd.f32 %v1735_v49, %v1734_v55  ;;  %v1742_v2 = vrot.slane %v1741_v54, 2  ;;  %v1726_v0 = vrot.slane %v1725_v61, 4 }
 0x371   : > { %2755 = vrcp.f32 %v1703_v60  ;;  %v1722_v3 = vadd.f32 %v1721_v62, %v1720_v53  ;;  %v2695_v35 = vunpack.i.h.bf16 %v2693_v17  ;;  %v2705_v50 = vunpack.i.h.bf16 %v2703_v39 }
 0x372   : > { %v1737_v5 = vrot.slane %v1736_v63, 1  ;;  %v1743_v6 = vadd.f32 %v1742_v2, %v1741_v54  ;;  %v1727_v4 = vadd.f32 %v1726_v0, %v1725_v61  ;;  %v2704_v55 = vunpack.i.l.bf16 %v2703_v39 }
 0x373   : > { %v1723_v7 = vrot.slane %v1722_v3, 1 }
 0x374   : > { %v1738_v8 = vadd.f32 %v1737_v5, %v1736_v63  ;;  %v1744_v9 = vrot.slane %v1743_v6, 1  ;;  %v1728_v10 = vrot.slane %v1727_v4, 2 }
 0x375   : > { %v1724_v11 = vadd.f32 %v1723_v7, %v1722_v3 }
 0x376   : > { %2757 = vrcp.f32 %v1738_v8  ;;  %v1745_v15 = vadd.f32 %v1744_v9, %v1743_v6  ;;  %v1729_v20 = vadd.f32 %v1728_v10, %v1727_v4 }
 0x377   : > { %2759 = vrcp.f32 %v1724_v11 }
 0x378   : > { %v2750_v18 = vpop.eup %2749  ;;  %2761 = vrcp.f32 %v1745_v15  ;;  %v1730_v21 = vrot.slane %v1729_v20, 1 }
 0x379   : > { %v2752_v22 = vpop.eup %2751  ;;  %v1756_v24 = vmul.f32 %v2750_v18, %v3080_v13 }
 0x37a   : > { %v2754_v25 = vpop.eup %2753  ;;  %v1754_v28 = vmul.f32 %v2752_v22, %v3082_v14  ;;  %v1731_v29 = vadd.f32 %v1730_v21, %v1729_v20  ;;  %v2698_v14 = vpop.permute.xlu0 %2697 }
 0x37b   : > { %v2756_v30 = vpop.eup %2755  ;;  %v1796_v32 = vmul.f32 %v2689_v23, %v1756_v24  ;;  %v1757_v34 = vmul.f32 %v2754_v25, %v3086_v16  ;;  %v2699_v48 = vunpack.i.l.bf16 %v2698_v14  ;;  %v2700_v0 = vunpack.i.h.bf16 %v2698_v14 }
 0x37c   : > { %v1794_v37 = vmul.f32 %v2694_v27, %v1754_v28  ;;  %v1755_v38 = vmul.f32 %v2756_v30, %v3090_v19  ;;  %2763 = vrcp.f32 %v1731_v29 }
 0x37d   : > { %v1816_v41 = vsel %vm1074_vm9, %v1796_v32, 0.0  ;;  %v1797_v42 = vmul.f32 %v2690_v31, %v1757_v34 }
 0x37e   : > { %v1817_v13 = vrot.slane %v1816_v41, 4  ;;  %v1802_v43 = vsel %vm1074_vm9, %v1794_v37, 0.0  ;;  %v1795_v44 = vmul.f32 %v2695_v35, %v1755_v38 }
 0x37f   : > { %v1803_v45 = vrot.slane %v1802_v43, 4  ;;  %v1823_v46 = vsel %vm1074_vm9, %v1797_v42, 0.0 }
 0x380   : > { %v2758_v47 = vpop.eup %2757  ;;  %v1818_v16 = vadd.f32 %v1817_v13, %v1816_v41  ;;  %v1824_v51 = vrot.slane %v1823_v46, 4  ;;  %v1809_v52 = vsel %vm1074_vm9, %v1795_v44, 0.0 }
 0x381   : > { %v2760_v19 = vpop.eup %2759  ;;  %v1804_v56 = vadd.f32 %v1803_v45, %v1802_v43  ;;  %v1810_v58 = vrot.slane %v1809_v52, 4  ;;  %v1760_v59 = vmul.f32 %v2758_v47, %v3096_v33 }
 0x382   : > { %v2762_v53 = vpop.eup %2761  ;;  %v1819_v49 = vrot.slane %v1818_v16, 2  ;;  %v1825_v54 = vadd.f32 %v1824_v51, %v1823_v46  ;;  %v1758_v60 = vmul.f32 %v2760_v19, %v3098_v36 }
 0x383   : > { %v1805_v62 = vrot.slane %v1804_v56, 2  ;;  %v1811_v61 = vadd.f32 %v1810_v58, %v1809_v52  ;;  %v1800_v63 = vmul.f32 %v2704_v55, %v1760_v59  ;;  %v1761_v2 = vmul.f32 %v2762_v53, %v3102_v40 }
 0x384   : > { %v1820_v3 = vadd.f32 %v1819_v49, %v1818_v16  ;;  %v1826_v5 = vrot.slane %v1825_v54, 2  ;;  %v1798_v6 = vmul.f32 %v2699_v48, %v1758_v60 }
 0x385   : > { %v1806_v4 = vadd.f32 %v1805_v62, %v1804_v56  ;;  %v1812_v7 = vrot.slane %v1811_v61, 2  ;;  %v1844_v8 = vsel %vm1074_vm9, %v1800_v63, 0.0  ;;  %v1801_v33 = vmul.f32 %v2705_v50, %v1761_v2 }
 0x386   : > { %v2764_v9 = vpop.eup %2763  ;;  %v1821_v10 = vrot.slane %v1820_v3, 1  ;;  %v1827_v11 = vadd.f32 %v1826_v5, %v1825_v54  ;;  %v1845_v12 = vrot.slane %v1844_v8, 4  ;;  %v1830_v36 = vsel %vm1074_vm9, %v1798_v6, 0.0 }
 0x387   : > { %v1807_v15 = vrot.slane %v1806_v4, 1  ;;  %v1813_v20 = vadd.f32 %v1812_v7, %v1811_v61  ;;  %v1831_v17 = vrot.slane %v1830_v36, 4  ;;  %v1851_v40 = vsel %vm1074_vm9, %v1801_v33, 0.0 }
 0x388   : > { %v1822_v18 = vadd.f32 %v1821_v10, %v1820_v3  ;;  %v1828_v21 = vrot.slane %v1827_v11, 1  ;;  %v1846_v22 = vadd.f32 %v1845_v12, %v1844_v8  ;;  %v1852_v23 = vrot.slane %v1851_v40, 4 }
 0x389   : > { %v1808_v24 = vadd.f32 %v1807_v15, %v1806_v4  ;;  %v1814_v25 = vrot.slane %v1813_v20, 1  ;;  %v1832_v27 = vadd.f32 %v1831_v17, %v1830_v36  ;;  %v1759_v28 = vmul.f32 %v2764_v9, %v3108_v57 }
 0x38a   : > { %v1829_v29 = vadd.f32 %v1828_v21, %v1827_v11  ;;  %v1847_v30 = vrot.slane %v1846_v22, 2  ;;  %v1853_v31 = vadd.f32 %v1852_v23, %v1851_v40  ;;  %v1860_v38 = vpack.c.bf16 %v1822_v18, %v1822_v18 }
 0x38b   : > { %v1858_v32 = vpack.c.bf16 %v1808_v24, %v1808_v24  ;;  %v1815_v34 = vadd.f32 %v1814_v25, %v1813_v20  ;;  %v1833_v35 = vrot.slane %v1832_v27, 2  ;;  %v1799_v37 = vmul.f32 %v2700_v0, %v1759_v28  ;;  %v2213_v24 = vld [vmem:[%s827_s5] sm:$0xff]  ;;  %v2724_v25 = vld [vmem:[%s3233_s16 + $0x8] sm:$0xff]  }
 0x38c   : > { %v1861_v39 = vpack.c.bf16 %v1829_v29, %v1829_v29  ;;  %v1854_v41 = vrot.slane %v1853_v31, 2  ;;  %v1848_v13 = vadd.f32 %v1847_v30, %v1846_v22  ;;  %v1880_v50 = vunpack.c.l.b16 %v1860_v38  ;;  %v2726_v28 = vld [vmem:[%s3235_s18 + $0x8] sm:$0xff]   ;;  %v2727_v29 = vld [vmem:[%s3235_s18 + $0x10] sm:$0xff]   ;;  %v2728_v30 = vld [vmem:[%s3235_s18 + $0x18] sm:$0xff]  }
 0x38d   : > { %v1859_v42 = vpack.c.bf16 %v1815_v34, %v1815_v34  ;;  %v1834_v43 = vadd.f32 %v1833_v35, %v1832_v27  ;;  %v1837_v44 = vsel %vm1074_vm9, %v1799_v37, 0.0  ;;  %v1878_v46 = vunpack.c.l.b16 %v1858_v32  ;;  %v2725_v27 = vld [vmem:[%s3235_s18] sm:$0xff]   ;;  %v2730_v32 = vld [vmem:[%s3235_s18 + $0x28] sm:$0xff]  }
 0x38e   : > { %v1838_v14 = vrot.slane %v1837_v44, 4  ;;  %v1855_v45 = vadd.f32 %v1854_v41, %v1853_v31  ;;  %v1881_v51 = vunpack.c.l.b16 %v1861_v39  ;;  %v1849_v19 = vrot.slane %v1848_v13, 1  ;;  %2620 = vmatpush3.bf16.msra.mxu1 %v2725_v27  ;;  %v2729_v31 = vld [vmem:[%s3235_s18 + $0x20] sm:$0xff]  }
 0x38f   : > { %v1879_v57 = vunpack.c.l.b16 %v1859_v42  ;;  %v1835_v47 = vrot.slane %v1834_v43, 1  ;;  %2621 = vmatprep.subr.bf16.mxu1 %v2814_v26 }
 0x390   : > { %v1839_v16 = vadd.f32 %v1838_v14, %v1837_v44  ;;  %v1856_v58 = vrot.slane %v1855_v45, 1  ;;  %v1850_v54 = vadd.f32 %v1849_v19, %v1848_v13  ;;  %v2478_v44 = vld [vmem:[%s3229_s12] ss:$0 sm:$0xff] }
 0x391   : > { %v1836_v52 = vadd.f32 %v1835_v47, %v1834_v43  ;;  %v1887_v55 = vsel %vm1886_vm12, %v1879_v57, %v1878_v46  ;;  %v2479_v46 = vld [vmem:[%s3230_s13] ss:$0 sm:$0xff] }
 0x392   : > { %v1840_v56 = vrot.slane %v1839_v16, 2  ;;  %v1889_v59 = vsel %vm1888_vm13, %v1880_v50, %v1887_v55  ;;  %v1857_v61 = vadd.f32 %v1856_v58, %v1855_v45  ;;  %v1864_v0 = vpack.c.bf16 %v1850_v54, %v1850_v54  ;;  %2622 = vmatpush3.bf16.msra.mxu1 %v2726_v28 }
 0x393   : > { %v1862_v53 = vpack.c.bf16 %v1836_v52, %v1836_v52  ;;  %v1891_v48 = vsel %vm1890_vm14, %v1881_v51, %v1889_v59  ;;  %2623 = vmatprep.subr.bf16.mxu1 %v2814_v26  ;;  %v2732_v51 = vld [vmem:[%s3235_s18 + $0x38] sm:$0xff]   ;;  %v2480_v52 = vld [vmem:[%s3234_s17] ss:$0 sm:$0xff] }
 0x394   : > { %v1841_v49 = vadd.f32 %v1840_v56, %v1839_v16  ;;  %v1865_v5 = vpack.c.bf16 %v1857_v61, %v1857_v61  ;;  %v1884_v4 = vunpack.c.l.b16 %v1864_v0  ;;  %v2731_v16 = vld [vmem:[%s3235_s18 + $0x30] sm:$0xff]  }
 0x395   : > { %v1882_v60 = vunpack.c.l.b16 %v1862_v53 }
 0x396   : > { %v1842_v62 = vrot.slane %v1841_v49, 1  ;;  %v1885_v7 = vunpack.c.l.b16 %v1865_v5  ;;  %2624 = vmatpush3.bf16.msra.mxu1 %v2727_v29 }
 0x397   : > { %v1893_v63 = vsel %vm1892_vm15, %v1882_v60, %v1891_v48  ;;  %2625 = vmatprep.subr.bf16.mxu1 %v2814_v26 }
 0x398   : > { %v1843_v2 = vadd.f32 %v1842_v62, %v1841_v49 }
 0x39a   : > { %v1863_v3 = vpack.c.bf16 %v1843_v2, %v1843_v2  ;;  %2626 = vmatpush3.bf16.msra.mxu1 %v2728_v30 }
 0x39b   : > { %2627 = vmatprep.subr.bf16.mxu1 %v2814_v26 }
 0x39c   : > { %v1883_v6 = vunpack.c.l.b16 %v1863_v3 }
 0x39e   : > { %v1895_v8 = vsel %vm1894_vm0, %v1883_v6, %v1893_v63  ;;  %2628 = vmatpush3.bf16.msra.mxu1 %v2729_v31 }
 0x39f   : > { %v1897_v33 = vsel %vm1896_vm1, %v1884_v4, %v1895_v8  ;;  %2629 = vmatprep.subr.bf16.mxu1 %v2814_v26 }
 0x3a0   : > { %v1899_v9 = vsel %vm1898_vm2, %v1885_v7, %v1897_v33 }
 0x3a1   : > { %v1900_v10 = vpack.c.b16 %v1899_v9, %v1899_v9 }
 0x3a2   : > { %2630 = vmatpush3.bf16.msra.mxu1 %v2730_v32 }
 0x3a3   : > { %2608 = vmatmul.mubr.msk.bf16.vlgmr.msra.gmra.mrb[20].mxu0 %vm1074_vm9, %v1900_v10  ;;  %2631 = vmatprep.subr.bf16.mxu1 %v2814_v26 }
 0x3a4   : > { %2615 = vmatprep.mubr.msk.bf16.mxu0 %vm2815_vm11, %v2814_v26 }
 0x3a6   : > { %2632 = vmatpush3.bf16.msra.mxu1 %v2731_v16 }
 0x3a7   : > { %2633 = vmatprep.subr.bf16.mxu1 %v2814_v26 }
 0x3aa   : > { %2634 = vmatpush3.bf16.msra.mxu1 %v2732_v51 }
 0x476   : > { %v1950_v11 = vpop.f32.mrb[20].mxu0 }
 0x477   : > { %v1956_v12 = vadd.f32 %v1950_v11, %v3035_v1  ;;  %v2609_v36 = vpop.f32.mrb[21].mxu0  ;;  %v2723_v1 = vld [vmem:[%s3233_s16] sm:$0xff]  }
 0x478   : > { %v1953_v15 = vpop.f32.mrb[22].mxu0  ;;  %2612 = vmatpush3.bf16.msra.mxu0 %v2723_v1 }
 0x479   : > { %v2610_v20 = vpop.f32.mrb[23].mxu0  ;;  %v1959_v17 = vsel %vm1074_vm9, %v1956_v12, 0.0  ;;  %2613 = vmatprep.subr.bf16.mxu0 %v2814_v26  ;;  %v2484_v26 = vld [vmem:[%s3236_s19] ss:$0 sm:$0xff] }
 0x47a   : > { %1960 = vadd.xlane.f32.xlu0 %v1959_v17  ;;  %v2493_v20 = vld [vmem:[%s3231_s14] ss:$0 sm:$0xff] }
 0x47c   : > { %2614 = vmatpush3.bf16.msra.mxu0 %v2724_v25 }
 0x507   : > { %v1961_v40 = vpop.xlane.xlu0 %1960 }
 0x508   : > { %v1963_v18 = vmul.f32 0.03125, %v1961_v40 }
 0x50a   : > { %v1964_v21 = vsub.f32 %v1956_v12, %v1963_v18  ;;  %v2494_v18 = vld [vmem:[%s3232_s15] ss:$0 sm:$0xff] }
 0x50c   : > { %v1965_v22 = vmul.f32 %v1964_v21, %v1964_v21  ;;  %v1984_v14 = vmul.f32 %v2478_v44, %v1964_v21 }
 0x50e   : > { %v1966_v23 = vsel %vm1074_vm9, %v1965_v22, 0.0 }
 0x50f   : > { %1967 = vadd.xlane.f32.xlu1 %v1966_v23 }
 0x520   : > { %2216 = vperm.xlu1 %2685, %v2213_v24  }
 0x59c   : > { %v1968_v34 = vpop.xlane.xlu1 %1967 }
 0x59d   : > { %v1969_v35 = vmul.f32 0.032258064, %v1968_v34 }
 0x59f   : > { %v1970_v37 = vadd.f32 1e-06, %v1969_v35 }
 0x5a0   : > { %v2217_v23 = vpop.permute.xlu1 %2216 }
 0x5a1   : > { %2765 = vrsqrt.f32 %v1970_v37  ;;  %vm1973_vm3 = vcmp.eq.f32.partialorder %v1970_v37, inf  ;;  %v1976_v41 = vand.u32 2147483648, %v1970_v37  ;;  %vm1975_vm4 = vcmp.eq.f32.partialorder %v1970_v37, 0.0 }
 0x5ab   : > { %v2766_v38 = vpop.eup %2765 }
 0x5ac   : > { %v1972_v39 = vmul.f32 %v2766_v38, %v1970_v37 }
 0x5ae   : > { %v1974_v42 = vsel %vm1973_vm3, %v1970_v37, %v1972_v39 }
 0x5af   : > { %v1977_v13 = vsel %vm1975_vm4, %v1976_v41, %v1974_v42 }
 0x5b0   : > { %v1985_v43 = vadd.f32 1e-06, %v1977_v13 }
 0x5b2   : > { %2767 = vrcp.f32 %v1985_v43 }
 0x5bc   : > { %v2768_v45 = vpop.eup %2767 }
 0x5bd   : > { %v1987_v57 = vmul.f32 %v2768_v45, %v1984_v14 }
 0x5bf   : > { %v1994_v47 = vadd.f32 %v2479_v46, %v1987_v57 }
 0x5c1   : > { %v1995_v50 = vpack.c.bf16 %v1994_v47, %v1994_v47 }
 0x5c3   : > { %2616 = vmatmul.mubr.msk.bf16.vlgmr.msra.gmra.mrb[24].mxu0 %vm1074_vm9, %v1995_v50 }
 0x696   : > { %v2056_v19 = vpop.f32.mrb[24].mxu0 }
 0x697   : > { %v2057_v55 = vadd.f32 %v2480_v52, %v2056_v19  ;;  %v2617_v56 = vpop.f32.mrb[25].mxu0 }
 0x698   : > { %v2059_v58 = vpop.f32.mrb[26].mxu0 }
 0x699   : > { %v2062_v59 = vmax.f32 %v2057_v55, 0.0  ;;  %v2618_v53 = vpop.f32.mrb[27].mxu0 }
 0x69b   : > { %v2063_v48 = vpack.c.bf16 %v2062_v59, %v2062_v59 }
 0x69d   : > { %2636 = vmatmul.mubr.bf16.vlgmr.msra.gmra.mrb[16].mxu1 %v2063_v48 }
 0x770   : > { %v2169_v49 = vpop.f32.mrb[16].mxu1 }
 0x771   : > { %v2170_v54 = vadd.f32 %v2484_v26, %v2169_v49  ;;  %v2637_v60 = vpop.f32.mrb[17].mxu1 }
 0x772   : > { %v2172_v62 = vpop.f32.mrb[18].mxu1 }
 0x773   : > { %v2638_v61 = vpop.f32.mrb[19].mxu1  ;;  %v2175_v63 = vadd.f32 %v2170_v54, %v1994_v47 }
 0x775   : > { %v2178_v2 = vsel %vm1074_vm9, %v2175_v63, 0.0 }
 0x776   : > { %2179 = vadd.xlane.f32.xlu0 %v2178_v2 }
 0x803   : > { %v2180_v0 = vpop.xlane.xlu0 %2179 }
 0x804   : > { %v2181_v3 = vmul.f32 0.03125, %v2180_v0 }
 0x806   : > { %v2182_v5 = vsub.f32 %v2175_v63, %v2181_v3 }
 0x808   : > { %v2183_v6 = vmul.f32 %v2182_v5, %v2182_v5  ;;  %v2202_v17 = vmul.f32 %v2493_v20, %v2182_v5 }
 0x80a   : > { %v2184_v4 = vsel %vm1074_vm9, %v2183_v6, 0.0 }
 0x80b   : > { %2185 = vadd.xlane.f32.xlu0 %v2184_v4 }
 0x898   : > { %v2186_v7 = vpop.xlane.xlu0 %2185 }
 0x899   : > { %v2187_v8 = vmul.f32 0.032258064, %v2186_v7 }
 0x89b   : > { %v2188_v33 = vadd.f32 1e-06, %v2187_v8 }
 0x89d   : > { %2769 = vrsqrt.f32 %v2188_v33  ;;  %vm2191_vm5 = vcmp.eq.f32.partialorder %v2188_v33, inf  ;;  %v2194_v11 = vand.u32 2147483648, %v2188_v33  ;;  %vm2193_vm6 = vcmp.eq.f32.partialorder %v2188_v33, 0.0 }
 0x8a7   : > { %v2770_v9 = vpop.eup %2769 }
 0x8a8   : > { %v2190_v10 = vmul.f32 %v2770_v9, %v2188_v33 }
 0x8aa   : > { %v2192_v12 = vsel %vm2191_vm5, %v2188_v33, %v2190_v10 }
 0x8ab   : > { %v2195_v36 = vsel %vm2193_vm6, %v2194_v11, %v2192_v12 }
 0x8ac   : > { %v2203_v15 = vadd.f32 1e-06, %v2195_v36 }
 0x8ae   : > { %2771 = vrcp.f32 %v2203_v15 }
 0x8b8   : > { %v2772_v40 = vpop.eup %2771 }
 0x8b9   : > { %v2205_v21 = vmul.f32 %v2772_v40, %v2202_v17 }
 0x8bb   : > { %v2212_v22 = vadd.f32 %v2494_v18, %v2205_v21 }
 0x8bd   : > { %v2219_v24 = vmul.f32 %v2217_v23, %v2212_v22 }
 0x8bf   : > { %2220 = vst.msk [vmem:[%s855_s28] sm:$0xff] %vm1074_vm9, %v2219_v24 }
 0x8c0 PF: > { %s30_s23 = sadd.s32 1, %s2811_s23   ;;  %s3254_s5 = sld [smem:[#allocation2_spill]] }
 0x8c1   : > { %p27_p8 = scmp.ge.s32.totalorder %s30_s23, 6   ;;  %s3255_s1 = sld [smem:[#allocation3_spill]] }
 0x8c2   : > { %s3256_s21 = sld [smem:[#allocation4_spill]]  ;;  %s3257_s22 = sld [smem:[#allocation5_spill]] }
 0x8c3   :  { %29 = sbr.rel (!%p27_p8) target bundleno = 6 (0x6), region = 148 }

</bundles_post_ra>
